<compile_context>
chip_gen: v7x
topology: tpu7x:2x2x1
jax: 0.10.0
libtpu: 0.0.40
codegen_flags: <defaults>
</compile_context>

<pallas_src>
import jax
import jax.numpy as jnp
from jax import lax
from jax.experimental import pallas as pl
from jax.experimental.pallas import tpu as pltpu  # noqa: F401  (TPU backend)

EPS = 1e-5
BF16 = jnp.bfloat16
F32 = jnp.float32


# ----------------------------------------------------------------------------
# Pallas kernels
# ----------------------------------------------------------------------------
def _conv_pool_kernel(taps_ref, w_ref, shift_ref, o_ref):
    """Fused conv + folded-BN + ReLU + 2x2 maxpool as one lane-dense MXU dot.

    taps_ref : (K, 4*L) bf16  im2col taps; lane index = q*L + b*Ppad + p where
                              q is the pooling quadrant and Ppad is 128-aligned
    w_ref    : (Cout, K) bf16 conv weights with the BN scale folded in
    shift_ref: (Cout, 1) f32  conv bias + BN shift
    o_ref    : (Cout, L)      relu(max_q(w @ taps) + shift); L multiple of 128
    """
    y = jnp.dot(w_ref[...], taps_ref[...], preferred_element_type=jnp.float32)
    L = o_ref.shape[-1]
    # 2x2 maxpool == elementwise max of the four 128-aligned quadrant slices.
    z = jnp.maximum(jnp.maximum(y[:, 0 * L:1 * L], y[:, 1 * L:2 * L]),
                    jnp.maximum(y[:, 2 * L:3 * L], y[:, 3 * L:4 * L]))
    o_ref[...] = jnp.maximum(z + shift_ref[...], 0.0).astype(o_ref.dtype)


def _mlp_kernel(a_ref, w1_ref, b1_ref, w2_ref, b2_ref, o_ref):
    """Fused fc1 + ReLU + fc2 (dropout = inference identity).

    a_ref: (B, 1568) bf16, w1_ref: (1568, 600) bf16, b1_ref: (1, 600) f32,
    w2_ref: (600, 128) bf16 (N=10 zero-padded to 128 lanes), b2_ref: (1, 128) f32,
    o_ref: (B, 128) f32.
    """
    h = jnp.dot(a_ref[...], w1_ref[...], preferred_element_type=jnp.float32)
    h = jnp.maximum(h + b1_ref[...], 0.0)                       # f32 epilogue
    # TODO(synk): Dropout(p=0.5) is an inference-mode identity here.
    y = jnp.dot(h.astype(w2_ref.dtype), w2_ref[...],
                preferred_element_type=jnp.float32)
    o_ref[...] = (y + b2_ref[...]).astype(o_ref.dtype)


# ----------------------------------------------------------------------------
# pallas_call wrappers
# ----------------------------------------------------------------------------
def conv_pool(taps, w, shift, out_dtype):
    """taps: (K, 4*L) bf16, w: (Cout, K) bf16, shift: (Cout,1) f32 -> (Cout, L)."""
    K, L4 = taps.shape
    Cout = w.shape[0]
    L = L4 // 4
    flops = 2 * Cout * K * L4
    bytes_acc = int(taps.size * taps.dtype.itemsize
                    + w.size * w.dtype.itemsize
                    + shift.size * shift.dtype.itemsize
                    + Cout * L * jnp.dtype(out_dtype).itemsize)
    return pl.pallas_call(
        _conv_pool_kernel,
        out_shape=jax.ShapeDtypeStruct((Cout, L), out_dtype),
        grid=(1,),
        in_specs=[
            pl.BlockSpec((K, L4), lambda i: (0, 0)),
            pl.BlockSpec((Cout, K), lambda i: (0, 0)),
            pl.BlockSpec((Cout, 1), lambda i: (0, 0)),
        ],
        out_specs=pl.BlockSpec((Cout, L), lambda i: (0, 0)),
        cost_estimate=pl.CostEstimate(flops=flops, transcendentals=0,
                                      bytes_accessed=bytes_acc),
    )(taps, w, shift)


def mlp(a, w1, b1, w2, b2):
    """a: (B, K1) bf16, w1: (K1, N1) bf16, b1: (1, N1), w2: (N1, N2) bf16, b2: (1, N2)."""
    B, K1 = a.shape
    N1 = w1.shape[1]
    N2 = w2.shape[1]
    flops = 2 * B * (K1 * N1 + N1 * N2)
    bytes_acc = int(sum(v.size * v.dtype.itemsize for v in (a, w1, b1, w2, b2))
                    + B * N2 * 4)
    return pl.pallas_call(
        _mlp_kernel,
        out_shape=jax.ShapeDtypeStruct((B, N2), jnp.float32),
        grid=(1,),
        in_specs=[
            pl.BlockSpec(a.shape, lambda i: (0, 0)),
            pl.BlockSpec(w1.shape, lambda i: (0, 0)),
            pl.BlockSpec(b1.shape, lambda i: (0, 0)),
            pl.BlockSpec(w2.shape, lambda i: (0, 0)),
            pl.BlockSpec(b2.shape, lambda i: (0, 0)),
        ],
        out_specs=pl.BlockSpec((B, N2), lambda i: (0, 0)),
        cost_estimate=pl.CostEstimate(flops=flops, transcendentals=0,
                                      bytes_accessed=bytes_acc),
    )(a, w1, b1, w2, b2)


# ----------------------------------------------------------------------------
# Glue: lane-merged stride-2 tap extraction (fuses pool subsampling into
# im2col), parameter init, full forward.
# ----------------------------------------------------------------------------
def conv1_taps(x):
    """x: (B,1,28,28) f32 -> (9, 4*B*256) bf16 taps; lane = q*(B*256)+b*256+p."""
    B = x.shape[0]
    xp = jnp.pad(x[:, 0].astype(BF16), ((0, 0), (1, 1), (1, 1)))     # (B,30,30)
    shifted = jnp.stack([xp[:, kh:kh + 28, kw:kw + 28]
                         for kh in range(3) for kw in range(3)],
                        axis=0)                                       # (9,B,28,28)
    t = shifted.reshape(9, B, 14, 2, 14, 2)                     # [k,b,i,dp,j,dq]
    t = t.transpose(0, 3, 5, 1, 2, 4).reshape(9, 4, B, 196)     # [k,q,b,p]
    t = jnp.pad(t, ((0, 0), (0, 0), (0, 0), (0, 60)))           # p: 196 -> 256
    return t.reshape(9, 4 * B * 256)


def conv2_taps(a1):
    """a1: (B,8,14,14) bf16 -> (200, 4*B*64) bf16 taps.

    K ordering is (kh*5+kw)*8 + c, matching w2.transpose(0,2,3,1).reshape."""
    B = a1.shape[0]
    a1p = jnp.pad(a1, ((0, 0), (0, 0), (2, 2), (2, 2)))              # (B,8,18,18)
    shifted = jnp.stack([a1p[:, :, kh:kh + 14, kw:kw + 14]
                         for kh in range(5) for kw in range(5)],
                        axis=0)                                      # (25,B,8,14,14)
    t = shifted.reshape(25, B, 8, 7, 2, 7, 2)                  # [kf,b,c,i,dp,j,dq]
    t = t.transpose(0, 2, 4, 6, 1, 3, 5).reshape(200, 4, B, 49)  # [(kf,c),q,b,p]
    t = jnp.pad(t, ((0, 0), (0, 0), (0, 0), (0, 15)))          # p: 49 -> 64
    return t.reshape(200, 4 * B * 64)


def init_params(key):
    ks = jax.random.split(key, 16)
    p = {}
    # cnn1: Conv2d(1 -> 8, k=3, pad=1)
    p["w1"] = 0.10 * jax.random.normal(ks[0], (8, 1, 3, 3), F32)
    p["b1"] = 0.10 * jax.random.normal(ks[1], (8,), F32)
    # batch_norm1 (eval-mode running stats)
    p["bn1_gamma"] = 1.0 + 0.1 * jax.random.normal(ks[2], (8,), F32)
    p["bn1_beta"] = 0.1 * jax.random.normal(ks[3], (8,), F32)
    p["bn1_mean"] = 0.1 * jax.random.normal(ks[4], (8,), F32)
    p["bn1_var"] = jax.random.uniform(ks[5], (8,), F32, 0.5, 1.5)
    # cnn2: Conv2d(8 -> 32, k=5, pad=2)
    p["w2"] = 0.05 * jax.random.normal(ks[6], (32, 8, 5, 5), F32)
    p["b2"] = 0.10 * jax.random.normal(ks[7], (32,), F32)
    # batch_norm2
    p["bn2_gamma"] = 1.0 + 0.1 * jax.random.normal(ks[8], (32,), F32)
    p["bn2_beta"] = 0.1 * jax.random.normal(ks[9], (32,), F32)
    p["bn2_mean"] = 0.1 * jax.random.normal(ks[10], (32,), F32)
    p["bn2_var"] = jax.random.uniform(ks[11], (32,), F32, 0.5, 1.5)
    # fc1: Linear(1568 -> 600), fc2: Linear(600 -> 10)
    p["fc1_w"] = 0.02 * jax.random.normal(ks[12], (600, 1568), F32)
    p["fc1_b"] = 0.02 * jax.random.normal(ks[13], (600,), F32)
    p["fc2_w"] = 0.05 * jax.random.normal(ks[14], (10, 600), F32)
    p["fc2_b"] = 0.05 * jax.random.normal(ks[15], (10,), F32)
    return p


def digit_cnn_forward(params, x):
    """x: (B, 1, 28, 28) float32 -> logits (B, 10)."""
    B = x.shape[0]

    # ---- fold BatchNorm (inference, running stats) into conv weight + shift --
    s1 = params["bn1_gamma"] / jnp.sqrt(params["bn1_var"] + EPS)          # (8,)
    w1s = (params["w1"].reshape(8, 9) * s1[:, None]).astype(BF16)         # (8, 9)
    sh1 = (params["bn1_beta"]
           + (params["b1"] - params["bn1_mean"]) * s1).reshape(8, 1)
    s2 = params["bn2_gamma"] / jnp.sqrt(params["bn2_var"] + EPS)          # (32,)
    w2s = ((params["w2"] * s2[:, None, None, None])
           .transpose(0, 2, 3, 1).reshape(32, 200)).astype(BF16)          # (32, 200)
    sh2 = (params["bn2_beta"]
           + (params["b2"] - params["bn2_mean"]) * s2).reshape(32, 1)

    # ---- stage 1: conv1 + bn1 + relu + 2x2 maxpool ---------------------------
    t1 = conv1_taps(x)                                          # (9, 4*B*256) bf16
    o1 = conv_pool(t1, w1s, sh1, out_dtype=BF16)                # (8, B*256)
    a1 = (o1.reshape(8, B, 256)[:, :, :196]
            .transpose(1, 0, 2).reshape(B, 8, 14, 14))          # NCHW bf16

    # ---- stage 2: conv2 + bn2 + relu + 2x2 maxpool ---------------------------
    t2 = conv2_taps(a1)                                         # (200, 4*B*64) bf16
    o2 = conv_pool(t2, w2s, sh2, out_dtype=BF16)                # (32, B*64)
    # torch .view(-1, 1568) flatten order = c*49 + h*7 + w  (pad lanes removed)
    a2 = (o2.reshape(32, B, 64).transpose(1, 0, 2)[:, :, :49]
            .reshape(B, 1568))                                  # (B, 1568) bf16

    # ---- stage 3: fc1 + relu + (dropout=identity) + fc2 (N padded to 128) ----
    w_fc1 = params["fc1_w"].T.astype(BF16)                      # (1568, 600)
    b_fc1 = params["fc1_b"].reshape(1, 600)
    w_fc2 = (jnp.zeros((600, 128), F32).at[:, :10]
             .set(params["fc2_w"].T)).astype(BF16)              # (600, 128)
    b_fc2 = jnp.zeros((1, 128), F32).at[:, :10].set(params["fc2_b"])
    logits = mlp(a2, w_fc1, b_fc1, w_fc2, b_fc2)                # (B, 128) f32
    return logits[:, :10]


# ----------------------------------------------------------------------------
# Pure-JAX (XLA) reference for validation
# ----------------------------------------------------------------------------
def reference_forward(params, x):
    def conv(v, w, b, pad):
        y = lax.conv_general_dilated(
            v, w, window_strides=(1, 1), padding=[(pad, pad), (pad, pad)],
            dimension_numbers=("NCHW", "OIHW", "NCHW"))
        return y + b[None, :, None, None]

    def bn(v, g, be, m, var):
        return ((v - m[None, :, None, None])
                / jnp.sqrt(var[None, :, None, None] + EPS)
                * g[None, :, None, None] + be[None, :, None, None])

    def pool(v):
        return lax.reduce_window(v, -jnp.inf, lax.max,
                                 (1, 1, 2, 2), (1, 1, 2, 2), "VALID")

    out = jax.nn.relu(bn(conv(x, params["w1"], params["b1"], 1),
                         params["bn1_gamma"], params["bn1_beta"],
                         params["bn1_mean"], params["bn1_var"]))
    out = pool(out)
    out = jax.nn.relu(bn(conv(out, params["w2"], params["b2"], 2),
                         params["bn2_gamma"], params["bn2_beta"],
                         params["bn2_mean"], params["bn2_var"]))
    out = pool(out)
    out = out.reshape(x.shape[0], 1568)
    out = jax.nn.relu(out @ params["fc1_w"].T + params["fc1_b"])
    out = out @ params["fc2_w"].T + params["fc2_b"]
    return out


if __name__ == "__main__":
    key = jax.random.PRNGKey(0)
    pkey, xkey = jax.random.split(key)
    params = init_params(pkey)
    # MNIST-style input implied by fc1's in_features=1568 (=32*7*7): (B,1,28,28)
    x = jax.random.normal(xkey, (2, 1, 28, 28), jnp.float32)

    fwd = jax.jit(digit_cnn_forward)
    y = jax.block_until_ready(fwd(params, x))
    assert y.shape == (2, 10), y.shape

    y_ref = reference_forward(params, x)
    max_err = float(jnp.max(jnp.abs(y - y_ref)))
    # All MXU operands (conv1/conv2/fc1/fc2 + bf16 activations) are bf16 with
    # f32 accumulation -> small accumulated error vs the f32 XLA reference.
    assert max_err < 3e-2, f"Pallas vs XLA reference mismatch: {max_err}"

    print("KERNEL_OK")
</pallas_src>

<mosaic_0001>
module attributes {stable_mosaic.version = 11 : i64} {
  func.func @_conv_pool_kernel(%arg0: i32, %arg1: memref<9x2048xbf16, #tpu.memory_space<vmem>>, %arg2: memref<8x9xbf16, #tpu.memory_space<vmem>>, %arg3: memref<8x1xf32, #tpu.memory_space<vmem>>, %arg4: memref<8x512xbf16, #tpu.memory_space<vmem>>) attributes {dimension_semantics = [#tpu.dimension_semantics<arbitrary>], iteration_bounds = array<i64: 1>, scalar_prefetch = 0 : i64, scratch_operands = 0 : i64, tpu.core_type = #tpu.core_type<tc>, window_params = [{pipeline_mode = #tpu.pipeline_mode<synchronous>, transform_indices = @transform_0, window_bounds = array<i64: 9, 2048>}, {pipeline_mode = #tpu.pipeline_mode<synchronous>, transform_indices = @transform_1, window_bounds = array<i64: 8, 9>}, {pipeline_mode = #tpu.pipeline_mode<synchronous>, transform_indices = @transform_2, window_bounds = array<i64: 8, 1>}, {pipeline_mode = #tpu.pipeline_mode<synchronous>, transform_indices = @transform_3, window_bounds = array<i64: 8, 512>}]} {
    %c0 = arith.constant 0 : index
    %c0_0 = arith.constant 0 : index
    %0 = vector.load %arg2[%c0, %c0_0] : memref<8x9xbf16, #tpu.memory_space<vmem>>, vector<8x9xbf16>
    %c0_1 = arith.constant 0 : index
    %c0_2 = arith.constant 0 : index
    %1 = vector.load %arg1[%c0_1, %c0_2] : memref<9x2048xbf16, #tpu.memory_space<vmem>>, vector<9x2048xbf16>
    %cst = arith.constant dense<0.000000e+00> : vector<8x2048xf32>
    %2 = tpu.matmul %0, %1, %cst {dimension_numbers = #tpu.dot_dimension_numbers<[1], [0], [0], [1], [0, 0, 1, 1], [], []>} : vector<8x9xbf16>, vector<9x2048xbf16>, vector<8x2048xf32> -> vector<8x2048xf32>
    %3 = vector.extract_strided_slice %2 {offsets = [0, 0], sizes = [8, 512], strides = [1, 1]} : vector<8x2048xf32> to vector<8x512xf32>
    %4 = vector.extract_strided_slice %2 {offsets = [0, 512], sizes = [8, 512], strides = [1, 1]} : vector<8x2048xf32> to vector<8x512xf32>
    %5 = arith.maximumf %3, %4 : vector<8x512xf32>
    %6 = vector.extract_strided_slice %2 {offsets = [0, 1024], sizes = [8, 512], strides = [1, 1]} : vector<8x2048xf32> to vector<8x512xf32>
    %7 = vector.extract_strided_slice %2 {offsets = [0, 1536], sizes = [8, 512], strides = [1, 1]} : vector<8x2048xf32> to vector<8x512xf32>
    %8 = arith.maximumf %6, %7 : vector<8x512xf32>
    %9 = arith.maximumf %5, %8 : vector<8x512xf32>
    %c0_3 = arith.constant 0 : index
    %c0_4 = arith.constant 0 : index
    %10 = vector.load %arg3[%c0_3, %c0_4] : memref<8x1xf32, #tpu.memory_space<vmem>>, vector<8x1xf32>
    %11 = vector.broadcast %10 : vector<8x1xf32> to vector<8x512xf32>
    %12 = arith.addf %9, %11 : vector<8x512xf32>
    %cst_5 = arith.constant 0.000000e+00 : f32
    %13 = vector.broadcast %cst_5 : f32 to vector<8x512xf32>
    %14 = arith.maximumf %12, %13 : vector<8x512xf32>
    %15 = arith.truncf %14 : vector<8x512xf32> to vector<8x512xbf16>
    %c0_6 = arith.constant 0 : index
    %c0_7 = arith.constant 0 : index
    %16 = vector.load %arg4[%c0_6, %c0_7] : memref<8x512xbf16, #tpu.memory_space<vmem>>, vector<8x512xbf16>
    tpu.vector_store %arg4[%c0_6, %c0_7], %15 {strides = array<i32>} : memref<8x512xbf16, #tpu.memory_space<vmem>>, vector<8x512xbf16>,
    return
  }
  func.func @transform_0(%arg0: i32) -> (i32, i32) {
    %c0_i32 = arith.constant 0 : i32
    %c0_i32_0 = arith.constant 0 : i32
    %c0_i32_1 = arith.constant 0 : i32
    return %c0_i32, %c0_i32_0 : i32, i32
  }
  func.func @transform_1(%arg0: i32) -> (i32, i32) {
    %c0_i32 = arith.constant 0 : i32
    %c0_i32_0 = arith.constant 0 : i32
    %c0_i32_1 = arith.constant 0 : i32
    return %c0_i32, %c0_i32_0 : i32, i32
  }
  func.func @transform_2(%arg0: i32) -> (i32, i32) {
    %c0_i32 = arith.constant 0 : i32
    %c0_i32_0 = arith.constant 0 : i32
    %c0_i32_1 = arith.constant 0 : i32
    return %c0_i32, %c0_i32_0 : i32, i32
  }
  func.func @transform_3(%arg0: i32) -> (i32, i32) {
    %c0_i32 = arith.constant 0 : i32
    %c0_i32_0 = arith.constant 0 : i32
    %c0_i32_1 = arith.constant 0 : i32
    return %c0_i32, %c0_i32_0 : i32, i32
  }
}

module attributes {stable_mosaic.version = 11 : i64} {
  func.func @_conv_pool_kernel(%arg0: i32, %arg1: memref<200x512xbf16, #tpu.memory_space<vmem>>, %arg2: memref<32x200xbf16, #tpu.memory_space<vmem>>, %arg3: memref<32x1xf32, #tpu.memory_space<vmem>>, %arg4: memref<32x128xbf16, #tpu.memory_space<vmem>>) attributes {dimension_semantics = [#tpu.dimension_semantics<arbitrary>], iteration_bounds = array<i64: 1>, scalar_prefetch = 0 : i64, scratch_operands = 0 : i64, tpu.core_type = #tpu.core_type<tc>, window_params = [{pipeline_mode = #tpu.pipeline_mode<synchronous>, transform_indices = @transform_0, window_bounds = array<i64: 200, 512>}, {pipeline_mode = #tpu.pipeline_mode<synchronous>, transform_indices = @transform_1, window_bounds = array<i64: 32, 200>}, {pipeline_mode = #tpu.pipeline_mode<synchronous>, transform_indices = @transform_2, window_bounds = array<i64: 32, 1>}, {pipeline_mode = #tpu.pipeline_mode<synchronous>, transform_indices = @transform_3, window_bounds = array<i64: 32, 128>}]} {
    %c0 = arith.constant 0 : index
    %c0_0 = arith.constant 0 : index
    %0 = vector.load %arg2[%c0, %c0_0] : memref<32x200xbf16, #tpu.memory_space<vmem>>, vector<32x200xbf16>
    %c0_1 = arith.constant 0 : index
    %c0_2 = arith.constant 0 : index
    %1 = vector.load %arg1[%c0_1, %c0_2] : memref<200x512xbf16, #tpu.memory_space<vmem>>, vector<200x512xbf16>
    %cst = arith.constant dense<0.000000e+00> : vector<32x512xf32>
    %2 = tpu.matmul %0, %1, %cst {dimension_numbers = #tpu.dot_dimension_numbers<[1], [0], [0], [1], [0, 0, 1, 1], [], []>} : vector<32x200xbf16>, vector<200x512xbf16>, vector<32x512xf32> -> vector<32x512xf32>
    %3 = vector.extract_strided_slice %2 {offsets = [0, 0], sizes = [32, 128], strides = [1, 1]} : vector<32x512xf32> to vector<32x128xf32>
    %4 = vector.extract_strided_slice %2 {offsets = [0, 128], sizes = [32, 128], strides = [1, 1]} : vector<32x512xf32> to vector<32x128xf32>
    %5 = arith.maximumf %3, %4 : vector<32x128xf32>
    %6 = vector.extract_strided_slice %2 {offsets = [0, 256], sizes = [32, 128], strides = [1, 1]} : vector<32x512xf32> to vector<32x128xf32>
    %7 = vector.extract_strided_slice %2 {offsets = [0, 384], sizes = [32, 128], strides = [1, 1]} : vector<32x512xf32> to vector<32x128xf32>
    %8 = arith.maximumf %6, %7 : vector<32x128xf32>
    %9 = arith.maximumf %5, %8 : vector<32x128xf32>
    %c0_3 = arith.constant 0 : index
    %c0_4 = arith.constant 0 : index
    %10 = vector.load %arg3[%c0_3, %c0_4] : memref<32x1xf32, #tpu.memory_space<vmem>>, vector<32x1xf32>
    %11 = vector.broadcast %10 : vector<32x1xf32> to vector<32x128xf32>
    %12 = arith.addf %9, %11 : vector<32x128xf32>
    %cst_5 = arith.constant 0.000000e+00 : f32
    %13 = vector.broadcast %cst_5 : f32 to vector<32x128xf32>
    %14 = arith.maximumf %12, %13 : vector<32x128xf32>
    %15 = arith.truncf %14 : vector<32x128xf32> to vector<32x128xbf16>
    %c0_6 = arith.constant 0 : index
    %c0_7 = arith.constant 0 : index
    %16 = vector.load %arg4[%c0_6, %c0_7] : memref<32x128xbf16, #tpu.memory_space<vmem>>, vector<32x128xbf16>
    tpu.vector_store %arg4[%c0_6, %c0_7], %15 {strides = array<i32>} : memref<32x128xbf16, #tpu.memory_space<vmem>>, vector<32x128xbf16>,
    return
  }
  func.func @transform_0(%arg0: i32) -> (i32, i32) {
    %c0_i32 = arith.constant 0 : i32
    %c0_i32_0 = arith.constant 0 : i32
    %c0_i32_1 = arith.constant 0 : i32
    return %c0_i32, %c0_i32_0 : i32, i32
  }
  func.func @transform_1(%arg0: i32) -> (i32, i32) {
    %c0_i32 = arith.constant 0 : i32
    %c0_i32_0 = arith.constant 0 : i32
    %c0_i32_1 = arith.constant 0 : i32
    return %c0_i32, %c0_i32_0 : i32, i32
  }
  func.func @transform_2(%arg0: i32) -> (i32, i32) {
    %c0_i32 = arith.constant 0 : i32
    %c0_i32_0 = arith.constant 0 : i32
    %c0_i32_1 = arith.constant 0 : i32
    return %c0_i32, %c0_i32_0 : i32, i32
  }
  func.func @transform_3(%arg0: i32) -> (i32, i32) {
    %c0_i32 = arith.constant 0 : i32
    %c0_i32_0 = arith.constant 0 : i32
    %c0_i32_1 = arith.constant 0 : i32
    return %c0_i32, %c0_i32_0 : i32, i32
  }
}

module attributes {stable_mosaic.version = 11 : i64} {
  func.func @_mlp_kernel(%arg0: i32, %arg1: memref<2x1568xbf16, #tpu.memory_space<vmem>>, %arg2: memref<1568x600xbf16, #tpu.memory_space<vmem>>, %arg3: memref<1x600xf32, #tpu.memory_space<vmem>>, %arg4: memref<600x128xbf16, #tpu.memory_space<vmem>>, %arg5: memref<1x128xf32, #tpu.memory_space<vmem>>, %arg6: memref<2x128xf32, #tpu.memory_space<vmem>>) attributes {dimension_semantics = [#tpu.dimension_semantics<arbitrary>], iteration_bounds = array<i64: 1>, scalar_prefetch = 0 : i64, scratch_operands = 0 : i64, tpu.core_type = #tpu.core_type<tc>, window_params = [{pipeline_mode = #tpu.pipeline_mode<synchronous>, transform_indices = @transform_0, window_bounds = array<i64: 2, 1568>}, {pipeline_mode = #tpu.pipeline_mode<synchronous>, transform_indices = @transform_1, window_bounds = array<i64: 1568, 600>}, {pipeline_mode = #tpu.pipeline_mode<synchronous>, transform_indices = @transform_2, window_bounds = array<i64: 1, 600>}, {pipeline_mode = #tpu.pipeline_mode<synchronous>, transform_indices = @transform_3, window_bounds = array<i64: 600, 128>}, {pipeline_mode = #tpu.pipeline_mode<synchronous>, transform_indices = @transform_4, window_bounds = array<i64: 1, 128>}, {pipeline_mode = #tpu.pipeline_mode<synchronous>, transform_indices = @transform_5, window_bounds = array<i64: 2, 128>}]} {
    %c0 = arith.constant 0 : index
    %c0_0 = arith.constant 0 : index
    %0 = vector.load %arg1[%c0, %c0_0] : memref<2x1568xbf16, #tpu.memory_space<vmem>>, vector<2x1568xbf16>
    %c0_1 = arith.constant 0 : index
    %c0_2 = arith.constant 0 : index
    %1 = vector.load %arg2[%c0_1, %c0_2] : memref<1568x600xbf16, #tpu.memory_space<vmem>>, vector<1568x600xbf16>
    %cst = arith.constant dense<0.000000e+00> : vector<2x600xf32>
    %2 = tpu.matmul %0, %1, %cst {dimension_numbers = #tpu.dot_dimension_numbers<[1], [0], [0], [1], [0, 0, 1, 1], [], []>} : vector<2x1568xbf16>, vector<1568x600xbf16>, vector<2x600xf32> -> vector<2x600xf32>
    %c0_3 = arith.constant 0 : index
    %c0_4 = arith.constant 0 : index
    %3 = vector.load %arg3[%c0_3, %c0_4] : memref<1x600xf32, #tpu.memory_space<vmem>>, vector<1x600xf32>
    %4 = vector.broadcast %3 : vector<1x600xf32> to vector<2x600xf32>
    %5 = arith.addf %2, %4 : vector<2x600xf32>
    %cst_5 = arith.constant 0.000000e+00 : f32
    %6 = vector.broadcast %cst_5 : f32 to vector<2x600xf32>
    %7 = arith.maximumf %5, %6 : vector<2x600xf32>
    %8 = arith.truncf %7 : vector<2x600xf32> to vector<2x600xbf16>
    %c0_6 = arith.constant 0 : index
    %c0_7 = arith.constant 0 : index
    %9 = vector.load %arg4[%c0_6, %c0_7] : memref<600x128xbf16, #tpu.memory_space<vmem>>, vector<600x128xbf16>
    %cst_8 = arith.constant dense<0.000000e+00> : vector<2x128xf32>
    %10 = tpu.matmul %8, %9, %cst_8 {dimension_numbers = #tpu.dot_dimension_numbers<[1], [0], [0], [1], [0, 0, 1, 1], [], []>} : vector<2x600xbf16>, vector<600x128xbf16>, vector<2x128xf32> -> vector<2x128xf32>
    %c0_9 = arith.constant 0 : index
    %c0_10 = arith.constant 0 : index
    %11 = vector.load %arg5[%c0_9, %c0_10] : memref<1x128xf32, #tpu.memory_space<vmem>>, vector<1x128xf32>
    %12 = vector.broadcast %11 : vector<1x128xf32> to vector<2x128xf32>
    %13 = arith.addf %10, %12 : vector<2x128xf32>
    %c0_11 = arith.constant 0 : index
    %c0_12 = arith.constant 0 : index
    %14 = vector.load %arg6[%c0_11, %c0_12] : memref<2x128xf32, #tpu.memory_space<vmem>>, vector<2x128xf32>
    tpu.vector_store %arg6[%c0_11, %c0_12], %13 {strides = array<i32>} : memref<2x128xf32, #tpu.memory_space<vmem>>, vector<2x128xf32>,
    return
  }
  func.func @transform_0(%arg0: i32) -> (i32, i32) {
    %c0_i32 = arith.constant 0 : i32
    %c0_i32_0 = arith.constant 0 : i32
    %c0_i32_1 = arith.constant 0 : i32
    return %c0_i32, %c0_i32_0 : i32, i32
  }
  func.func @transform_1(%arg0: i32) -> (i32, i32) {
    %c0_i32 = arith.constant 0 : i32
    %c0_i32_0 = arith.constant 0 : i32
    %c0_i32_1 = arith.constant 0 : i32
    return %c0_i32, %c0_i32_0 : i32, i32
  }
  func.func @transform_2(%arg0: i32) -> (i32, i32) {
    %c0_i32 = arith.constant 0 : i32
    %c0_i32_0 = arith.constant 0 : i32
    %c0_i32_1 = arith.constant 0 : i32
    return %c0_i32, %c0_i32_0 : i32, i32
  }
  func.func @transform_3(%arg0: i32) -> (i32, i32) {
    %c0_i32 = arith.constant 0 : i32
    %c0_i32_0 = arith.constant 0 : i32
    %c0_i32_1 = arith.constant 0 : i32
    return %c0_i32, %c0_i32_0 : i32, i32
  }
  func.func @transform_4(%arg0: i32) -> (i32, i32) {
    %c0_i32 = arith.constant 0 : i32
    %c0_i32_0 = arith.constant 0 : i32
    %c0_i32_1 = arith.constant 0 : i32
    return %c0_i32, %c0_i32_0 : i32, i32
  }
  func.func @transform_5(%arg0: i32) -> (i32, i32) {
    %c0_i32 = arith.constant 0 : i32
    %c0_i32_0 = arith.constant 0 : i32
    %c0_i32_1 = arith.constant 0 : i32
    return %c0_i32, %c0_i32_0 : i32, i32
  }
}

</mosaic_0001>

<bundles_post_ra>
// kernel: digit_cnn_forward.3
= control target key start
LH: loop header
LB: loop body
LE: loop exit
PB: predicated region body
PF: predicated region fallthrough
CT: control target
= control target key end

     0   :  { %vm100_vm0 = vcmask 1043456   ;;  %vm101_vm1 = vcmask 1044480   ;;  %v559_v2 = vmov 65535   ;;  %v560_v5 = vmov 0   ;;  %s676_s0 = inlined_call_operand.vmem [shape: bf16[9,2048], index: 0, kind: input, shape index: {}]   ;;  %s677_s1 = inlined_call_operand.vmem [shape: bf16[8,9], index: 1, kind: input, shape index: {}]   ;;  %s678_s2 = inlined_call_operand.vmem [shape: f32[8,1], index: 2, kind: input, shape index: {}]   ;;  %s679_s3 = inlined_call_operand.vmem [shape: bf16[8,512], index: 3, kind: output, shape index: {}]  }
   0x1   :  { %v16_v0 = vld [vmem:[%s676_s0] sm:$0xff]  ;;  %v102_v3 = vsel %vm100_vm0, 4294967295, %v559_v2  ;;  %v17_v4 = vld [vmem:[%s676_s0 + $0x8] sm:$0xff]  ;;  %184 = vmatprep.mubr.bf16.mxu0 %v560_v5  ;;  %225 = vmatprep.mubr.bf16.mxu1 %v560_v5  ;;  %v18_v10 = vld [vmem:[%s676_s0 + $0x10] sm:$0xff]  ;;  %vm96_vm2 = vcmask 72704  }
   0x2   :  { %v24_v1 = vld [vmem:[%s676_s0 + $0x40] sm:$0x11]  ;;  %v592_v7 = vsel %vm101_vm1, %v102_v3, 0  ;;  %v25_v8 = vld [vmem:[%s676_s0 + $0x48] sm:$0x11]  ;;  %558 = vset.pattern.permute.xlu0 %v560_v5  ;;  %v19_v14 = vld [vmem:[%s676_s0 + $0x18] sm:$0xff] }
   0x3   :  { %v529_v6 = vcombine.high %v16_v0, %v24_v1  ;;  %v528_v9 = vcombine.low %v16_v0, %v24_v1  ;;  %v531_v11 = vcombine.high %v17_v4, %v25_v8  ;;  %v530_v12 = vcombine.low %v17_v4, %v25_v8  ;;  %v26_v13 = vld [vmem:[%s676_s0 + $0x50] sm:$0x11]  ;;  %v27_v15 = vld [vmem:[%s676_s0 + $0x58] sm:$0x11]  ;;  %v20_v20 = vld [vmem:[%s676_s0 + $0x20] sm:$0xff] }
   0x4   :  { %v532_v18 = vcombine.low %v18_v10, %v26_v13  ;;  %v533_v19 = vcombine.high %v18_v10, %v26_v13  ;;  %v28_v21 = vld [vmem:[%s676_s0 + $0x60] sm:$0x11]  ;;  %v534_v24 = vcombine.low %v19_v14, %v27_v15  ;;  %v535_v25 = vcombine.high %v19_v14, %v27_v15  ;;  %v21_v26 = vld [vmem:[%s676_s0 + $0x28] sm:$0xff]  ;;  %v22_v38 = vld [vmem:[%s676_s0 + $0x30] sm:$0xff] }
   0x5   :  { %v108_v16 = vand.u32 %v529_v6, %v592_v7  ;;  %v105_v17 = vand.u32 %v528_v9, %v592_v7  ;;  %v114_v22 = vand.u32 %v531_v11, %v592_v7  ;;  %v111_v23 = vand.u32 %v530_v12, %v592_v7  ;;  %v29_v27 = vld [vmem:[%s676_s0 + $0x68] sm:$0x11]  ;;  %v15_v30 = vld [vmem:[%s677_s1] sm:$0xf]  ;;  %v30_v39 = vld [vmem:[%s676_s0 + $0x70] sm:$0x11] }
   0x6   :  { %v120_v28 = vand.u32 %v533_v19, %v592_v7  ;;  %v537_v29 = vcombine.high %v20_v20, %v28_v21  ;;  %v126_v31 = vand.u32 %v535_v25, %v592_v7  ;;  %v117_v32 = vand.u32 %v532_v18, %v592_v7  ;;  %v492_v33 = vld [vmem:[%s678_s2] sm:$0xff]  ;;  %v23_v41 = vld [vmem:[%s676_s0 + $0x38] sm:$0xff] }
   0x7   :  { %152 = vmatprep.subr.bf16.mxu0 %v108_v16  ;;  %193 = vmatprep.subr.bf16.mxu1 %v114_v22  ;;  %v123_v34 = vand.u32 %v534_v24, %v592_v7  ;;  %v539_v35 = vcombine.high %v21_v26, %v29_v27  ;;  %v536_v40 = vcombine.low %v20_v20, %v28_v21  ;;  %v31_v42 = vld [vmem:[%s676_s0 + $0x78] sm:$0x11] }
   0x8   :  { %153 = vmatpush1.bf16.msra.mxu0 %v105_v17  ;;  %194 = vmatpush1.bf16.msra.mxu1 %v111_v23  ;;  %v132_v36 = vand.u32 %v537_v29, %v592_v7  ;;  %v538_v43 = vcombine.low %v21_v26, %v29_v27  ;;  %v541_v44 = vcombine.high %v22_v38, %v30_v39 }
   0x9   :  { %234 = vmatprep.subr.bf16.mxu0 %v120_v28  ;;  %275 = vmatprep.subr.bf16.mxu1 %v126_v31  ;;  %v138_v37 = vand.u32 %v539_v35, %v592_v7  ;;  %v543_v45 = vcombine.high %v23_v41, %v31_v42  ;;  %v129_v46 = vand.u32 %v536_v40, %v592_v7 }
   0xa   :  { %495 = vperm.xlu0 %558, %v492_v33   ;;  %v135_v47 = vand.u32 %v538_v43, %v592_v7  ;;  %v144_v48 = vand.u32 %v541_v44, %v592_v7  ;;  %v540_v50 = vcombine.low %v22_v38, %v30_v39  ;;  %v542_v51 = vcombine.low %v23_v41, %v31_v42 }
   0xb   :  { %544 = vmatmul.mubr.msk.bf16.vlgmr.msra.gmra.mrb[0].mxu0 %vm96_vm2, %v15_v30  ;;  %545 = vmatmul.mubr.msk.bf16.vlgmr.msra.gmra.mrb[0].mxu1 %vm96_vm2, %v15_v30  ;;  %v150_v49 = vand.u32 %v543_v45, %v592_v7 }
   0xc   :  { %235 = vmatpush1.bf16.msra.mxu0 %v117_v32  ;;  %276 = vmatpush1.bf16.msra.mxu1 %v123_v34  ;;  %v141_v52 = vand.u32 %v540_v50, %v592_v7  ;;  %v147_v53 = vand.u32 %v542_v51, %v592_v7 }
   0xd   :  { %266 = vmatprep.mubr.bf16.mxu0 %v560_v5  ;;  %307 = vmatprep.mubr.bf16.mxu1 %v560_v5 }
   0xe   :  { %316 = vmatprep.subr.bf16.mxu0 %v132_v36  ;;  %357 = vmatprep.subr.bf16.mxu1 %v138_v37 }
  0x13   :  { %546 = vmatmul.mubr.msk.bf16.vlgmr.msra.gmra.mrb[4].mxu0 %vm96_vm2, %v15_v30  ;;  %547 = vmatmul.mubr.msk.bf16.vlgmr.msra.gmra.mrb[4].mxu1 %vm96_vm2, %v15_v30 }
  0x14   :  { %317 = vmatpush1.bf16.msra.mxu0 %v129_v46  ;;  %358 = vmatpush1.bf16.msra.mxu1 %v135_v47 }
  0x15   :  { %348 = vmatprep.mubr.bf16.mxu0 %v560_v5  ;;  %389 = vmatprep.mubr.bf16.mxu1 %v560_v5 }
  0x16   :  { %398 = vmatprep.subr.bf16.mxu0 %v144_v48  ;;  %439 = vmatprep.subr.bf16.mxu1 %v150_v49 }
  0x1b   :  { %548 = vmatmul.mubr.msk.bf16.vlgmr.msra.gmra.mrb[8].mxu0 %vm96_vm2, %v15_v30  ;;  %549 = vmatmul.mubr.msk.bf16.vlgmr.msra.gmra.mrb[8].mxu1 %vm96_vm2, %v15_v30 }
  0x1c   :  { %399 = vmatpush1.bf16.msra.mxu0 %v141_v52  ;;  %440 = vmatpush1.bf16.msra.mxu1 %v147_v53 }
  0x1d   :  { %430 = vmatprep.mubr.bf16.mxu0 %v560_v5  ;;  %471 = vmatprep.mubr.bf16.mxu1 %v560_v5 }
  0x23   :  { %550 = vmatmul.mubr.msk.bf16.vlgmr.msra.gmra.mrb[12].mxu0 %vm96_vm2, %v15_v30  ;;  %551 = vmatmul.mubr.msk.bf16.vlgmr.msra.gmra.mrb[12].mxu1 %vm96_vm2, %v15_v30 }
  0x89   :  { %v496_v19 = vpop.permute.xlu0 %495 }
  0xde   :  { %v186_v54 = vpop.f32.mrb[0].mxu0  ;;  %v227_v55 = vpop.f32.mrb[0].mxu1 }
  0xdf   :  { %v188_v56 = vpop.f32.mrb[1].mxu0  ;;  %v229_v57 = vpop.f32.mrb[1].mxu1 }
  0xe0   :  { %v190_v58 = vpop.f32.mrb[2].mxu0  ;;  %v231_v59 = vpop.f32.mrb[2].mxu1 }
  0xe1   :  { %v191_v60 = vpop.f32.mrb[3].mxu0  ;;  %v232_v61 = vpop.f32.mrb[3].mxu1 }
  0xe6   :  { %v268_v62 = vpop.f32.mrb[4].mxu0  ;;  %v309_v0 = vpop.f32.mrb[4].mxu1 }
  0xe7   :  { %v480_v63 = vmax.f32 %v186_v54, %v268_v62  ;;  %v270_v1 = vpop.f32.mrb[5].mxu0  ;;  %v482_v2 = vmax.f32 %v227_v55, %v309_v0  ;;  %v311_v4 = vpop.f32.mrb[5].mxu1 }
  0xe8   :  { %v481_v3 = vmax.f32 %v188_v56, %v270_v1  ;;  %v272_v5 = vpop.f32.mrb[6].mxu0  ;;  %v483_v6 = vmax.f32 %v229_v57, %v311_v4  ;;  %v313_v7 = vpop.f32.mrb[6].mxu1 }
  0xe9   :  { %v273_v8 = vpop.f32.mrb[7].mxu0  ;;  %v314_v9 = vpop.f32.mrb[7].mxu1 }
  0xee   :  { %v350_v10 = vpop.f32.mrb[8].mxu0  ;;  %v391_v11 = vpop.f32.mrb[8].mxu1 }
  0xef   :  { %v352_v12 = vpop.f32.mrb[9].mxu0  ;;  %v393_v13 = vpop.f32.mrb[9].mxu1 }
  0xf0   :  { %v354_v14 = vpop.f32.mrb[10].mxu0  ;;  %v395_v15 = vpop.f32.mrb[10].mxu1 }
  0xf1   :  { %v355_v16 = vpop.f32.mrb[11].mxu0  ;;  %v396_v17 = vpop.f32.mrb[11].mxu1 }
  0xf6   :  { %v432_v18 = vpop.f32.mrb[12].mxu0  ;;  %v473_v21 = vpop.f32.mrb[12].mxu1 }
  0xf7   :  { %v484_v20 = vmax.f32 %v350_v10, %v432_v18  ;;  %v434_v22 = vpop.f32.mrb[13].mxu0  ;;  %v486_v23 = vmax.f32 %v391_v11, %v473_v21  ;;  %v475_v25 = vpop.f32.mrb[13].mxu1 }
  0xf8   :  { %v485_v24 = vmax.f32 %v352_v12, %v434_v22  ;;  %v436_v26 = vpop.f32.mrb[14].mxu0  ;;  %v487_v28 = vmax.f32 %v393_v13, %v475_v25  ;;  %v477_v29 = vpop.f32.mrb[14].mxu1 }
  0xf9   :  { %v488_v27 = vmax.f32 %v480_v63, %v484_v20  ;;  %v437_v30 = vpop.f32.mrb[15].mxu0  ;;  %v490_v31 = vmax.f32 %v482_v2, %v486_v23  ;;  %v478_v33 = vpop.f32.mrb[15].mxu1 }
  0xfa   :  { %v489_v32 = vmax.f32 %v481_v3, %v485_v24  ;;  %v491_v34 = vmax.f32 %v483_v6, %v487_v28 }
  0xfb   :  { %v498_v35 = vadd.f32 %v496_v19, %v488_v27  ;;  %v500_v37 = vadd.f32 %v496_v19, %v490_v31 }
  0xfc   :  { %v499_v36 = vadd.f32 %v496_v19, %v489_v32  ;;  %v501_v38 = vadd.f32 %v496_v19, %v491_v34 }
  0xfd   :  { %v502_v39 = vmax.f32 %v498_v35, 0.0  ;;  %v504_v41 = vmax.f32 %v500_v37, 0.0 }
  0xfe   :  { %v503_v40 = vmax.f32 %v499_v36, 0.0  ;;  %v505_v42 = vmax.f32 %v501_v38, 0.0 }
 0x100   :  { %v554_v43 = vpack.c.bf16 %v503_v40, %v502_v39  ;;  %v555_v44 = vpack.c.bf16 %v505_v42, %v504_v41 }
 0x102   :  { %522 = vst [vmem:[%s679_s3] sm:$0xff] %v554_v43  ;;  %523 = vst [vmem:[%s679_s3 + $0x8] sm:$0xff] %v555_v44 }

// kernel: digit_cnn_forward.4
= control target key start
LH: loop header
LB: loop body
LE: loop exit
PB: predicated region body
PF: predicated region fallthrough
CT: control target
= control target key end

     0   :  { %v697_v1 = vmov 0   ;;  %vm337_vm0 = vcmask 588800   ;;  %vm344_vm1 = vcmask 1043456   ;;  %s902_s0 = inlined_call_operand.vmem [shape: bf16[200,512], index: 0, kind: input, shape index: {}]   ;;  %s903_s1 = inlined_call_operand.vmem [shape: bf16[32,200], index: 1, kind: input, shape index: {}]   ;;  %s904_s2 = inlined_call_operand.vmem [shape: f32[32,1], index: 2, kind: input, shape index: {}]   ;;  %s905_s3 = inlined_call_operand.vmem [shape: bf16[32,128], index: 3, kind: output, shape index: {}]  }
   0x1   :  { %v615_v0 = vld [vmem:[%s902_s0 + $0x4] ss:$16 sps:$4 sm:$0xff]   ;;  %613 = vset.pattern.permute.xlu0 %v697_v1  ;;  %614 = vset.pattern.permute.xlu1 %v697_v1  ;;  %v617_v2 = vld [vmem:[%s902_s0 + $0xc] ss:$16 sps:$4 sm:$0xff]   ;;  %v619_v3 = vld [vmem:[%s902_s0] ss:$16 sps:$4 sm:$0xff]  }
   0x2   :  { %357 = vmatprep.subr.bf16.mxu0 %v615_v0  ;;  %v620_v4 = vld [vmem:[%s902_s0 + $0x8] ss:$16 sps:$4 sm:$0xff]   ;;  %410 = vmatprep.subr.bf16.mxu1 %v617_v2  ;;  %v621_v5 = vld [vmem:[%s902_s0 + $0x24] ss:$16 sps:$4 sm:$0xff]   ;;  %v623_v6 = vld [vmem:[%s902_s0 + $0x2c] ss:$16 sps:$4 sm:$0xff]  }
   0x3   :  { %358 = vmatpush1.bf16.msra.mxu0 %v619_v3  ;;  %411 = vmatpush1.bf16.msra.mxu1 %v620_v4  ;;  %v625_v7 = vld [vmem:[%s902_s0 + $0x20] ss:$16 sps:$4 sm:$0xff]   ;;  %v626_v8 = vld [vmem:[%s902_s0 + $0x28] ss:$16 sps:$4 sm:$0xff]   ;;  %v627_v9 = vld [vmem:[%s902_s0 + $0x44] ss:$16 sps:$4 sm:$0xff]  }
   0x4   :  { %359 = vmatprep.subr.bf16.mxu0 %v621_v5  ;;  %412 = vmatprep.subr.bf16.mxu1 %v623_v6  ;;  %v629_v10 = vld [vmem:[%s902_s0 + $0x4c] ss:$16 sps:$4 sm:$0xff]   ;;  %v631_v11 = vld [vmem:[%s902_s0 + $0x40] ss:$16 sps:$4 sm:$0xff]   ;;  %v632_v12 = vld [vmem:[%s902_s0 + $0x48] ss:$16 sps:$4 sm:$0xff]  }
   0x5   :  { %v633_v13 = vld [vmem:[%s902_s0 + $0x64] ss:$16 sps:$4 sm:$0xff]   ;;  %v635_v14 = vld [vmem:[%s902_s0 + $0x6c] ss:$16 sps:$4 sm:$0xff]   ;;  %v637_v15 = vld [vmem:[%s902_s0 + $0x60] ss:$16 sps:$4 sm:$0xff]  }
   0x6   :  { %v638_v16 = vld [vmem:[%s902_s0 + $0x68] ss:$16 sps:$4 sm:$0xff]   ;;  %v639_v17 = vld [vmem:[%s902_s0 + $0x84] ss:$16 sps:$4 sm:$0xff]   ;;  %v641_v18 = vld [vmem:[%s902_s0 + $0x8c] ss:$16 sps:$4 sm:$0xff]  }
   0x7   :  { %360 = vmatpush1.bf16.msra.mxu0 %v625_v7  ;;  %413 = vmatpush1.bf16.msra.mxu1 %v626_v8  ;;  %v643_v19 = vld [vmem:[%s902_s0 + $0x80] ss:$16 sps:$4 sm:$0xff]   ;;  %v644_v20 = vld [vmem:[%s902_s0 + $0x88] ss:$16 sps:$4 sm:$0xff]   ;;  %v645_v21 = vld [vmem:[%s902_s0 + $0xa4] ss:$16 sps:$4 sm:$0xff]  }
   0x8   :  { %361 = vmatprep.subr.bf16.mxu0 %v627_v9  ;;  %414 = vmatprep.subr.bf16.mxu1 %v629_v10  ;;  %v647_v22 = vld [vmem:[%s902_s0 + $0xac] ss:$16 sps:$4 sm:$0xff]   ;;  %v649_v23 = vld [vmem:[%s902_s0 + $0xa0] ss:$16 sps:$4 sm:$0xff]   ;;  %v650_v24 = vld [vmem:[%s902_s0 + $0xa8] ss:$16 sps:$4 sm:$0xff]  }
   0x9   :  { %v651_v25 = vld [vmem:[%s902_s0 + $0xc4] ss:$16 sps:$4 sm:$0xff]   ;;  %v653_v26 = vld [vmem:[%s902_s0 + $0xcc] ss:$16 sps:$4 sm:$0xff]   ;;  %v655_v27 = vld [vmem:[%s902_s0 + $0xc0] ss:$16 sps:$4 sm:$0xff]  }
   0xa   :  { %v656_v28 = vld [vmem:[%s902_s0 + $0xc8] ss:$16 sps:$4 sm:$0xff]   ;;  %v657_v29 = vld [vmem:[%s902_s0 + $0xe4] ss:$16 sps:$4 sm:$0xff]   ;;  %v659_v30 = vld [vmem:[%s902_s0 + $0xec] ss:$16 sps:$4 sm:$0xff]  }
   0xb   :  { %362 = vmatpush1.bf16.msra.mxu0 %v631_v11  ;;  %415 = vmatpush1.bf16.msra.mxu1 %v632_v12  ;;  %v661_v31 = vld [vmem:[%s902_s0 + $0xe0] ss:$16 sps:$4 sm:$0xff]   ;;  %v662_v32 = vld [vmem:[%s902_s0 + $0xe8] ss:$16 sps:$4 sm:$0xff]   ;;  %v663_v33 = vld [vmem:[%s902_s0 + $0x104] ss:$16 sps:$4 sm:$0xff]  }
   0xc   :  { %363 = vmatprep.subr.bf16.mxu0 %v633_v13  ;;  %416 = vmatprep.subr.bf16.mxu1 %v635_v14  ;;  %v665_v34 = vld [vmem:[%s902_s0 + $0x10c] ss:$16 sps:$4 sm:$0xff]   ;;  %v667_v35 = vld [vmem:[%s902_s0 + $0x100] ss:$16 sps:$4 sm:$0xff]   ;;  %v668_v36 = vld [vmem:[%s902_s0 + $0x108] ss:$16 sps:$4 sm:$0xff]  }
   0xd   :  { %v669_v37 = vld [vmem:[%s902_s0 + $0x124] ss:$16 sps:$4 sm:$0xff]   ;;  %v671_v38 = vld [vmem:[%s902_s0 + $0x12c] ss:$16 sps:$4 sm:$0xff]   ;;  %v673_v42 = vld [vmem:[%s902_s0 + $0x120] ss:$16 sps:$4 sm:$0xff]  }
   0xe   :  { %v693_v39 = vld [vmem:[%s903_s1 + $0x4] ss:$8 sps:$4 sm:$0xff]   ;;  %v477_v41 = vld [vmem:[%s904_s2 + $0x10] sm:$0xff]  ;;  %v674_v43 = vld [vmem:[%s902_s0 + $0x128] ss:$16 sps:$4 sm:$0xff]  }
   0xf   :  { %364 = vmatpush1.bf16.msra.mxu0 %v637_v15  ;;  %417 = vmatpush1.bf16.msra.mxu1 %v638_v16  ;;  %v475_v40 = vld [vmem:[%s904_s2] sm:$0xff]  ;;  %v677_v45 = vld [vmem:[%s902_s0 + $0x14c] ss:$16 sps:$4 sm:$0xff]   ;;  %v680_v49 = vld [vmem:[%s902_s0 + $0x148] ss:$16 sps:$4 sm:$0xff]  }
  0x10   :  { %365 = vmatprep.subr.bf16.mxu0 %v639_v17  ;;  %418 = vmatprep.subr.bf16.mxu1 %v641_v18  ;;  %v675_v44 = vld [vmem:[%s902_s0 + $0x144] ss:$16 sps:$4 sm:$0xff]   ;;  %v476_v46 = vld [vmem:[%s904_s2 + $0x8] sm:$0xff]  ;;  %v478_v47 = vld [vmem:[%s904_s2 + $0x18] sm:$0xff] }
  0x11   :  { %588 = vmatprep.mubr.msk.bf16.mxu0 %vm337_vm0, %v693_v39  ;;  %591 = vmatprep.mubr.msk.bf16.mxu1 %vm337_vm0, %v693_v39  ;;  %v679_v48 = vld [vmem:[%s902_s0 + $0x140] ss:$16 sps:$4 sm:$0xff]   ;;  %v681_v50 = vld [vmem:[%s902_s0 + $0x164] ss:$16 sps:$4 sm:$0xff]   ;;  %v683_v51 = vld [vmem:[%s902_s0 + $0x16c] ss:$16 sps:$4 sm:$0xff]  }
  0x12   :  { %481 = vperm.xlu0 %613, %v475_v40   ;;  %491 = vperm.xlu1 %614, %v477_v41   ;;  %v67_v52 = vld [vmem:[%s902_s0 + $0x180] sm:$0xff]  ;;  %v68_v53 = vld [vmem:[%s902_s0 + $0x188] sm:$0xff]  ;;  %v694_v63 = vld [vmem:[%s903_s1 + $0x14] ss:$8 sps:$4 sm:$0xff]  }
  0x13   :  { %366 = vmatpush1.bf16.msra.mxu0 %v643_v19  ;;  %419 = vmatpush1.bf16.msra.mxu1 %v644_v20  ;;  %v685_v54 = vld [vmem:[%s902_s0 + $0x160] ss:$16 sps:$4 sm:$0xff]   ;;  %v686_v55 = vld [vmem:[%s902_s0 + $0x168] ss:$16 sps:$4 sm:$0xff]   ;;  %v584_v56 = vcombine.high %v67_v52, %v67_v52  ;;  %v586_v57 = vcombine.high %v68_v53, %v68_v53  ;;  %v583_v58 = vcombine.low %v67_v52, %v67_v52 }
  0x14   :  { %367 = vmatprep.subr.bf16.mxu0 %v645_v21  ;;  %420 = vmatprep.subr.bf16.mxu1 %v647_v22  ;;  %v585_v59 = vcombine.low %v68_v53, %v68_v53  ;;  %v691_v62 = vld [vmem:[%s903_s1] ss:$8 sps:$4 sm:$0xff]   ;;  %v696_v0 = vld [vmem:[%s903_s1 + $0x10] ss:$8 sps:$4 sm:$0xff]  }
  0x15   :  { %v346_v60 = vsel %vm344_vm1, %v583_v58, 0 }
  0x16   :  { %486 = vperm.xlu0 %613, %v476_v46   ;;  %496 = vperm.xlu1 %614, %v478_v47   ;;  %v352_v61 = vsel %vm344_vm1, %v585_v59, 0 }
  0x17   :  { %368 = vmatpush1.bf16.msra.mxu0 %v649_v23  ;;  %421 = vmatpush1.bf16.msra.mxu1 %v650_v24 }
  0x18   :  { %369 = vmatprep.subr.bf16.mxu0 %v651_v25  ;;  %422 = vmatprep.subr.bf16.mxu1 %v653_v26 }
  0x1b   :  { %370 = vmatpush1.bf16.msra.mxu0 %v655_v27  ;;  %423 = vmatpush1.bf16.msra.mxu1 %v656_v28 }
  0x1c   :  { %371 = vmatprep.subr.bf16.mxu0 %v657_v29  ;;  %424 = vmatprep.subr.bf16.mxu1 %v659_v30 }
  0x1f   :  { %372 = vmatpush1.bf16.msra.mxu0 %v661_v31  ;;  %425 = vmatpush1.bf16.msra.mxu1 %v662_v32 }
  0x20   :  { %373 = vmatprep.subr.bf16.mxu0 %v663_v33  ;;  %426 = vmatprep.subr.bf16.mxu1 %v665_v34 }
  0x23   :  { %374 = vmatpush1.bf16.msra.mxu0 %v667_v35  ;;  %427 = vmatpush1.bf16.msra.mxu1 %v668_v36 }
  0x24   :  { %375 = vmatprep.subr.bf16.mxu0 %v669_v37  ;;  %428 = vmatprep.subr.bf16.mxu1 %v671_v38 }
  0x27   :  { %376 = vmatpush1.bf16.msra.mxu0 %v673_v42  ;;  %429 = vmatpush1.bf16.msra.mxu1 %v674_v43 }
  0x28   :  { %377 = vmatprep.subr.bf16.mxu0 %v675_v44  ;;  %430 = vmatprep.subr.bf16.mxu1 %v677_v45 }
  0x2b   :  { %378 = vmatpush1.bf16.msra.mxu0 %v679_v48  ;;  %431 = vmatpush1.bf16.msra.mxu1 %v680_v49 }
  0x2c   :  { %379 = vmatprep.subr.bf16.mxu0 %v681_v50  ;;  %432 = vmatprep.subr.bf16.mxu1 %v683_v51 }
  0x2f   :  { %380 = vmatpush1.bf16.msra.mxu0 %v685_v54  ;;  %433 = vmatpush1.bf16.msra.mxu1 %v686_v55 }
  0x30   :  { %587 = vmatprep.subr.msk.bf16.mxu0 %vm344_vm1, %v584_v56  ;;  %590 = vmatprep.subr.msk.bf16.mxu1 %vm344_vm1, %v586_v57 }
  0x33   :  { %382 = vmatpush1.bf16.msra.mxu0 %v346_v60  ;;  %435 = vmatpush1.bf16.msra.mxu1 %v352_v61 }
  0x36   :  { %390 = vmatmul.mubr.bf16.vlgmr.msra.gmra.mrb[0].mxu0 %v691_v62  ;;  %443 = vmatmul.mubr.bf16.vlgmr.msra.gmra.mrb[0].mxu1 %v691_v62 }
  0x37   :  { %589 = vmatprep.mubr.msk.bf16.mxu0 %vm337_vm0, %v694_v63  ;;  %592 = vmatprep.mubr.msk.bf16.mxu1 %vm337_vm0, %v694_v63 }
  0x3e   :  { %400 = vmatmul.mubr.bf16.gmra.mrb[4].mxu0 %v696_v0  ;;  %453 = vmatmul.mubr.bf16.gmra.mrb[4].mxu1 %v696_v0 }
  0x91   :  { %v482_v1 = vpop.permute.xlu0 %481  ;;  %v492_v18 = vpop.permute.xlu1 %491 }
  0x95   :  { %v487_v15 = vpop.permute.xlu0 %486  ;;  %v497_v38 = vpop.permute.xlu1 %496 }
 0x109   :  { %v391_v2 = vpop.f32.mrb[0].mxu0  ;;  %v444_v3 = vpop.f32.mrb[0].mxu1 }
 0x10a   :  { %v393_v4 = vpop.f32.mrb[1].mxu0  ;;  %v446_v5 = vpop.f32.mrb[1].mxu1 }
 0x10b   :  { %v463_v6 = vmax.f32 %v391_v2, %v393_v4  ;;  %v467_v7 = vmax.f32 %v444_v3, %v446_v5  ;;  %v395_v8 = vpop.f32.mrb[2].mxu0  ;;  %v448_v9 = vpop.f32.mrb[2].mxu1 }
 0x10c   :  { %v397_v10 = vpop.f32.mrb[3].mxu0  ;;  %v450_v11 = vpop.f32.mrb[3].mxu1 }
 0x10d   :  { %v471_v12 = vmax.f32 %v463_v6, %v467_v7  ;;  %v464_v13 = vmax.f32 %v395_v8, %v397_v10  ;;  %v468_v14 = vmax.f32 %v448_v9, %v450_v11 }
 0x10f   :  { %v499_v16 = vadd.f32 %v482_v1, %v471_v12  ;;  %v472_v17 = vmax.f32 %v464_v13, %v468_v14 }
 0x111   :  { %v500_v19 = vadd.f32 %v487_v15, %v472_v17  ;;  %v401_v20 = vpop.f32.mrb[4].mxu0  ;;  %v454_v21 = vpop.f32.mrb[4].mxu1  ;;  %v503_v24 = vmax.f32 %v499_v16, 0.0 }
 0x112   :  { %v403_v22 = vpop.f32.mrb[5].mxu0  ;;  %v456_v23 = vpop.f32.mrb[5].mxu1 }
 0x113   :  { %v504_v25 = vmax.f32 %v500_v19, 0.0  ;;  %v465_v26 = vmax.f32 %v401_v20, %v403_v22  ;;  %v469_v27 = vmax.f32 %v454_v21, %v456_v23  ;;  %v405_v28 = vpop.f32.mrb[6].mxu0  ;;  %v458_v29 = vpop.f32.mrb[6].mxu1 }
 0x114   :  { %v407_v30 = vpop.f32.mrb[7].mxu0  ;;  %v460_v31 = vpop.f32.mrb[7].mxu1 }
 0x115   :  { %v604_v32 = vpack.c.bf16 %v504_v25, %v503_v24  ;;  %v473_v33 = vmax.f32 %v465_v26, %v469_v27  ;;  %v466_v34 = vmax.f32 %v405_v28, %v407_v30  ;;  %v470_v35 = vmax.f32 %v458_v29, %v460_v31 }
 0x117   :  { %605 = vst [vmem:[%s905_s3] sm:$0xff] %v604_v32   ;;  %v501_v36 = vadd.f32 %v492_v18, %v473_v33  ;;  %v474_v37 = vmax.f32 %v466_v34, %v470_v35 }
 0x119   :  { %v502_v39 = vadd.f32 %v497_v38, %v474_v37  ;;  %v505_v40 = vmax.f32 %v501_v36, 0.0 }
 0x11b   :  { %v506_v41 = vmax.f32 %v502_v39, 0.0 }
 0x11d   :  { %v609_v42 = vpack.c.bf16 %v506_v41, %v505_v40 }
 0x11f   :  { %611 = vst [vmem:[%s905_s3 + $0x8] sm:$0xff] %v609_v42  }

// kernel: digit_cnn_forward.5
= control target key start
LH: loop header
LB: loop body
LE: loop exit
PB: predicated region body
PF: predicated region fallthrough
CT: control target
= control target key end

     0   :  { %v614_v36 = vlaneseq  ;;  %v6157_v37 = vmov 1966171168   ;;  %s7930_s0 = inlined_call_operand.vmem [shape: bf16[2,1568], index: 0, kind: input, shape index: {}]   ;;  %s7931_s1 = inlined_call_operand.vmem [shape: bf16[1568,600], index: 1, kind: input, shape index: {}]   ;;  %s7932_s2 = inlined_call_operand.vmem [shape: f32[1,600], index: 2, kind: input, shape index: {}]   ;;  %s7933_s3 = inlined_call_operand.vmem [shape: bf16[600,128], index: 3, kind: input, shape index: {}]   ;;  %s7934_s4 = inlined_call_operand.vmem [shape: f32[1,128], index: 4, kind: input, shape index: {}]   ;;  %s7935_s5 = inlined_call_operand.hbm [shape: f32[2,128], index: 5, kind: output, shape index: {}]  }
   0x1   :  { %v5405_v0 = vld [vmem:[%s7931_s1 + $0x4] ss:$20 sps:$4 sm:$0xff]   ;;  %v5407_v1 = vld [vmem:[%s7931_s1 + $0xc] ss:$20 sps:$4 sm:$0xff]   ;;  %v5410_v3 = vld [vmem:[%s7931_s1 + $0x8] ss:$20 sps:$4 sm:$0xff]   ;;  %v643_v38 = vunpack.c.l.s4 %v6157_v37 }
   0x2   :  { %3293 = vmatprep.subr.bf16.mxu0 %v5405_v0  ;;  %v5409_v2 = vld [vmem:[%s7931_s1] ss:$20 sps:$4 sm:$0xff]   ;;  %3580 = vmatprep.subr.bf16.mxu1 %v5407_v1  ;;  %v5415_v6 = vld [vmem:[%s7931_s1 + $0x28] ss:$20 sps:$4 sm:$0xff]   ;;  %v5416_v7 = vld [vmem:[%s7931_s1 + $0x30] ss:$20 sps:$4 sm:$0xff]  }
   0x3   :  { %v5411_v4 = vld [vmem:[%s7931_s1 + $0x2c] ss:$20 sps:$4 sm:$0xff]   ;;  %3294 = vmatpush1.bf16.msra.mxu0 %v5409_v2  ;;  %3581 = vmatpush1.bf16.msra.mxu1 %v5410_v3  ;;  %v5413_v5 = vld [vmem:[%s7931_s1 + $0x34] ss:$20 sps:$4 sm:$0xff]   ;;  %v5419_v9 = vld [vmem:[%s7931_s1 + $0x5c] ss:$20 sps:$4 sm:$0xff]   ;;  %v644_v43 = vunpack.c.0.s8 %v643_v38 }
   0x4   :  { %3295 = vmatprep.subr.bf16.mxu0 %v5411_v4  ;;  %3582 = vmatprep.subr.bf16.mxu1 %v5413_v5  ;;  %v5417_v8 = vld [vmem:[%s7931_s1 + $0x54] ss:$20 sps:$4 sm:$0xff]   ;;  %v5421_v10 = vld [vmem:[%s7931_s1 + $0x50] ss:$20 sps:$4 sm:$0xff]   ;;  %v5422_v11 = vld [vmem:[%s7931_s1 + $0x58] ss:$20 sps:$4 sm:$0xff]  }
   0x5   :  { %v5423_v12 = vld [vmem:[%s7931_s1 + $0x7c] ss:$20 sps:$4 sm:$0xff]   ;;  %v5425_v13 = vld [vmem:[%s7931_s1 + $0x84] ss:$20 sps:$4 sm:$0xff]   ;;  %v5428_v15 = vld [vmem:[%s7931_s1 + $0x80] ss:$20 sps:$4 sm:$0xff]  }
   0x6   :  { %v5427_v14 = vld [vmem:[%s7931_s1 + $0x78] ss:$20 sps:$4 sm:$0xff]   ;;  %v5433_v18 = vld [vmem:[%s7931_s1 + $0xa0] ss:$20 sps:$4 sm:$0xff]   ;;  %v5434_v19 = vld [vmem:[%s7931_s1 + $0xa8] ss:$20 sps:$4 sm:$0xff]  }
   0x7   :  { %3296 = vmatpush1.bf16.msra.mxu0 %v5415_v6  ;;  %3583 = vmatpush1.bf16.msra.mxu1 %v5416_v7  ;;  %v5429_v16 = vld [vmem:[%s7931_s1 + $0xa4] ss:$20 sps:$4 sm:$0xff]   ;;  %v5431_v17 = vld [vmem:[%s7931_s1 + $0xac] ss:$20 sps:$4 sm:$0xff]   ;;  %v5437_v21 = vld [vmem:[%s7931_s1 + $0xd4] ss:$20 sps:$4 sm:$0xff]  }
   0x8   :  { %3297 = vmatprep.subr.bf16.mxu0 %v5417_v8  ;;  %3584 = vmatprep.subr.bf16.mxu1 %v5419_v9  ;;  %v5435_v20 = vld [vmem:[%s7931_s1 + $0xcc] ss:$20 sps:$4 sm:$0xff]   ;;  %v5439_v22 = vld [vmem:[%s7931_s1 + $0xc8] ss:$20 sps:$4 sm:$0xff]   ;;  %v5440_v23 = vld [vmem:[%s7931_s1 + $0xd0] ss:$20 sps:$4 sm:$0xff]  }
   0x9   :  { %v5441_v24 = vld [vmem:[%s7931_s1 + $0xf4] ss:$20 sps:$4 sm:$0xff]   ;;  %v5443_v25 = vld [vmem:[%s7931_s1 + $0xfc] ss:$20 sps:$4 sm:$0xff]   ;;  %v5446_v27 = vld [vmem:[%s7931_s1 + $0xf8] ss:$20 sps:$4 sm:$0xff]  }
   0xa   :  { %v5445_v26 = vld [vmem:[%s7931_s1 + $0xf0] ss:$20 sps:$4 sm:$0xff]   ;;  %v5451_v30 = vld [vmem:[%s7931_s1 + $0x118] ss:$20 sps:$4 sm:$0xff]   ;;  %v5452_v31 = vld [vmem:[%s7931_s1 + $0x120] ss:$20 sps:$4 sm:$0xff]  }
   0xb   :  { %3298 = vmatpush1.bf16.msra.mxu0 %v5421_v10  ;;  %3585 = vmatpush1.bf16.msra.mxu1 %v5422_v11  ;;  %v5447_v28 = vld [vmem:[%s7931_s1 + $0x11c] ss:$20 sps:$4 sm:$0xff]   ;;  %v5449_v29 = vld [vmem:[%s7931_s1 + $0x124] ss:$20 sps:$4 sm:$0xff]   ;;  %v5455_v33 = vld [vmem:[%s7931_s1 + $0x14c] ss:$20 sps:$4 sm:$0xff]  }
   0xc   :  { %3299 = vmatprep.subr.bf16.mxu0 %v5423_v12  ;;  %3586 = vmatprep.subr.bf16.mxu1 %v5425_v13  ;;  %v5453_v32 = vld [vmem:[%s7931_s1 + $0x144] ss:$20 sps:$4 sm:$0xff]   ;;  %v5457_v34 = vld [vmem:[%s7931_s1 + $0x140] ss:$20 sps:$4 sm:$0xff]   ;;  %v5458_v35 = vld [vmem:[%s7931_s1 + $0x148] ss:$20 sps:$4 sm:$0xff]  }
   0xd   :  { %v5459_v39 = vld [vmem:[%s7931_s1 + $0x16c] ss:$20 sps:$4 sm:$0xff]   ;;  %v5461_v40 = vld [vmem:[%s7931_s1 + $0x174] ss:$20 sps:$4 sm:$0xff]   ;;  %v6309_v42 = vshrl.u32 %v614_v36, 7 }
   0xe   :  { %v5463_v41 = vld [vmem:[%s7931_s1 + $0x168] ss:$20 sps:$4 sm:$0xff]   ;;  %v5464_v44 = vld [vmem:[%s7931_s1 + $0x170] ss:$20 sps:$4 sm:$0xff]   ;;  %v5470_v48 = vld [vmem:[%s7931_s1 + $0x198] ss:$20 sps:$4 sm:$0xff]  }
   0xf   :  { %3300 = vmatpush1.bf16.msra.mxu0 %v5427_v14  ;;  %3587 = vmatpush1.bf16.msra.mxu1 %v5428_v15  ;;  %v5465_v45 = vld [vmem:[%s7931_s1 + $0x194] ss:$20 sps:$4 sm:$0xff]   ;;  %v5467_v46 = vld [vmem:[%s7931_s1 + $0x19c] ss:$20 sps:$4 sm:$0xff]   ;;  %v6327_v49 = vsub.s32 %v644_v43, %v6309_v42  ;;  %v5473_v51 = vld [vmem:[%s7931_s1 + $0x1c4] ss:$20 sps:$4 sm:$0xff]  }
  0x10   :  { %3301 = vmatprep.subr.bf16.mxu0 %v5429_v16  ;;  %3588 = vmatprep.subr.bf16.mxu1 %v5431_v17  ;;  %v5469_v47 = vld [vmem:[%s7931_s1 + $0x190] ss:$20 sps:$4 sm:$0xff]   ;;  %v5475_v53 = vld [vmem:[%s7931_s1 + $0x1b8] ss:$20 sps:$4 sm:$0xff]   ;;  %v5476_v55 = vld [vmem:[%s7931_s1 + $0x1c0] ss:$20 sps:$4 sm:$0xff]  }
  0x11   :  { %v5471_v50 = vld [vmem:[%s7931_s1 + $0x1bc] ss:$20 sps:$4 sm:$0xff]   ;;  %v6338_v52 = vld [vmem:[%s7930_s0] sm:$0xff]  ;;  %v5485_v63 = vld [vmem:[%s7931_s1 + $0x214] ss:$20 sps:$4 sm:$0xff]  }
  0x12   :  { %v648_v54 = vrot.slane %v6338_v52, %v6327_v49  ;;  %v5477_v56 = vld [vmem:[%s7931_s1 + $0x1e4] ss:$20 sps:$4 sm:$0xff]   ;;  %v5479_v57 = vld [vmem:[%s7931_s1 + $0x1ec] ss:$20 sps:$4 sm:$0xff]   ;;  %v5482_v61 = vld [vmem:[%s7931_s1 + $0x1e8] ss:$20 sps:$4 sm:$0xff]  }
  0x13   :  { %3302 = vmatpush1.bf16.msra.mxu0 %v5433_v18  ;;  %3589 = vmatpush1.bf16.msra.mxu1 %v5434_v19  ;;  %v5481_v59 = vld [vmem:[%s7931_s1 + $0x1e0] ss:$20 sps:$4 sm:$0xff]   ;;  %v5487_v0 = vld [vmem:[%s7931_s1 + $0x208] ss:$20 sps:$4 sm:$0xff]   ;;  %v5488_v1 = vld [vmem:[%s7931_s1 + $0x210] ss:$20 sps:$4 sm:$0xff]  }
  0x14   :  { %3303 = vmatprep.subr.bf16.mxu0 %v5435_v20  ;;  %3590 = vmatprep.subr.bf16.mxu1 %v5437_v21  ;;  %v656_v58 = vcombine.high %v648_v54, %v648_v54  ;;  %v5483_v62 = vld [vmem:[%s7931_s1 + $0x20c] ss:$20 sps:$4 sm:$0xff]   ;;  %v5489_v2 = vld [vmem:[%s7931_s1 + $0x234] ss:$20 sps:$4 sm:$0xff]   ;;  %v5491_v3 = vld [vmem:[%s7931_s1 + $0x23c] ss:$20 sps:$4 sm:$0xff]   ;;  %v6411_v13 = vrot.slane %v648_v54, %v6327_v49 }
  0x15   :  { %v5493_v4 = vld [vmem:[%s7931_s1 + $0x230] ss:$20 sps:$4 sm:$0xff]   ;;  %v5494_v5 = vld [vmem:[%s7931_s1 + $0x238] ss:$20 sps:$4 sm:$0xff]   ;;  %v5500_v9 = vld [vmem:[%s7931_s1 + $0x260] ss:$20 sps:$4 sm:$0xff]  }
  0x16   :  { %v6358_v60 = vrot.slane %v656_v58, %v6327_v49  ;;  %v5495_v6 = vld [vmem:[%s7931_s1 + $0x25c] ss:$20 sps:$4 sm:$0xff]   ;;  %v5497_v7 = vld [vmem:[%s7931_s1 + $0x264] ss:$20 sps:$4 sm:$0xff]   ;;  %v5506_v11 = vld [vmem:[%s7931_s1 + $0x28c] ss:$20 sps:$4 sm:$0xff]  }
  0x17   :  { %3304 = vmatpush1.bf16.msra.mxu0 %v5439_v22  ;;  %3591 = vmatpush1.bf16.msra.mxu1 %v5440_v23  ;;  %v5499_v8 = vld [vmem:[%s7931_s1 + $0x258] ss:$20 sps:$4 sm:$0xff]   ;;  %v5501_v12 = vld [vmem:[%s7931_s1 + $0x280] ss:$20 sps:$4 sm:$0xff]   ;;  %v5504_v14 = vld [vmem:[%s7931_s1 + $0x288] ss:$20 sps:$4 sm:$0xff]  }
  0x18   :  { %3305 = vmatprep.subr.bf16.mxu0 %v5441_v24  ;;  %3592 = vmatprep.subr.bf16.mxu1 %v5443_v25  ;;  %v5503_v10 = vld [vmem:[%s7931_s1 + $0x284] ss:$20 sps:$4 sm:$0xff]   ;;  %v5509_v15 = vld [vmem:[%s7931_s1 + $0x2ac] ss:$20 sps:$4 sm:$0xff]   ;;  %v5512_v16 = vld [vmem:[%s7931_s1 + $0x2b4] ss:$20 sps:$4 sm:$0xff]   ;;  %v6424_v17 = vcombine.high %v6358_v60, %v6358_v60 }
  0x19   :  { %3325 = vmatprep.mubr.bf16.mxu0 %v6358_v60  ;;  %3612 = vmatprep.mubr.bf16.mxu1 %v6358_v60  ;;  %v5507_v18 = vld [vmem:[%s7931_s1 + $0x2a8] ss:$20 sps:$4 sm:$0xff]   ;;  %v5510_v19 = vld [vmem:[%s7931_s1 + $0x2b0] ss:$20 sps:$4 sm:$0xff]   ;;  %v5516_v23 = vld [vmem:[%s7931_s1 + $0x2d8] ss:$20 sps:$4 sm:$0xff]  }
  0x1a   :  { %v5515_v20 = vld [vmem:[%s7931_s1 + $0x2d4] ss:$20 sps:$4 sm:$0xff]   ;;  %v5518_v21 = vld [vmem:[%s7931_s1 + $0x2dc] ss:$20 sps:$4 sm:$0xff]   ;;  %v5524_v25 = vld [vmem:[%s7931_s1 + $0x304] ss:$20 sps:$4 sm:$0xff]  }
  0x1b   :  { %3306 = vmatpush1.bf16.msra.mxu0 %v5445_v26  ;;  %3593 = vmatpush1.bf16.msra.mxu1 %v5446_v27  ;;  %v5513_v22 = vld [vmem:[%s7931_s1 + $0x2d0] ss:$20 sps:$4 sm:$0xff]   ;;  %v5519_v26 = vld [vmem:[%s7931_s1 + $0x2f8] ss:$20 sps:$4 sm:$0xff]   ;;  %v5522_v27 = vld [vmem:[%s7931_s1 + $0x300] ss:$20 sps:$4 sm:$0xff]  }
  0x1c   :  { %3307 = vmatprep.subr.bf16.mxu0 %v5447_v28  ;;  %3594 = vmatprep.subr.bf16.mxu1 %v5449_v29  ;;  %v5521_v24 = vld [vmem:[%s7931_s1 + $0x2fc] ss:$20 sps:$4 sm:$0xff]   ;;  %v5527_v28 = vld [vmem:[%s7931_s1 + $0x324] ss:$20 sps:$4 sm:$0xff]   ;;  %v5530_v29 = vld [vmem:[%s7931_s1 + $0x32c] ss:$20 sps:$4 sm:$0xff]  }
  0x1d   :  { %v5539_v36 = vld [vmem:[%s7931_s1 + $0x374] ss:$20 sps:$4 sm:$0xff]   ;;  %v5542_v37 = vld [vmem:[%s7931_s1 + $0x37c] ss:$20 sps:$4 sm:$0xff]   ;;  %v5543_v43 = vld [vmem:[%s7931_s1 + $0x398] ss:$20 sps:$4 sm:$0xff]  }
  0x1e   :  { %v5537_v38 = vld [vmem:[%s7931_s1 + $0x370] ss:$20 sps:$4 sm:$0xff]   ;;  %v5564_v58 = vld [vmem:[%s7931_s1 + $0x418] ss:$20 sps:$4 sm:$0xff]  }
  0x1f   :  { %3308 = vmatpush1.bf16.msra.mxu0 %v5451_v30  ;;  %3595 = vmatpush1.bf16.msra.mxu1 %v5452_v31  ;;  %v5525_v30 = vld [vmem:[%s7931_s1 + $0x320] ss:$20 sps:$4 sm:$0xff]   ;;  %v5528_v31 = vld [vmem:[%s7931_s1 + $0x328] ss:$20 sps:$4 sm:$0xff]   ;;  %v5558_v54 = vld [vmem:[%s7931_s1 + $0x3f0] ss:$20 sps:$4 sm:$0xff]  }
  0x20   :  { %3309 = vmatprep.subr.bf16.mxu0 %v5453_v32  ;;  %3596 = vmatprep.subr.bf16.mxu1 %v5455_v33  ;;  %v5533_v32 = vld [vmem:[%s7931_s1 + $0x34c] ss:$20 sps:$4 sm:$0xff]   ;;  %v5536_v33 = vld [vmem:[%s7931_s1 + $0x354] ss:$20 sps:$4 sm:$0xff]  }
  0x23   :  { %3310 = vmatpush1.bf16.msra.mxu0 %v5457_v34  ;;  %3597 = vmatpush1.bf16.msra.mxu1 %v5458_v35  ;;  %v5531_v34 = vld [vmem:[%s7931_s1 + $0x348] ss:$20 sps:$4 sm:$0xff]   ;;  %v5534_v35 = vld [vmem:[%s7931_s1 + $0x350] ss:$20 sps:$4 sm:$0xff]  }
  0x24   :  { %3311 = vmatprep.subr.bf16.mxu0 %v5459_v39  ;;  %3598 = vmatprep.subr.bf16.mxu1 %v5461_v40  ;;  %v5540_v39 = vld [vmem:[%s7931_s1 + $0x378] ss:$20 sps:$4 sm:$0xff]   ;;  %v5545_v40 = vld [vmem:[%s7931_s1 + $0x39c] ss:$20 sps:$4 sm:$0xff]  }
  0x27   :  { %3312 = vmatpush1.bf16.msra.mxu0 %v5463_v41  ;;  %3599 = vmatpush1.bf16.msra.mxu1 %v5464_v44  ;;  %v5548_v41 = vld [vmem:[%s7931_s1 + $0x3a4] ss:$20 sps:$4 sm:$0xff]   ;;  %v5546_v44 = vld [vmem:[%s7931_s1 + $0x3a0] ss:$20 sps:$4 sm:$0xff]  }
  0x28   :  { %3313 = vmatprep.subr.bf16.mxu0 %v5465_v45  ;;  %3600 = vmatprep.subr.bf16.mxu1 %v5467_v46  ;;  %v5551_v45 = vld [vmem:[%s7931_s1 + $0x3c4] ss:$20 sps:$4 sm:$0xff]   ;;  %v5554_v46 = vld [vmem:[%s7931_s1 + $0x3cc] ss:$20 sps:$4 sm:$0xff]  }
  0x2b   :  { %3314 = vmatpush1.bf16.msra.mxu0 %v5469_v47  ;;  %3601 = vmatpush1.bf16.msra.mxu1 %v5470_v48  ;;  %v5549_v47 = vld [vmem:[%s7931_s1 + $0x3c0] ss:$20 sps:$4 sm:$0xff]   ;;  %v5552_v48 = vld [vmem:[%s7931_s1 + $0x3c8] ss:$20 sps:$4 sm:$0xff]  }
  0x2c   :  { %3315 = vmatprep.subr.bf16.mxu0 %v5471_v50  ;;  %3602 = vmatprep.subr.bf16.mxu1 %v5473_v51  ;;  %v5557_v50 = vld [vmem:[%s7931_s1 + $0x3ec] ss:$20 sps:$4 sm:$0xff]   ;;  %v5560_v51 = vld [vmem:[%s7931_s1 + $0x3f4] ss:$20 sps:$4 sm:$0xff]  }
  0x2f   :  { %3316 = vmatpush1.bf16.msra.mxu0 %v5475_v53  ;;  %3603 = vmatpush1.bf16.msra.mxu1 %v5476_v55  ;;  %v5555_v53 = vld [vmem:[%s7931_s1 + $0x3e8] ss:$20 sps:$4 sm:$0xff]  }
  0x30   :  { %3317 = vmatprep.subr.bf16.mxu0 %v5477_v56  ;;  %3604 = vmatprep.subr.bf16.mxu1 %v5479_v57  ;;  %v5563_v55 = vld [vmem:[%s7931_s1 + $0x414] ss:$20 sps:$4 sm:$0xff]   ;;  %v5566_v56 = vld [vmem:[%s7931_s1 + $0x41c] ss:$20 sps:$4 sm:$0xff]  }
  0x31   :  { %v5561_v57 = vld [vmem:[%s7931_s1 + $0x410] ss:$20 sps:$4 sm:$0xff]  }
  0x33   :  { %3318 = vmatpush1.bf16.msra.mxu0 %v5481_v59  ;;  %3605 = vmatpush1.bf16.msra.mxu1 %v5482_v61  ;;  %v5569_v59 = vld [vmem:[%s7931_s1 + $0x43c] ss:$20 sps:$4 sm:$0xff]   ;;  %v5572_v61 = vld [vmem:[%s7931_s1 + $0x444] ss:$20 sps:$4 sm:$0xff]  }
  0x34   :  { %3319 = vmatprep.subr.bf16.mxu0 %v5483_v62  ;;  %3606 = vmatprep.subr.bf16.mxu1 %v5485_v63  ;;  %v5567_v62 = vld [vmem:[%s7931_s1 + $0x438] ss:$20 sps:$4 sm:$0xff]   ;;  %v5570_v63 = vld [vmem:[%s7931_s1 + $0x440] ss:$20 sps:$4 sm:$0xff]  }
  0x37   :  { %3320 = vmatpush1.bf16.msra.mxu0 %v5487_v0  ;;  %3607 = vmatpush1.bf16.msra.mxu1 %v5488_v1  ;;  %v5575_v0 = vld [vmem:[%s7931_s1 + $0x464] ss:$20 sps:$4 sm:$0xff]   ;;  %v5578_v1 = vld [vmem:[%s7931_s1 + $0x46c] ss:$20 sps:$4 sm:$0xff]  }
  0x38   :  { %3321 = vmatprep.subr.bf16.mxu0 %v5489_v2  ;;  %3608 = vmatprep.subr.bf16.mxu1 %v5491_v3  ;;  %v5573_v2 = vld [vmem:[%s7931_s1 + $0x460] ss:$20 sps:$4 sm:$0xff]   ;;  %v5576_v3 = vld [vmem:[%s7931_s1 + $0x468] ss:$20 sps:$4 sm:$0xff]  }
  0x3b   :  { %3322 = vmatpush1.bf16.msra.mxu0 %v5493_v4  ;;  %3609 = vmatpush1.bf16.msra.mxu1 %v5494_v5  ;;  %v5581_v4 = vld [vmem:[%s7931_s1 + $0x48c] ss:$20 sps:$4 sm:$0xff]   ;;  %v5584_v5 = vld [vmem:[%s7931_s1 + $0x494] ss:$20 sps:$4 sm:$0xff]  }
  0x3c   :  { %3323 = vmatprep.subr.bf16.mxu0 %v5495_v6  ;;  %3610 = vmatprep.subr.bf16.mxu1 %v5497_v7  ;;  %v5579_v6 = vld [vmem:[%s7931_s1 + $0x488] ss:$20 sps:$4 sm:$0xff]   ;;  %v5582_v7 = vld [vmem:[%s7931_s1 + $0x490] ss:$20 sps:$4 sm:$0xff]  }
  0x3f   :  { %3324 = vmatpush1.bf16.msra.mxu0 %v5499_v8  ;;  %3611 = vmatpush1.bf16.msra.mxu1 %v5500_v9  ;;  %v5587_v8 = vld [vmem:[%s7931_s1 + $0x4b4] ss:$20 sps:$4 sm:$0xff]   ;;  %v5590_v9 = vld [vmem:[%s7931_s1 + $0x4bc] ss:$20 sps:$4 sm:$0xff]  }
  0x40   :  { %3334 = vmatprep.subr.bf16.mxu0 %v5503_v10  ;;  %3621 = vmatprep.subr.bf16.mxu1 %v5506_v11  ;;  %v641_v10 = vcombine.high %v6338_v52, %v6338_v52  ;;  %v5585_v11 = vld [vmem:[%s7931_s1 + $0x4b0] ss:$20 sps:$4 sm:$0xff]  }
  0x41   :  { %v5596_v52 = vld [vmem:[%s7931_s1 + $0x4e4] ss:$20 sps:$4 sm:$0xff]  }
  0x42   :  { %3326 = vmatmul.mubr.bf16.vlgmr.msra.gmra.mrb[0].mxu0 %v6411_v13  ;;  %3613 = vmatmul.mubr.bf16.vlgmr.msra.gmra.mrb[0].mxu1 %v6411_v13 }
  0x43   :  { %3335 = vmatpush1.bf16.msra.mxu0 %v5501_v12  ;;  %3622 = vmatpush1.bf16.msra.mxu1 %v5504_v14  ;;  %v5588_v12 = vld [vmem:[%s7931_s1 + $0x4b8] ss:$20 sps:$4 sm:$0xff]   ;;  %v5593_v14 = vld [vmem:[%s7931_s1 + $0x4dc] ss:$20 sps:$4 sm:$0xff]  }
  0x44   :  { %3336 = vmatprep.subr.bf16.mxu0 %v5509_v15  ;;  %3623 = vmatprep.subr.bf16.mxu1 %v5512_v16  ;;  %v6601_v15 = vrot.slane %v641_v10, %v6327_v49  ;;  %v5591_v16 = vld [vmem:[%s7931_s1 + $0x4d8] ss:$20 sps:$4 sm:$0xff]  }
  0x45   :  { %3366 = vmatprep.mubr.bf16.mxu0 %v6424_v17  ;;  %3653 = vmatprep.mubr.bf16.mxu1 %v6424_v17  ;;  %v5671_v10 = vld [vmem:[%s7931_s1 + $0x6e4] ss:$20 sps:$4 sm:$0xff]  }
  0x47   :  { %3337 = vmatpush1.bf16.msra.mxu0 %v5507_v18  ;;  %3624 = vmatpush1.bf16.msra.mxu1 %v5510_v19  ;;  %v5594_v18 = vld [vmem:[%s7931_s1 + $0x4e0] ss:$20 sps:$4 sm:$0xff]   ;;  %v5599_v19 = vld [vmem:[%s7931_s1 + $0x504] ss:$20 sps:$4 sm:$0xff]  }
  0x48   :  { %3338 = vmatprep.subr.bf16.mxu0 %v5515_v20  ;;  %3625 = vmatprep.subr.bf16.mxu1 %v5518_v21  ;;  %v5602_v20 = vld [vmem:[%s7931_s1 + $0x50c] ss:$20 sps:$4 sm:$0xff]   ;;  %v657_v21 = vcombine.high %v6601_v15, %v6601_v15 }
  0x4b   :  { %3339 = vmatpush1.bf16.msra.mxu0 %v5513_v22  ;;  %3626 = vmatpush1.bf16.msra.mxu1 %v5516_v23  ;;  %v5597_v22 = vld [vmem:[%s7931_s1 + $0x500] ss:$20 sps:$4 sm:$0xff]   ;;  %v6622_v23 = vcombine.high %v6411_v13, %v6411_v13 }
  0x4c   :  { %3340 = vmatprep.subr.bf16.mxu0 %v5521_v24  ;;  %3627 = vmatprep.subr.bf16.mxu1 %v5524_v25  ;;  %v5600_v24 = vld [vmem:[%s7931_s1 + $0x508] ss:$20 sps:$4 sm:$0xff]   ;;  %v5605_v25 = vld [vmem:[%s7931_s1 + $0x52c] ss:$20 sps:$4 sm:$0xff]  }
  0x4f   :  { %3341 = vmatpush1.bf16.msra.mxu0 %v5519_v26  ;;  %3628 = vmatpush1.bf16.msra.mxu1 %v5522_v27  ;;  %v5608_v26 = vld [vmem:[%s7931_s1 + $0x534] ss:$20 sps:$4 sm:$0xff]   ;;  %v6634_v27 = vrot.slane %v657_v21, %v6327_v49  ;;  %v5686_v21 = vld [vmem:[%s7931_s1 + $0x73c] ss:$20 sps:$4 sm:$0xff]  }
  0x50   :  { %3342 = vmatprep.subr.bf16.mxu0 %v5527_v28  ;;  %3629 = vmatprep.subr.bf16.mxu1 %v5530_v29  ;;  %v5603_v28 = vld [vmem:[%s7931_s1 + $0x528] ss:$20 sps:$4 sm:$0xff]   ;;  %v5606_v29 = vld [vmem:[%s7931_s1 + $0x530] ss:$20 sps:$4 sm:$0xff]  }
  0x53   :  { %3343 = vmatpush1.bf16.msra.mxu0 %v5525_v30  ;;  %3630 = vmatpush1.bf16.msra.mxu1 %v5528_v31  ;;  %v5611_v30 = vld [vmem:[%s7931_s1 + $0x554] ss:$20 sps:$4 sm:$0xff]   ;;  %v5614_v31 = vld [vmem:[%s7931_s1 + $0x55c] ss:$20 sps:$4 sm:$0xff]  }
  0x54   :  { %3344 = vmatprep.subr.bf16.mxu0 %v5533_v32  ;;  %3631 = vmatprep.subr.bf16.mxu1 %v5536_v33  ;;  %v5609_v32 = vld [vmem:[%s7931_s1 + $0x550] ss:$20 sps:$4 sm:$0xff]   ;;  %v5612_v33 = vld [vmem:[%s7931_s1 + $0x558] ss:$20 sps:$4 sm:$0xff]  }
  0x57   :  { %3345 = vmatpush1.bf16.msra.mxu0 %v5531_v34  ;;  %3632 = vmatpush1.bf16.msra.mxu1 %v5534_v35  ;;  %v5617_v34 = vld [vmem:[%s7931_s1 + $0x57c] ss:$20 sps:$4 sm:$0xff]   ;;  %v5620_v35 = vld [vmem:[%s7931_s1 + $0x584] ss:$20 sps:$4 sm:$0xff]  }
  0x58   :  { %3346 = vmatprep.subr.bf16.mxu0 %v5539_v36  ;;  %3633 = vmatprep.subr.bf16.mxu1 %v5542_v37  ;;  %v5615_v36 = vld [vmem:[%s7931_s1 + $0x578] ss:$20 sps:$4 sm:$0xff]   ;;  %v5618_v37 = vld [vmem:[%s7931_s1 + $0x580] ss:$20 sps:$4 sm:$0xff]  }
  0x5b   :  { %3347 = vmatpush1.bf16.msra.mxu0 %v5537_v38  ;;  %3634 = vmatpush1.bf16.msra.mxu1 %v5540_v39  ;;  %v5623_v38 = vld [vmem:[%s7931_s1 + $0x5a4] ss:$20 sps:$4 sm:$0xff]   ;;  %v5626_v39 = vld [vmem:[%s7931_s1 + $0x5ac] ss:$20 sps:$4 sm:$0xff]  }
  0x5c   :  { %3348 = vmatprep.subr.bf16.mxu0 %v5545_v40  ;;  %3635 = vmatprep.subr.bf16.mxu1 %v5548_v41  ;;  %v5621_v40 = vld [vmem:[%s7931_s1 + $0x5a0] ss:$20 sps:$4 sm:$0xff]   ;;  %v5624_v41 = vld [vmem:[%s7931_s1 + $0x5a8] ss:$20 sps:$4 sm:$0xff]  }
  0x5f   :  { %3349 = vmatpush1.bf16.msra.mxu0 %v5543_v43  ;;  %3636 = vmatpush1.bf16.msra.mxu1 %v5546_v44  ;;  %v5629_v43 = vld [vmem:[%s7931_s1 + $0x5cc] ss:$20 sps:$4 sm:$0xff]   ;;  %v5632_v44 = vld [vmem:[%s7931_s1 + $0x5d4] ss:$20 sps:$4 sm:$0xff]  }
  0x60   :  { %3350 = vmatprep.subr.bf16.mxu0 %v5551_v45  ;;  %3637 = vmatprep.subr.bf16.mxu1 %v5554_v46  ;;  %v5627_v45 = vld [vmem:[%s7931_s1 + $0x5c8] ss:$20 sps:$4 sm:$0xff]   ;;  %v5630_v46 = vld [vmem:[%s7931_s1 + $0x5d0] ss:$20 sps:$4 sm:$0xff]  }
  0x63   :  { %3351 = vmatpush1.bf16.msra.mxu0 %v5549_v47  ;;  %3638 = vmatpush1.bf16.msra.mxu1 %v5552_v48  ;;  %v5635_v47 = vld [vmem:[%s7931_s1 + $0x5f4] ss:$20 sps:$4 sm:$0xff]   ;;  %v5638_v48 = vld [vmem:[%s7931_s1 + $0x5fc] ss:$20 sps:$4 sm:$0xff]  }
  0x64   :  { %3352 = vmatprep.subr.bf16.mxu0 %v5557_v50  ;;  %3639 = vmatprep.subr.bf16.mxu1 %v5560_v51  ;;  %v5633_v50 = vld [vmem:[%s7931_s1 + $0x5f0] ss:$20 sps:$4 sm:$0xff]   ;;  %v5636_v51 = vld [vmem:[%s7931_s1 + $0x5f8] ss:$20 sps:$4 sm:$0xff]  }
  0x67   :  { %3353 = vmatpush1.bf16.msra.mxu0 %v5555_v53  ;;  %3640 = vmatpush1.bf16.msra.mxu1 %v5558_v54  ;;  %v5641_v53 = vld [vmem:[%s7931_s1 + $0x61c] ss:$20 sps:$4 sm:$0xff]   ;;  %v5644_v54 = vld [vmem:[%s7931_s1 + $0x624] ss:$20 sps:$4 sm:$0xff]  }
  0x68   :  { %3354 = vmatprep.subr.bf16.mxu0 %v5563_v55  ;;  %3641 = vmatprep.subr.bf16.mxu1 %v5566_v56  ;;  %v5639_v55 = vld [vmem:[%s7931_s1 + $0x618] ss:$20 sps:$4 sm:$0xff]   ;;  %v5642_v56 = vld [vmem:[%s7931_s1 + $0x620] ss:$20 sps:$4 sm:$0xff]  }
  0x6b   :  { %3355 = vmatpush1.bf16.msra.mxu0 %v5561_v57  ;;  %3642 = vmatpush1.bf16.msra.mxu1 %v5564_v58  ;;  %v5647_v57 = vld [vmem:[%s7931_s1 + $0x644] ss:$20 sps:$4 sm:$0xff]   ;;  %v5650_v58 = vld [vmem:[%s7931_s1 + $0x64c] ss:$20 sps:$4 sm:$0xff]  }
  0x6c   :  { %3356 = vmatprep.subr.bf16.mxu0 %v5569_v59  ;;  %3643 = vmatprep.subr.bf16.mxu1 %v5572_v61  ;;  %v5645_v59 = vld [vmem:[%s7931_s1 + $0x640] ss:$20 sps:$4 sm:$0xff]   ;;  %v5648_v61 = vld [vmem:[%s7931_s1 + $0x648] ss:$20 sps:$4 sm:$0xff]  }
  0x6f   :  { %3357 = vmatpush1.bf16.msra.mxu0 %v5567_v62  ;;  %3644 = vmatpush1.bf16.msra.mxu1 %v5570_v63  ;;  %v5653_v62 = vld [vmem:[%s7931_s1 + $0x66c] ss:$20 sps:$4 sm:$0xff]   ;;  %v5656_v63 = vld [vmem:[%s7931_s1 + $0x674] ss:$20 sps:$4 sm:$0xff]  }
  0x70   :  { %3358 = vmatprep.subr.bf16.mxu0 %v5575_v0  ;;  %3645 = vmatprep.subr.bf16.mxu1 %v5578_v1  ;;  %v5651_v0 = vld [vmem:[%s7931_s1 + $0x668] ss:$20 sps:$4 sm:$0xff]   ;;  %v5654_v1 = vld [vmem:[%s7931_s1 + $0x670] ss:$20 sps:$4 sm:$0xff]  }
  0x73   :  { %3359 = vmatpush1.bf16.msra.mxu0 %v5573_v2  ;;  %3646 = vmatpush1.bf16.msra.mxu1 %v5576_v3  ;;  %v5659_v2 = vld [vmem:[%s7931_s1 + $0x694] ss:$20 sps:$4 sm:$0xff]   ;;  %v5662_v3 = vld [vmem:[%s7931_s1 + $0x69c] ss:$20 sps:$4 sm:$0xff]  }
  0x74   :  { %3360 = vmatprep.subr.bf16.mxu0 %v5581_v4  ;;  %3647 = vmatprep.subr.bf16.mxu1 %v5584_v5  ;;  %v5657_v4 = vld [vmem:[%s7931_s1 + $0x690] ss:$20 sps:$4 sm:$0xff]   ;;  %v5660_v5 = vld [vmem:[%s7931_s1 + $0x698] ss:$20 sps:$4 sm:$0xff]  }
  0x77   :  { %3361 = vmatpush1.bf16.msra.mxu0 %v5579_v6  ;;  %3648 = vmatpush1.bf16.msra.mxu1 %v5582_v7  ;;  %v5665_v6 = vld [vmem:[%s7931_s1 + $0x6bc] ss:$20 sps:$4 sm:$0xff]   ;;  %v5668_v7 = vld [vmem:[%s7931_s1 + $0x6c4] ss:$20 sps:$4 sm:$0xff]  }
  0x78   :  { %3362 = vmatprep.subr.bf16.mxu0 %v5587_v8  ;;  %3649 = vmatprep.subr.bf16.mxu1 %v5590_v9  ;;  %v5663_v8 = vld [vmem:[%s7931_s1 + $0x6b8] ss:$20 sps:$4 sm:$0xff]   ;;  %v5666_v9 = vld [vmem:[%s7931_s1 + $0x6c0] ss:$20 sps:$4 sm:$0xff]  }
  0x7b   :  { %3363 = vmatpush1.bf16.msra.mxu0 %v5585_v11  ;;  %3650 = vmatpush1.bf16.msra.mxu1 %v5588_v12  ;;  %v5674_v11 = vld [vmem:[%s7931_s1 + $0x6ec] ss:$20 sps:$4 sm:$0xff]  }
  0x7c   :  { %3364 = vmatprep.subr.bf16.mxu0 %v5593_v14  ;;  %3651 = vmatprep.subr.bf16.mxu1 %v5596_v52  ;;  %v5669_v12 = vld [vmem:[%s7931_s1 + $0x6e0] ss:$20 sps:$4 sm:$0xff]   ;;  %v5672_v14 = vld [vmem:[%s7931_s1 + $0x6e8] ss:$20 sps:$4 sm:$0xff]  }
  0x7d   :  { %v5677_v52 = vld [vmem:[%s7931_s1 + $0x70c] ss:$20 sps:$4 sm:$0xff]  }
  0x7f   :  { %3365 = vmatpush1.bf16.msra.mxu0 %v5591_v16  ;;  %3652 = vmatpush1.bf16.msra.mxu1 %v5594_v18  ;;  %v5680_v16 = vld [vmem:[%s7931_s1 + $0x714] ss:$20 sps:$4 sm:$0xff]  }
  0x80   :  { %3375 = vmatprep.subr.bf16.mxu0 %v5599_v19  ;;  %3662 = vmatprep.subr.bf16.mxu1 %v5602_v20  ;;  %v5675_v18 = vld [vmem:[%s7931_s1 + $0x708] ss:$20 sps:$4 sm:$0xff]   ;;  %v5678_v19 = vld [vmem:[%s7931_s1 + $0x710] ss:$20 sps:$4 sm:$0xff]  }
  0x81   :  { %v5683_v20 = vld [vmem:[%s7931_s1 + $0x734] ss:$20 sps:$4 sm:$0xff]  }
  0x82   :  { %3367 = vmatmul.mubr.bf16.vlgmr.msra.gmra.mrb[0].mxu0 %v6622_v23  ;;  %3654 = vmatmul.mubr.bf16.vlgmr.msra.gmra.mrb[0].mxu1 %v6622_v23 }
  0x83   :  { %3376 = vmatpush1.bf16.msra.mxu0 %v5597_v22  ;;  %3663 = vmatpush1.bf16.msra.mxu1 %v5600_v24  ;;  %v5681_v22 = vld [vmem:[%s7931_s1 + $0x730] ss:$20 sps:$4 sm:$0xff]   ;;  %v5684_v24 = vld [vmem:[%s7931_s1 + $0x738] ss:$20 sps:$4 sm:$0xff]  }
  0x84   :  { %3377 = vmatprep.subr.bf16.mxu0 %v5605_v25  ;;  %3664 = vmatprep.subr.bf16.mxu1 %v5608_v26  ;;  %v5689_v25 = vld [vmem:[%s7931_s1 + $0x75c] ss:$20 sps:$4 sm:$0xff]   ;;  %v5692_v26 = vld [vmem:[%s7931_s1 + $0x764] ss:$20 sps:$4 sm:$0xff]  }
  0x85   :  { %3407 = vmatprep.mubr.bf16.mxu0 %v6634_v27  ;;  %3694 = vmatprep.mubr.bf16.mxu1 %v6634_v27 }
  0x87   :  { %3378 = vmatpush1.bf16.msra.mxu0 %v5603_v28  ;;  %3665 = vmatpush1.bf16.msra.mxu1 %v5606_v29  ;;  %v5687_v28 = vld [vmem:[%s7931_s1 + $0x758] ss:$20 sps:$4 sm:$0xff]   ;;  %v5690_v29 = vld [vmem:[%s7931_s1 + $0x760] ss:$20 sps:$4 sm:$0xff]  }
  0x88   :  { %3379 = vmatprep.subr.bf16.mxu0 %v5611_v30  ;;  %3666 = vmatprep.subr.bf16.mxu1 %v5614_v31  ;;  %v5696_v30 = vld [vmem:[%s7931_s1 + $0x784] ss:$20 sps:$4 sm:$0xff]   ;;  %v5699_v31 = vld [vmem:[%s7931_s1 + $0x78c] ss:$20 sps:$4 sm:$0xff]  }
  0x8b   :  { %3380 = vmatpush1.bf16.msra.mxu0 %v5609_v32  ;;  %3667 = vmatpush1.bf16.msra.mxu1 %v5612_v33  ;;  %v5694_v32 = vld [vmem:[%s7931_s1 + $0x780] ss:$20 sps:$4 sm:$0xff]   ;;  %v6825_v33 = vrot.slane %v6601_v15, %v6327_v49  ;;  %v6838_v15 = vcombine.high %v6634_v27, %v6634_v27 }
  0x8c   :  { %3381 = vmatprep.subr.bf16.mxu0 %v5617_v34  ;;  %3668 = vmatprep.subr.bf16.mxu1 %v5620_v35  ;;  %v5697_v34 = vld [vmem:[%s7931_s1 + $0x788] ss:$20 sps:$4 sm:$0xff]   ;;  %v5702_v35 = vld [vmem:[%s7931_s1 + $0x7ac] ss:$20 sps:$4 sm:$0xff]  }
  0x8f   :  { %3382 = vmatpush1.bf16.msra.mxu0 %v5615_v36  ;;  %3669 = vmatpush1.bf16.msra.mxu1 %v5618_v37  ;;  %v5705_v36 = vld [vmem:[%s7931_s1 + $0x7b4] ss:$20 sps:$4 sm:$0xff]  }
  0x90   :  { %3383 = vmatprep.subr.bf16.mxu0 %v5623_v38  ;;  %3670 = vmatprep.subr.bf16.mxu1 %v5626_v39  ;;  %v5700_v37 = vld [vmem:[%s7931_s1 + $0x7a8] ss:$20 sps:$4 sm:$0xff]   ;;  %v5703_v38 = vld [vmem:[%s7931_s1 + $0x7b0] ss:$20 sps:$4 sm:$0xff]  }
  0x91   :  { %v5708_v39 = vld [vmem:[%s7931_s1 + $0x7d4] ss:$20 sps:$4 sm:$0xff]  }
  0x93   :  { %3384 = vmatpush1.bf16.msra.mxu0 %v5621_v40  ;;  %3671 = vmatpush1.bf16.msra.mxu1 %v5624_v41  ;;  %v5711_v40 = vld [vmem:[%s7931_s1 + $0x7dc] ss:$20 sps:$4 sm:$0xff]  }
  0x94   :  { %3385 = vmatprep.subr.bf16.mxu0 %v5629_v43  ;;  %3672 = vmatprep.subr.bf16.mxu1 %v5632_v44  ;;  %v5706_v41 = vld [vmem:[%s7931_s1 + $0x7d0] ss:$20 sps:$4 sm:$0xff]   ;;  %v5709_v43 = vld [vmem:[%s7931_s1 + $0x7d8] ss:$20 sps:$4 sm:$0xff]  }
  0x95   :  { %v5714_v44 = vld [vmem:[%s7931_s1 + $0x7fc] ss:$20 sps:$4 sm:$0xff]  }
  0x97   :  { %3386 = vmatpush1.bf16.msra.mxu0 %v5627_v45  ;;  %3673 = vmatpush1.bf16.msra.mxu1 %v5630_v46  ;;  %v5717_v45 = vld [vmem:[%s7931_s1 + $0x804] ss:$20 sps:$4 sm:$0xff]  }
  0x98   :  { %3387 = vmatprep.subr.bf16.mxu0 %v5635_v47  ;;  %3674 = vmatprep.subr.bf16.mxu1 %v5638_v48  ;;  %v5712_v46 = vld [vmem:[%s7931_s1 + $0x7f8] ss:$20 sps:$4 sm:$0xff]   ;;  %v5715_v47 = vld [vmem:[%s7931_s1 + $0x800] ss:$20 sps:$4 sm:$0xff]  }
  0x99   :  { %v5720_v48 = vld [vmem:[%s7931_s1 + $0x824] ss:$20 sps:$4 sm:$0xff]  }
  0x9b   :  { %3388 = vmatpush1.bf16.msra.mxu0 %v5633_v50  ;;  %3675 = vmatpush1.bf16.msra.mxu1 %v5636_v51  ;;  %v5723_v50 = vld [vmem:[%s7931_s1 + $0x82c] ss:$20 sps:$4 sm:$0xff]  }
  0x9c   :  { %3389 = vmatprep.subr.bf16.mxu0 %v5641_v53  ;;  %3676 = vmatprep.subr.bf16.mxu1 %v5644_v54  ;;  %v5718_v51 = vld [vmem:[%s7931_s1 + $0x820] ss:$20 sps:$4 sm:$0xff]   ;;  %v5721_v53 = vld [vmem:[%s7931_s1 + $0x828] ss:$20 sps:$4 sm:$0xff]  }
  0x9d   :  { %v5726_v54 = vld [vmem:[%s7931_s1 + $0x84c] ss:$20 sps:$4 sm:$0xff]  }
  0x9f   :  { %3390 = vmatpush1.bf16.msra.mxu0 %v5639_v55  ;;  %3677 = vmatpush1.bf16.msra.mxu1 %v5642_v56  ;;  %v5729_v55 = vld [vmem:[%s7931_s1 + $0x854] ss:$20 sps:$4 sm:$0xff]  }
  0xa0   :  { %3391 = vmatprep.subr.bf16.mxu0 %v5647_v57  ;;  %3678 = vmatprep.subr.bf16.mxu1 %v5650_v58  ;;  %v5724_v56 = vld [vmem:[%s7931_s1 + $0x848] ss:$20 sps:$4 sm:$0xff]   ;;  %v5727_v57 = vld [vmem:[%s7931_s1 + $0x850] ss:$20 sps:$4 sm:$0xff]  }
  0xa1   :  { %v5732_v58 = vld [vmem:[%s7931_s1 + $0x874] ss:$20 sps:$4 sm:$0xff]  }
  0xa3   :  { %3392 = vmatpush1.bf16.msra.mxu0 %v5645_v59  ;;  %3679 = vmatpush1.bf16.msra.mxu1 %v5648_v61  ;;  %v5735_v59 = vld [vmem:[%s7931_s1 + $0x87c] ss:$20 sps:$4 sm:$0xff]  }
  0xa4   :  { %3393 = vmatprep.subr.bf16.mxu0 %v5653_v62  ;;  %3680 = vmatprep.subr.bf16.mxu1 %v5656_v63  ;;  %v5730_v61 = vld [vmem:[%s7931_s1 + $0x870] ss:$20 sps:$4 sm:$0xff]   ;;  %v5733_v62 = vld [vmem:[%s7931_s1 + $0x878] ss:$20 sps:$4 sm:$0xff]  }
  0xa5   :  { %v5738_v63 = vld [vmem:[%s7931_s1 + $0x89c] ss:$20 sps:$4 sm:$0xff]  }
  0xa7   :  { %3394 = vmatpush1.bf16.msra.mxu0 %v5651_v0  ;;  %3681 = vmatpush1.bf16.msra.mxu1 %v5654_v1  ;;  %v5741_v0 = vld [vmem:[%s7931_s1 + $0x8a4] ss:$20 sps:$4 sm:$0xff]  }
  0xa8   :  { %3395 = vmatprep.subr.bf16.mxu0 %v5659_v2  ;;  %3682 = vmatprep.subr.bf16.mxu1 %v5662_v3  ;;  %v5736_v1 = vld [vmem:[%s7931_s1 + $0x898] ss:$20 sps:$4 sm:$0xff]   ;;  %v5739_v2 = vld [vmem:[%s7931_s1 + $0x8a0] ss:$20 sps:$4 sm:$0xff]  }
  0xa9   :  { %v5744_v3 = vld [vmem:[%s7931_s1 + $0x8c4] ss:$20 sps:$4 sm:$0xff]  }
  0xab   :  { %3396 = vmatpush1.bf16.msra.mxu0 %v5657_v4  ;;  %3683 = vmatpush1.bf16.msra.mxu1 %v5660_v5  ;;  %v5747_v4 = vld [vmem:[%s7931_s1 + $0x8cc] ss:$20 sps:$4 sm:$0xff]  }
  0xac   :  { %3397 = vmatprep.subr.bf16.mxu0 %v5665_v6  ;;  %3684 = vmatprep.subr.bf16.mxu1 %v5668_v7  ;;  %v5742_v5 = vld [vmem:[%s7931_s1 + $0x8c0] ss:$20 sps:$4 sm:$0xff]   ;;  %v5745_v6 = vld [vmem:[%s7931_s1 + $0x8c8] ss:$20 sps:$4 sm:$0xff]  }
  0xad   :  { %v5750_v7 = vld [vmem:[%s7931_s1 + $0x8ec] ss:$20 sps:$4 sm:$0xff]  }
  0xaf   :  { %3398 = vmatpush1.bf16.msra.mxu0 %v5663_v8  ;;  %3685 = vmatpush1.bf16.msra.mxu1 %v5666_v9  ;;  %v5753_v8 = vld [vmem:[%s7931_s1 + $0x8f4] ss:$20 sps:$4 sm:$0xff]  }
  0xb0   :  { %3399 = vmatprep.subr.bf16.mxu0 %v5671_v10  ;;  %3686 = vmatprep.subr.bf16.mxu1 %v5674_v11  ;;  %v5748_v9 = vld [vmem:[%s7931_s1 + $0x8e8] ss:$20 sps:$4 sm:$0xff]   ;;  %v5751_v10 = vld [vmem:[%s7931_s1 + $0x8f0] ss:$20 sps:$4 sm:$0xff]  }
  0xb1   :  { %v5756_v11 = vld [vmem:[%s7931_s1 + $0x914] ss:$20 sps:$4 sm:$0xff]  }
  0xb3   :  { %3400 = vmatpush1.bf16.msra.mxu0 %v5669_v12  ;;  %3687 = vmatpush1.bf16.msra.mxu1 %v5672_v14  ;;  %v5759_v12 = vld [vmem:[%s7931_s1 + $0x91c] ss:$20 sps:$4 sm:$0xff]  }
  0xb4   :  { %3401 = vmatprep.subr.bf16.mxu0 %v5677_v52  ;;  %3688 = vmatprep.subr.bf16.mxu1 %v5680_v16  ;;  %v5754_v14 = vld [vmem:[%s7931_s1 + $0x910] ss:$20 sps:$4 sm:$0xff]   ;;  %v5757_v52 = vld [vmem:[%s7931_s1 + $0x918] ss:$20 sps:$4 sm:$0xff]  }
  0xb5   :  { %v5762_v16 = vld [vmem:[%s7931_s1 + $0x93c] ss:$20 sps:$4 sm:$0xff]  }
  0xb7   :  { %3402 = vmatpush1.bf16.msra.mxu0 %v5675_v18  ;;  %3689 = vmatpush1.bf16.msra.mxu1 %v5678_v19  ;;  %v5765_v18 = vld [vmem:[%s7931_s1 + $0x944] ss:$20 sps:$4 sm:$0xff]  }
  0xb8   :  { %3403 = vmatprep.subr.bf16.mxu0 %v5683_v20  ;;  %3690 = vmatprep.subr.bf16.mxu1 %v5686_v21  ;;  %v5760_v19 = vld [vmem:[%s7931_s1 + $0x938] ss:$20 sps:$4 sm:$0xff]   ;;  %v5763_v20 = vld [vmem:[%s7931_s1 + $0x940] ss:$20 sps:$4 sm:$0xff]  }
  0xb9   :  { %v5768_v21 = vld [vmem:[%s7931_s1 + $0x964] ss:$20 sps:$4 sm:$0xff]  }
  0xbb   :  { %3404 = vmatpush1.bf16.msra.mxu0 %v5681_v22  ;;  %3691 = vmatpush1.bf16.msra.mxu1 %v5684_v24  ;;  %v5771_v22 = vld [vmem:[%s7931_s1 + $0x96c] ss:$20 sps:$4 sm:$0xff]  }
  0xbc   :  { %3405 = vmatprep.subr.bf16.mxu0 %v5689_v25  ;;  %3692 = vmatprep.subr.bf16.mxu1 %v5692_v26  ;;  %v5766_v24 = vld [vmem:[%s7931_s1 + $0x960] ss:$20 sps:$4 sm:$0xff]   ;;  %v5769_v25 = vld [vmem:[%s7931_s1 + $0x968] ss:$20 sps:$4 sm:$0xff]  }
  0xbd   :  { %v5774_v26 = vld [vmem:[%s7931_s1 + $0x98c] ss:$20 sps:$4 sm:$0xff]  }
  0xbf   :  { %3406 = vmatpush1.bf16.msra.mxu0 %v5687_v28  ;;  %3693 = vmatpush1.bf16.msra.mxu1 %v5690_v29  ;;  %v5777_v28 = vld [vmem:[%s7931_s1 + $0x994] ss:$20 sps:$4 sm:$0xff]  }
  0xc0   :  { %3416 = vmatprep.subr.bf16.mxu0 %v5696_v30  ;;  %3703 = vmatprep.subr.bf16.mxu1 %v5699_v31  ;;  %v5772_v29 = vld [vmem:[%s7931_s1 + $0x988] ss:$20 sps:$4 sm:$0xff]   ;;  %v5775_v30 = vld [vmem:[%s7931_s1 + $0x990] ss:$20 sps:$4 sm:$0xff]  }
  0xc1   :  { %v5780_v31 = vld [vmem:[%s7931_s1 + $0x9b4] ss:$20 sps:$4 sm:$0xff]  }
  0xc2   :  { %3408 = vmatmul.mubr.bf16.vlgmr.msra.gmra.mrb[0].mxu0 %v6825_v33  ;;  %3695 = vmatmul.mubr.bf16.vlgmr.msra.gmra.mrb[0].mxu1 %v6825_v33 }
  0xc3   :  { %3417 = vmatpush1.bf16.msra.mxu0 %v5694_v32  ;;  %3704 = vmatpush1.bf16.msra.mxu1 %v5697_v34  ;;  %v5783_v32 = vld [vmem:[%s7931_s1 + $0x9bc] ss:$20 sps:$4 sm:$0xff]   ;;  %v7003_v34 = vld.sshfl [vmem:[%s7930_s0 + $0x8] sm:$0x37 pattern:$0x75316420] }
  0xc4   :  { %3418 = vmatprep.subr.bf16.mxu0 %v5702_v35  ;;  %3705 = vmatprep.subr.bf16.mxu1 %v5705_v36  ;;  %v5778_v35 = vld [vmem:[%s7931_s1 + $0x9b0] ss:$20 sps:$4 sm:$0xff]   ;;  %v5781_v36 = vld [vmem:[%s7931_s1 + $0x9b8] ss:$20 sps:$4 sm:$0xff]  }
  0xc5   :  { %3448 = vmatprep.mubr.bf16.mxu0 %v6838_v15  ;;  %3735 = vmatprep.mubr.bf16.mxu1 %v6838_v15 }
  0xc7   :  { %3419 = vmatpush1.bf16.msra.mxu0 %v5700_v37  ;;  %3706 = vmatpush1.bf16.msra.mxu1 %v5703_v38  ;;  %v5786_v37 = vld [vmem:[%s7931_s1 + $0x9dc] ss:$20 sps:$4 sm:$0xff]   ;;  %v5789_v38 = vld [vmem:[%s7931_s1 + $0x9e4] ss:$20 sps:$4 sm:$0xff]  }
  0xc8   :  { %3420 = vmatprep.subr.bf16.mxu0 %v5708_v39  ;;  %3707 = vmatprep.subr.bf16.mxu1 %v5711_v40  ;;  %v5784_v39 = vld [vmem:[%s7931_s1 + $0x9d8] ss:$20 sps:$4 sm:$0xff]   ;;  %v5787_v40 = vld [vmem:[%s7931_s1 + $0x9e0] ss:$20 sps:$4 sm:$0xff]  }
  0xcb   :  { %3421 = vmatpush1.bf16.msra.mxu0 %v5706_v41  ;;  %3708 = vmatpush1.bf16.msra.mxu1 %v5709_v43  ;;  %v5792_v41 = vld [vmem:[%s7931_s1 + $0xa04] ss:$20 sps:$4 sm:$0xff]   ;;  %v5795_v43 = vld [vmem:[%s7931_s1 + $0xa0c] ss:$20 sps:$4 sm:$0xff]  }
  0xcc   :  { %3422 = vmatprep.subr.bf16.mxu0 %v5714_v44  ;;  %3709 = vmatprep.subr.bf16.mxu1 %v5717_v45  ;;  %v5790_v44 = vld [vmem:[%s7931_s1 + $0xa00] ss:$20 sps:$4 sm:$0xff]   ;;  %v705_v45 = vcombine.high %v7003_v34, %v7003_v34 }
  0xcf   :  { %3423 = vmatpush1.bf16.msra.mxu0 %v5712_v46  ;;  %3710 = vmatpush1.bf16.msra.mxu1 %v5715_v47  ;;  %v5793_v46 = vld [vmem:[%s7931_s1 + $0xa08] ss:$20 sps:$4 sm:$0xff]   ;;  %v7039_v47 = vcombine.high %v6825_v33, %v6825_v33 }
  0xd0   :  { %3424 = vmatprep.subr.bf16.mxu0 %v5720_v48  ;;  %3711 = vmatprep.subr.bf16.mxu1 %v5723_v50  ;;  %v5798_v48 = vld [vmem:[%s7931_s1 + $0xa2c] ss:$20 sps:$4 sm:$0xff]   ;;  %v5801_v50 = vld [vmem:[%s7931_s1 + $0xa34] ss:$20 sps:$4 sm:$0xff]  }
  0xd3   :  { %3425 = vmatpush1.bf16.msra.mxu0 %v5718_v51  ;;  %3712 = vmatpush1.bf16.msra.mxu1 %v5721_v53  ;;  %v7048_v51 = vrot.slane %v705_v45, %v6327_v49  ;;  %v5796_v53 = vld [vmem:[%s7931_s1 + $0xa28] ss:$20 sps:$4 sm:$0xff]  }
  0xd4   :  { %3426 = vmatprep.subr.bf16.mxu0 %v5726_v54  ;;  %3713 = vmatprep.subr.bf16.mxu1 %v5729_v55  ;;  %v5799_v54 = vld [vmem:[%s7931_s1 + $0xa30] ss:$20 sps:$4 sm:$0xff]   ;;  %v5804_v55 = vld [vmem:[%s7931_s1 + $0xa54] ss:$20 sps:$4 sm:$0xff]  }
  0xd5   :  { %v5868_v45 = vld [vmem:[%s7931_s1 + $0xc08] ss:$20 sps:$4 sm:$0xff]  }
  0xd7   :  { %3427 = vmatpush1.bf16.msra.mxu0 %v5724_v56  ;;  %3714 = vmatpush1.bf16.msra.mxu1 %v5727_v57  ;;  %v5807_v56 = vld [vmem:[%s7931_s1 + $0xa5c] ss:$20 sps:$4 sm:$0xff]  }
  0xd8   :  { %3428 = vmatprep.subr.bf16.mxu0 %v5732_v58  ;;  %3715 = vmatprep.subr.bf16.mxu1 %v5735_v59  ;;  %v5802_v57 = vld [vmem:[%s7931_s1 + $0xa50] ss:$20 sps:$4 sm:$0xff]   ;;  %v5805_v58 = vld [vmem:[%s7931_s1 + $0xa58] ss:$20 sps:$4 sm:$0xff]  }
  0xd9   :  { %v5810_v59 = vld [vmem:[%s7931_s1 + $0xa7c] ss:$20 sps:$4 sm:$0xff]  }
  0xdb   :  { %3429 = vmatpush1.bf16.msra.mxu0 %v5730_v61  ;;  %3716 = vmatpush1.bf16.msra.mxu1 %v5733_v62  ;;  %v5813_v61 = vld [vmem:[%s7931_s1 + $0xa84] ss:$20 sps:$4 sm:$0xff]  }
  0xdc   :  { %3430 = vmatprep.subr.bf16.mxu0 %v5738_v63  ;;  %3717 = vmatprep.subr.bf16.mxu1 %v5741_v0  ;;  %v5808_v62 = vld [vmem:[%s7931_s1 + $0xa78] ss:$20 sps:$4 sm:$0xff]   ;;  %v5811_v63 = vld [vmem:[%s7931_s1 + $0xa80] ss:$20 sps:$4 sm:$0xff]  }
  0xdd   :  { %v5816_v0 = vld [vmem:[%s7931_s1 + $0xaa4] ss:$20 sps:$4 sm:$0xff]  }
  0xdf   :  { %3431 = vmatpush1.bf16.msra.mxu0 %v5736_v1  ;;  %3718 = vmatpush1.bf16.msra.mxu1 %v5739_v2  ;;  %v5819_v1 = vld [vmem:[%s7931_s1 + $0xaac] ss:$20 sps:$4 sm:$0xff]  }
  0xe0   :  { %3432 = vmatprep.subr.bf16.mxu0 %v5744_v3  ;;  %3719 = vmatprep.subr.bf16.mxu1 %v5747_v4  ;;  %v5814_v2 = vld [vmem:[%s7931_s1 + $0xaa0] ss:$20 sps:$4 sm:$0xff]   ;;  %v5817_v3 = vld [vmem:[%s7931_s1 + $0xaa8] ss:$20 sps:$4 sm:$0xff]  }
  0xe1   :  { %v5822_v4 = vld [vmem:[%s7931_s1 + $0xacc] ss:$20 sps:$4 sm:$0xff]  }
  0xe3   :  { %3433 = vmatpush1.bf16.msra.mxu0 %v5742_v5  ;;  %3720 = vmatpush1.bf16.msra.mxu1 %v5745_v6  ;;  %v5825_v5 = vld [vmem:[%s7931_s1 + $0xad4] ss:$20 sps:$4 sm:$0xff]  }
  0xe4   :  { %3434 = vmatprep.subr.bf16.mxu0 %v5750_v7  ;;  %3721 = vmatprep.subr.bf16.mxu1 %v5753_v8  ;;  %v5820_v6 = vld [vmem:[%s7931_s1 + $0xac8] ss:$20 sps:$4 sm:$0xff]   ;;  %v5823_v7 = vld [vmem:[%s7931_s1 + $0xad0] ss:$20 sps:$4 sm:$0xff]  }
  0xe5   :  { %v5828_v8 = vld [vmem:[%s7931_s1 + $0xaf4] ss:$20 sps:$4 sm:$0xff]  }
  0xe7   :  { %3435 = vmatpush1.bf16.msra.mxu0 %v5748_v9  ;;  %3722 = vmatpush1.bf16.msra.mxu1 %v5751_v10  ;;  %v5831_v9 = vld [vmem:[%s7931_s1 + $0xafc] ss:$20 sps:$4 sm:$0xff]  }
  0xe8   :  { %3436 = vmatprep.subr.bf16.mxu0 %v5756_v11  ;;  %3723 = vmatprep.subr.bf16.mxu1 %v5759_v12  ;;  %v5826_v10 = vld [vmem:[%s7931_s1 + $0xaf0] ss:$20 sps:$4 sm:$0xff]   ;;  %v5829_v11 = vld [vmem:[%s7931_s1 + $0xaf8] ss:$20 sps:$4 sm:$0xff]  }
  0xe9   :  { %v5834_v12 = vld [vmem:[%s7931_s1 + $0xb1c] ss:$20 sps:$4 sm:$0xff]  }
  0xeb   :  { %3437 = vmatpush1.bf16.msra.mxu0 %v5754_v14  ;;  %3724 = vmatpush1.bf16.msra.mxu1 %v5757_v52  ;;  %v5837_v14 = vld [vmem:[%s7931_s1 + $0xb24] ss:$20 sps:$4 sm:$0xff]  }
  0xec   :  { %3438 = vmatprep.subr.bf16.mxu0 %v5762_v16  ;;  %3725 = vmatprep.subr.bf16.mxu1 %v5765_v18  ;;  %v5832_v52 = vld [vmem:[%s7931_s1 + $0xb18] ss:$20 sps:$4 sm:$0xff]   ;;  %v5835_v16 = vld [vmem:[%s7931_s1 + $0xb20] ss:$20 sps:$4 sm:$0xff]  }
  0xed   :  { %v5840_v18 = vld [vmem:[%s7931_s1 + $0xb44] ss:$20 sps:$4 sm:$0xff]  }
  0xef   :  { %3439 = vmatpush1.bf16.msra.mxu0 %v5760_v19  ;;  %3726 = vmatpush1.bf16.msra.mxu1 %v5763_v20  ;;  %v5843_v19 = vld [vmem:[%s7931_s1 + $0xb4c] ss:$20 sps:$4 sm:$0xff]  }
  0xf0   :  { %3440 = vmatprep.subr.bf16.mxu0 %v5768_v21  ;;  %3727 = vmatprep.subr.bf16.mxu1 %v5771_v22  ;;  %v5838_v20 = vld [vmem:[%s7931_s1 + $0xb40] ss:$20 sps:$4 sm:$0xff]   ;;  %v5841_v21 = vld [vmem:[%s7931_s1 + $0xb48] ss:$20 sps:$4 sm:$0xff]  }
  0xf1   :  { %v5846_v22 = vld [vmem:[%s7931_s1 + $0xb6c] ss:$20 sps:$4 sm:$0xff]  }
  0xf3   :  { %3441 = vmatpush1.bf16.msra.mxu0 %v5766_v24  ;;  %3728 = vmatpush1.bf16.msra.mxu1 %v5769_v25  ;;  %v5849_v24 = vld [vmem:[%s7931_s1 + $0xb74] ss:$20 sps:$4 sm:$0xff]  }
  0xf4   :  { %3442 = vmatprep.subr.bf16.mxu0 %v5774_v26  ;;  %3729 = vmatprep.subr.bf16.mxu1 %v5777_v28  ;;  %v5844_v25 = vld [vmem:[%s7931_s1 + $0xb68] ss:$20 sps:$4 sm:$0xff]   ;;  %v5847_v26 = vld [vmem:[%s7931_s1 + $0xb70] ss:$20 sps:$4 sm:$0xff]  }
  0xf5   :  { %v5852_v28 = vld [vmem:[%s7931_s1 + $0xb94] ss:$20 sps:$4 sm:$0xff]  }
  0xf7   :  { %3443 = vmatpush1.bf16.msra.mxu0 %v5772_v29  ;;  %3730 = vmatpush1.bf16.msra.mxu1 %v5775_v30  ;;  %v5855_v29 = vld [vmem:[%s7931_s1 + $0xb9c] ss:$20 sps:$4 sm:$0xff]  }
  0xf8   :  { %3444 = vmatprep.subr.bf16.mxu0 %v5780_v31  ;;  %3731 = vmatprep.subr.bf16.mxu1 %v5783_v32  ;;  %v5850_v30 = vld [vmem:[%s7931_s1 + $0xb90] ss:$20 sps:$4 sm:$0xff]   ;;  %v5853_v31 = vld [vmem:[%s7931_s1 + $0xb98] ss:$20 sps:$4 sm:$0xff]  }
  0xf9   :  { %v5858_v32 = vld [vmem:[%s7931_s1 + $0xbbc] ss:$20 sps:$4 sm:$0xff]  }
  0xfb   :  { %3445 = vmatpush1.bf16.msra.mxu0 %v5778_v35  ;;  %3732 = vmatpush1.bf16.msra.mxu1 %v5781_v36  ;;  %v5861_v35 = vld [vmem:[%s7931_s1 + $0xbc4] ss:$20 sps:$4 sm:$0xff]  }
  0xfc   :  { %3446 = vmatprep.subr.bf16.mxu0 %v5786_v37  ;;  %3733 = vmatprep.subr.bf16.mxu1 %v5789_v38  ;;  %v5856_v36 = vld [vmem:[%s7931_s1 + $0xbb8] ss:$20 sps:$4 sm:$0xff]   ;;  %v5859_v37 = vld [vmem:[%s7931_s1 + $0xbc0] ss:$20 sps:$4 sm:$0xff]  }
  0xfd   :  { %v5864_v38 = vld [vmem:[%s7931_s1 + $0xbe4] ss:$20 sps:$4 sm:$0xff]  }
  0xff   :  { %3447 = vmatpush1.bf16.msra.mxu0 %v5784_v39  ;;  %3734 = vmatpush1.bf16.msra.mxu1 %v5787_v40  ;;  %v5867_v39 = vld [vmem:[%s7931_s1 + $0xbec] ss:$20 sps:$4 sm:$0xff]  }
 0x100   :  { %3457 = vmatprep.subr.bf16.mxu0 %v5792_v41  ;;  %3744 = vmatprep.subr.bf16.mxu1 %v5795_v43  ;;  %v5862_v40 = vld [vmem:[%s7931_s1 + $0xbe0] ss:$20 sps:$4 sm:$0xff]   ;;  %v5865_v41 = vld [vmem:[%s7931_s1 + $0xbe8] ss:$20 sps:$4 sm:$0xff]  }
 0x101   :  { %v5870_v43 = vld [vmem:[%s7931_s1 + $0xc0c] ss:$20 sps:$4 sm:$0xff]  }
 0x102   :  { %3449 = vmatmul.mubr.bf16.vlgmr.msra.gmra.mrb[0].mxu0 %v7039_v47  ;;  %3736 = vmatmul.mubr.bf16.vlgmr.msra.gmra.mrb[0].mxu1 %v7039_v47 }
 0x103   :  { %3458 = vmatpush1.bf16.msra.mxu0 %v5790_v44  ;;  %3745 = vmatpush1.bf16.msra.mxu1 %v5793_v46  ;;  %v5873_v44 = vld [vmem:[%s7931_s1 + $0xc14] ss:$20 sps:$4 sm:$0xff]   ;;  %v5871_v46 = vld [vmem:[%s7931_s1 + $0xc10] ss:$20 sps:$4 sm:$0xff]  }
 0x104   :  { %3459 = vmatprep.subr.bf16.mxu0 %v5798_v48  ;;  %3746 = vmatprep.subr.bf16.mxu1 %v5801_v50  ;;  %v5876_v48 = vld [vmem:[%s7931_s1 + $0xc34] ss:$20 sps:$4 sm:$0xff]   ;;  %v5879_v50 = vld [vmem:[%s7931_s1 + $0xc3c] ss:$20 sps:$4 sm:$0xff]  }
 0x105   :  { %3489 = vmatprep.mubr.bf16.mxu0 %v7048_v51  ;;  %3776 = vmatprep.mubr.bf16.mxu1 %v7048_v51 }
 0x107   :  { %3460 = vmatpush1.bf16.msra.mxu0 %v5796_v53  ;;  %3747 = vmatpush1.bf16.msra.mxu1 %v5799_v54  ;;  %v5874_v53 = vld [vmem:[%s7931_s1 + $0xc30] ss:$20 sps:$4 sm:$0xff]   ;;  %v5877_v54 = vld [vmem:[%s7931_s1 + $0xc38] ss:$20 sps:$4 sm:$0xff]  }
 0x108   :  { %3461 = vmatprep.subr.bf16.mxu0 %v5804_v55  ;;  %3748 = vmatprep.subr.bf16.mxu1 %v5807_v56  ;;  %v5882_v55 = vld [vmem:[%s7931_s1 + $0xc5c] ss:$20 sps:$4 sm:$0xff]   ;;  %v5885_v56 = vld [vmem:[%s7931_s1 + $0xc64] ss:$20 sps:$4 sm:$0xff]  }
 0x10b   :  { %3462 = vmatpush1.bf16.msra.mxu0 %v5802_v57  ;;  %3749 = vmatpush1.bf16.msra.mxu1 %v5805_v58  ;;  %v5880_v57 = vld [vmem:[%s7931_s1 + $0xc58] ss:$20 sps:$4 sm:$0xff]   ;;  %v5883_v58 = vld [vmem:[%s7931_s1 + $0xc60] ss:$20 sps:$4 sm:$0xff]  }
 0x10c   :  { %3463 = vmatprep.subr.bf16.mxu0 %v5810_v59  ;;  %3750 = vmatprep.subr.bf16.mxu1 %v5813_v61  ;;  %v5889_v59 = vld [vmem:[%s7931_s1 + $0xc84] ss:$20 sps:$4 sm:$0xff]   ;;  %v5892_v61 = vld [vmem:[%s7931_s1 + $0xc8c] ss:$20 sps:$4 sm:$0xff]  }
 0x10f   :  { %3464 = vmatpush1.bf16.msra.mxu0 %v5808_v62  ;;  %3751 = vmatpush1.bf16.msra.mxu1 %v5811_v63  ;;  %v5887_v62 = vld [vmem:[%s7931_s1 + $0xc80] ss:$20 sps:$4 sm:$0xff]   ;;  %v7239_v63 = vrot.slane %v7003_v34, %v6327_v49  ;;  %v5893_v34 = vld [vmem:[%s7931_s1 + $0xca8] ss:$20 sps:$4 sm:$0xff]  }
 0x110   :  { %3465 = vmatprep.subr.bf16.mxu0 %v5816_v0  ;;  %3752 = vmatprep.subr.bf16.mxu1 %v5819_v1  ;;  %v5890_v0 = vld [vmem:[%s7931_s1 + $0xc88] ss:$20 sps:$4 sm:$0xff]   ;;  %v5895_v1 = vld [vmem:[%s7931_s1 + $0xcac] ss:$20 sps:$4 sm:$0xff]  }
 0x113   :  { %3466 = vmatpush1.bf16.msra.mxu0 %v5814_v2  ;;  %3753 = vmatpush1.bf16.msra.mxu1 %v5817_v3  ;;  %v5898_v2 = vld [vmem:[%s7931_s1 + $0xcb4] ss:$20 sps:$4 sm:$0xff]   ;;  %v7255_v3 = vcombine.high %v7048_v51, %v7048_v51 }
 0x114   :  { %3467 = vmatprep.subr.bf16.mxu0 %v5822_v4  ;;  %3754 = vmatprep.subr.bf16.mxu1 %v5825_v5  ;;  %v5896_v4 = vld [vmem:[%s7931_s1 + $0xcb0] ss:$20 sps:$4 sm:$0xff]   ;;  %v5901_v5 = vld [vmem:[%s7931_s1 + $0xcd4] ss:$20 sps:$4 sm:$0xff]  }
 0x117   :  { %3468 = vmatpush1.bf16.msra.mxu0 %v5820_v6  ;;  %3755 = vmatpush1.bf16.msra.mxu1 %v5823_v7  ;;  %v5904_v6 = vld [vmem:[%s7931_s1 + $0xcdc] ss:$20 sps:$4 sm:$0xff]  }
 0x118   :  { %3469 = vmatprep.subr.bf16.mxu0 %v5828_v8  ;;  %3756 = vmatprep.subr.bf16.mxu1 %v5831_v9  ;;  %v5899_v7 = vld [vmem:[%s7931_s1 + $0xcd0] ss:$20 sps:$4 sm:$0xff]   ;;  %v5902_v8 = vld [vmem:[%s7931_s1 + $0xcd8] ss:$20 sps:$4 sm:$0xff]  }
 0x119   :  { %v5907_v9 = vld [vmem:[%s7931_s1 + $0xcfc] ss:$20 sps:$4 sm:$0xff]  }
 0x11b   :  { %3470 = vmatpush1.bf16.msra.mxu0 %v5826_v10  ;;  %3757 = vmatpush1.bf16.msra.mxu1 %v5829_v11  ;;  %v5910_v10 = vld [vmem:[%s7931_s1 + $0xd04] ss:$20 sps:$4 sm:$0xff]  }
 0x11c   :  { %3471 = vmatprep.subr.bf16.mxu0 %v5834_v12  ;;  %3758 = vmatprep.subr.bf16.mxu1 %v5837_v14  ;;  %v5905_v11 = vld [vmem:[%s7931_s1 + $0xcf8] ss:$20 sps:$4 sm:$0xff]   ;;  %v5908_v12 = vld [vmem:[%s7931_s1 + $0xd00] ss:$20 sps:$4 sm:$0xff]  }
 0x11d   :  { %v5913_v14 = vld [vmem:[%s7931_s1 + $0xd24] ss:$20 sps:$4 sm:$0xff]  }
 0x11f   :  { %3472 = vmatpush1.bf16.msra.mxu0 %v5832_v52  ;;  %3759 = vmatpush1.bf16.msra.mxu1 %v5835_v16  ;;  %v5916_v52 = vld [vmem:[%s7931_s1 + $0xd2c] ss:$20 sps:$4 sm:$0xff]  }
 0x120   :  { %3473 = vmatprep.subr.bf16.mxu0 %v5840_v18  ;;  %3760 = vmatprep.subr.bf16.mxu1 %v5843_v19  ;;  %v5911_v16 = vld [vmem:[%s7931_s1 + $0xd20] ss:$20 sps:$4 sm:$0xff]   ;;  %v5914_v18 = vld [vmem:[%s7931_s1 + $0xd28] ss:$20 sps:$4 sm:$0xff]  }
 0x121   :  { %v5919_v19 = vld [vmem:[%s7931_s1 + $0xd4c] ss:$20 sps:$4 sm:$0xff]  }
 0x123   :  { %3474 = vmatpush1.bf16.msra.mxu0 %v5838_v20  ;;  %3761 = vmatpush1.bf16.msra.mxu1 %v5841_v21  ;;  %v5922_v20 = vld [vmem:[%s7931_s1 + $0xd54] ss:$20 sps:$4 sm:$0xff]  }
 0x124   :  { %3475 = vmatprep.subr.bf16.mxu0 %v5846_v22  ;;  %3762 = vmatprep.subr.bf16.mxu1 %v5849_v24  ;;  %v5917_v21 = vld [vmem:[%s7931_s1 + $0xd48] ss:$20 sps:$4 sm:$0xff]   ;;  %v5920_v22 = vld [vmem:[%s7931_s1 + $0xd50] ss:$20 sps:$4 sm:$0xff]  }
 0x125   :  { %v5925_v24 = vld [vmem:[%s7931_s1 + $0xd74] ss:$20 sps:$4 sm:$0xff]  }
 0x127   :  { %3476 = vmatpush1.bf16.msra.mxu0 %v5844_v25  ;;  %3763 = vmatpush1.bf16.msra.mxu1 %v5847_v26  ;;  %v5928_v25 = vld [vmem:[%s7931_s1 + $0xd7c] ss:$20 sps:$4 sm:$0xff]  }
 0x128   :  { %3477 = vmatprep.subr.bf16.mxu0 %v5852_v28  ;;  %3764 = vmatprep.subr.bf16.mxu1 %v5855_v29  ;;  %v5923_v26 = vld [vmem:[%s7931_s1 + $0xd70] ss:$20 sps:$4 sm:$0xff]   ;;  %v5926_v28 = vld [vmem:[%s7931_s1 + $0xd78] ss:$20 sps:$4 sm:$0xff]  }
 0x129   :  { %v5931_v29 = vld [vmem:[%s7931_s1 + $0xd9c] ss:$20 sps:$4 sm:$0xff]  }
 0x12b   :  { %3478 = vmatpush1.bf16.msra.mxu0 %v5850_v30  ;;  %3765 = vmatpush1.bf16.msra.mxu1 %v5853_v31  ;;  %v5934_v30 = vld [vmem:[%s7931_s1 + $0xda4] ss:$20 sps:$4 sm:$0xff]  }
 0x12c   :  { %3479 = vmatprep.subr.bf16.mxu0 %v5858_v32  ;;  %3766 = vmatprep.subr.bf16.mxu1 %v5861_v35  ;;  %v5929_v31 = vld [vmem:[%s7931_s1 + $0xd98] ss:$20 sps:$4 sm:$0xff]   ;;  %v5932_v32 = vld [vmem:[%s7931_s1 + $0xda0] ss:$20 sps:$4 sm:$0xff]  }
 0x12d   :  { %v5937_v35 = vld [vmem:[%s7931_s1 + $0xdc4] ss:$20 sps:$4 sm:$0xff]  }
 0x12f   :  { %3480 = vmatpush1.bf16.msra.mxu0 %v5856_v36  ;;  %3767 = vmatpush1.bf16.msra.mxu1 %v5859_v37  ;;  %v5940_v36 = vld [vmem:[%s7931_s1 + $0xdcc] ss:$20 sps:$4 sm:$0xff]  }
 0x130   :  { %3481 = vmatprep.subr.bf16.mxu0 %v5864_v38  ;;  %3768 = vmatprep.subr.bf16.mxu1 %v5867_v39  ;;  %v5935_v37 = vld [vmem:[%s7931_s1 + $0xdc0] ss:$20 sps:$4 sm:$0xff]   ;;  %v5938_v38 = vld [vmem:[%s7931_s1 + $0xdc8] ss:$20 sps:$4 sm:$0xff]  }
 0x131   :  { %v5943_v39 = vld [vmem:[%s7931_s1 + $0xdec] ss:$20 sps:$4 sm:$0xff]  }
 0x133   :  { %3482 = vmatpush1.bf16.msra.mxu0 %v5862_v40  ;;  %3769 = vmatpush1.bf16.msra.mxu1 %v5865_v41  ;;  %v5946_v40 = vld [vmem:[%s7931_s1 + $0xdf4] ss:$20 sps:$4 sm:$0xff]  }
 0x134   :  { %3483 = vmatprep.subr.bf16.mxu0 %v5870_v43  ;;  %3770 = vmatprep.subr.bf16.mxu1 %v5873_v44  ;;  %v5941_v41 = vld [vmem:[%s7931_s1 + $0xde8] ss:$20 sps:$4 sm:$0xff]   ;;  %v5944_v43 = vld [vmem:[%s7931_s1 + $0xdf0] ss:$20 sps:$4 sm:$0xff]  }
 0x135   :  { %v5949_v44 = vld [vmem:[%s7931_s1 + $0xe14] ss:$20 sps:$4 sm:$0xff]  }
 0x137   :  { %3484 = vmatpush1.bf16.msra.mxu0 %v5868_v45  ;;  %3771 = vmatpush1.bf16.msra.mxu1 %v5871_v46  ;;  %v5952_v45 = vld [vmem:[%s7931_s1 + $0xe1c] ss:$20 sps:$4 sm:$0xff]  }
 0x138   :  { %3485 = vmatprep.subr.bf16.mxu0 %v5876_v48  ;;  %3772 = vmatprep.subr.bf16.mxu1 %v5879_v50  ;;  %v5947_v46 = vld [vmem:[%s7931_s1 + $0xe10] ss:$20 sps:$4 sm:$0xff]   ;;  %v5950_v48 = vld [vmem:[%s7931_s1 + $0xe18] ss:$20 sps:$4 sm:$0xff]  }
 0x139   :  { %v5955_v50 = vld [vmem:[%s7931_s1 + $0xe3c] ss:$20 sps:$4 sm:$0xff]  }
 0x13b   :  { %3486 = vmatpush1.bf16.msra.mxu0 %v5874_v53  ;;  %3773 = vmatpush1.bf16.msra.mxu1 %v5877_v54  ;;  %v5958_v53 = vld [vmem:[%s7931_s1 + $0xe44] ss:$20 sps:$4 sm:$0xff]  }
 0x13c   :  { %3487 = vmatprep.subr.bf16.mxu0 %v5882_v55  ;;  %3774 = vmatprep.subr.bf16.mxu1 %v5885_v56  ;;  %v5953_v54 = vld [vmem:[%s7931_s1 + $0xe38] ss:$20 sps:$4 sm:$0xff]   ;;  %v5956_v55 = vld [vmem:[%s7931_s1 + $0xe40] ss:$20 sps:$4 sm:$0xff]  }
 0x13d   :  { %v5961_v56 = vld [vmem:[%s7931_s1 + $0xe64] ss:$20 sps:$4 sm:$0xff]  }
 0x13f   :  { %3488 = vmatpush1.bf16.msra.mxu0 %v5880_v57  ;;  %3775 = vmatpush1.bf16.msra.mxu1 %v5883_v58  ;;  %v5964_v57 = vld [vmem:[%s7931_s1 + $0xe6c] ss:$20 sps:$4 sm:$0xff]  }
 0x140   :  { %3498 = vmatprep.subr.bf16.mxu0 %v5889_v59  ;;  %3785 = vmatprep.subr.bf16.mxu1 %v5892_v61  ;;  %v5959_v58 = vld [vmem:[%s7931_s1 + $0xe60] ss:$20 sps:$4 sm:$0xff]   ;;  %v5962_v59 = vld [vmem:[%s7931_s1 + $0xe68] ss:$20 sps:$4 sm:$0xff]  }
 0x141   :  { %v5967_v61 = vld [vmem:[%s7931_s1 + $0xe8c] ss:$20 sps:$4 sm:$0xff]  }
 0x142   :  { %3490 = vmatmul.mubr.bf16.vlgmr.msra.gmra.mrb[0].mxu0 %v7239_v63  ;;  %3777 = vmatmul.mubr.bf16.vlgmr.msra.gmra.mrb[0].mxu1 %v7239_v63 }
 0x143   :  { %3499 = vmatpush1.bf16.msra.mxu0 %v5887_v62  ;;  %3786 = vmatpush1.bf16.msra.mxu1 %v5890_v0  ;;  %v5970_v62 = vld [vmem:[%s7931_s1 + $0xe94] ss:$20 sps:$4 sm:$0xff]  }
 0x144   :  { %3500 = vmatprep.subr.bf16.mxu0 %v5895_v1  ;;  %3787 = vmatprep.subr.bf16.mxu1 %v5898_v2  ;;  %v5965_v0 = vld [vmem:[%s7931_s1 + $0xe88] ss:$20 sps:$4 sm:$0xff]   ;;  %v5968_v1 = vld [vmem:[%s7931_s1 + $0xe90] ss:$20 sps:$4 sm:$0xff]  }
 0x145   :  { %3530 = vmatprep.mubr.bf16.mxu0 %v7255_v3  ;;  %3817 = vmatprep.mubr.bf16.mxu1 %v7255_v3  ;;  %v5973_v2 = vld [vmem:[%s7931_s1 + $0xeb4] ss:$20 sps:$4 sm:$0xff]  }
 0x147   :  { %3501 = vmatpush1.bf16.msra.mxu0 %v5893_v34  ;;  %3788 = vmatpush1.bf16.msra.mxu1 %v5896_v4  ;;  %v5976_v34 = vld [vmem:[%s7931_s1 + $0xebc] ss:$20 sps:$4 sm:$0xff]  }
 0x148   :  { %3502 = vmatprep.subr.bf16.mxu0 %v5901_v5  ;;  %3789 = vmatprep.subr.bf16.mxu1 %v5904_v6  ;;  %v5971_v4 = vld [vmem:[%s7931_s1 + $0xeb0] ss:$20 sps:$4 sm:$0xff]   ;;  %v5974_v5 = vld [vmem:[%s7931_s1 + $0xeb8] ss:$20 sps:$4 sm:$0xff]  }
 0x149   :  { %v5979_v6 = vld [vmem:[%s7931_s1 + $0xedc] ss:$20 sps:$4 sm:$0xff]  }
 0x14b   :  { %3503 = vmatpush1.bf16.msra.mxu0 %v5899_v7  ;;  %3790 = vmatpush1.bf16.msra.mxu1 %v5902_v8  ;;  %v5982_v7 = vld [vmem:[%s7931_s1 + $0xee4] ss:$20 sps:$4 sm:$0xff]  }
 0x14c   :  { %3504 = vmatprep.subr.bf16.mxu0 %v5907_v9  ;;  %3791 = vmatprep.subr.bf16.mxu1 %v5910_v10  ;;  %v5977_v8 = vld [vmem:[%s7931_s1 + $0xed8] ss:$20 sps:$4 sm:$0xff]   ;;  %v5980_v9 = vld [vmem:[%s7931_s1 + $0xee0] ss:$20 sps:$4 sm:$0xff]  }
 0x14d   :  { %v5985_v10 = vld [vmem:[%s7931_s1 + $0xf04] ss:$20 sps:$4 sm:$0xff]  }
 0x14f   :  { %3505 = vmatpush1.bf16.msra.mxu0 %v5905_v11  ;;  %3792 = vmatpush1.bf16.msra.mxu1 %v5908_v12  ;;  %v5997_v11 = vld [vmem:[%s7931_s1 + $0x3d0] ss:$20 sps:$4 sm:$0xff]   ;;  %v7440_v12 = vcombine.high %v7239_v63, %v7239_v63 }
 0x150   :  { %3506 = vmatprep.subr.bf16.mxu0 %v5913_v14  ;;  %3793 = vmatprep.subr.bf16.mxu1 %v5916_v52  ;;  %v5983_v14 = vld [vmem:[%s7931_s1 + $0xf00] ss:$20 sps:$4 sm:$0xff]  }
 0x151   :  { %v5988_v52 = vld [vmem:[%s7931_s1 + $0xf2c] ss:$20 sps:$4 sm:$0xff]  }
 0x153   :  { %3507 = vmatpush1.bf16.msra.mxu0 %v5911_v16  ;;  %3794 = vmatpush1.bf16.msra.mxu1 %v5914_v18  ;;  %v5998_v16 = vld [vmem:[%s7931_s1 + $0x290] ss:$20 sps:$4 sm:$0xff]   ;;  %v6001_v18 = vld [vmem:[%s7931_s1 + $0x3f8] ss:$20 sps:$4 sm:$0xff]  }
 0x154   :  { %3508 = vmatprep.subr.bf16.mxu0 %v5919_v19  ;;  %3795 = vmatprep.subr.bf16.mxu1 %v5922_v20  ;;  %v5986_v19 = vld [vmem:[%s7931_s1 + $0xf28] ss:$20 sps:$4 sm:$0xff]  }
 0x155   :  { %v6131_v20 = vld [vmem:[%s7930_s0 + $0x8] sm:$0x1f] }
 0x157   :  { %3509 = vmatpush1.bf16.msra.mxu0 %v5917_v21  ;;  %3796 = vmatpush1.bf16.msra.mxu1 %v5920_v22  ;;  %v690_v21 = vcombine.high %v6131_v20, %v6131_v20  ;;  %v5991_v22 = vld [vmem:[%s7931_s1 + $0xf0c] ss:$20 sps:$4 sm:$0xff]  }
 0x158   :  { %3510 = vmatprep.subr.bf16.mxu0 %v5925_v24  ;;  %3797 = vmatprep.subr.bf16.mxu1 %v5928_v25  ;;  %v6158_v24 = vmov 0   ;;  %v6002_v25 = vld [vmem:[%s7931_s1 + $0x2b8] ss:$20 sps:$4 sm:$0xff]  }
 0x15b   :  { %3511 = vmatpush1.bf16.msra.mxu0 %v5923_v26  ;;  %3798 = vmatpush1.bf16.msra.mxu1 %v5926_v28 }
 0x15c   :  { %3512 = vmatprep.subr.bf16.mxu0 %v5931_v29  ;;  %3799 = vmatprep.subr.bf16.mxu1 %v5934_v30 }
 0x15f   :  { %3513 = vmatpush1.bf16.msra.mxu0 %v5929_v31  ;;  %3800 = vmatpush1.bf16.msra.mxu1 %v5932_v32 }
 0x160   :  { %3514 = vmatprep.subr.bf16.mxu0 %v5937_v35  ;;  %3801 = vmatprep.subr.bf16.mxu1 %v5940_v36 }
 0x163   :  { %3515 = vmatpush1.bf16.msra.mxu0 %v5935_v37  ;;  %3802 = vmatpush1.bf16.msra.mxu1 %v5938_v38 }
 0x164   :  { %3516 = vmatprep.subr.bf16.mxu0 %v5943_v39  ;;  %3803 = vmatprep.subr.bf16.mxu1 %v5946_v40 }
 0x167   :  { %3517 = vmatpush1.bf16.msra.mxu0 %v5941_v41  ;;  %3804 = vmatpush1.bf16.msra.mxu1 %v5944_v43 }
 0x168   :  { %3518 = vmatprep.subr.bf16.mxu0 %v5949_v44  ;;  %3805 = vmatprep.subr.bf16.mxu1 %v5952_v45 }
 0x16b   :  { %3519 = vmatpush1.bf16.msra.mxu0 %v5947_v46  ;;  %3806 = vmatpush1.bf16.msra.mxu1 %v5950_v48 }
 0x16c   :  { %3520 = vmatprep.subr.bf16.mxu0 %v5955_v50  ;;  %3807 = vmatprep.subr.bf16.mxu1 %v5958_v53 }
 0x16f   :  { %3521 = vmatpush1.bf16.msra.mxu0 %v5953_v54  ;;  %3808 = vmatpush1.bf16.msra.mxu1 %v5956_v55 }
 0x170   :  { %3522 = vmatprep.subr.bf16.mxu0 %v5961_v56  ;;  %3809 = vmatprep.subr.bf16.mxu1 %v5964_v57 }
 0x173   :  { %3523 = vmatpush1.bf16.msra.mxu0 %v5959_v58  ;;  %3810 = vmatpush1.bf16.msra.mxu1 %v5962_v59 }
 0x174   :  { %3524 = vmatprep.subr.bf16.mxu0 %v5967_v61  ;;  %3811 = vmatprep.subr.bf16.mxu1 %v5970_v62 }
 0x177   :  { %3525 = vmatpush1.bf16.msra.mxu0 %v5965_v0  ;;  %3812 = vmatpush1.bf16.msra.mxu1 %v5968_v1 }
 0x178   :  { %3526 = vmatprep.subr.bf16.mxu0 %v5973_v2  ;;  %3813 = vmatprep.subr.bf16.mxu1 %v5976_v34 }
 0x17b   :  { %3527 = vmatpush1.bf16.msra.mxu0 %v5971_v4  ;;  %3814 = vmatpush1.bf16.msra.mxu1 %v5974_v5 }
 0x17c   :  { %3528 = vmatprep.subr.bf16.mxu0 %v5979_v6  ;;  %3815 = vmatprep.subr.bf16.mxu1 %v5982_v7 }
 0x17f   :  { %3529 = vmatpush1.bf16.msra.mxu0 %v5977_v8  ;;  %3816 = vmatpush1.bf16.msra.mxu1 %v5980_v9 }
 0x180   :  { %3539 = vmatprep.subr.bf16.mxu0 %v5985_v10  ;;  %5162 = vmatprep.subr.bf16.mxu1 %v5997_v11 }
 0x182   :  { %3531 = vmatmul.mubr.bf16.vlgmr.msra.gmra.mrb[0].mxu0 %v7440_v12  ;;  %3818 = vmatmul.mubr.bf16.vlgmr.msra.gmra.mrb[0].mxu1 %v7440_v12 }
 0x183   :  { %3540 = vmatpush1.bf16.msra.mxu0 %v5983_v14  ;;  %3571 = vmatprep.mubr.bf16.mxu0 %v6158_v24 }
 0x184   :  { %3541 = vmatprep.subr.bf16.mxu0 %v5988_v52  ;;  %5163 = vmatpush3.bf16.msra.mxu1 %v5998_v16 }
 0x185   :  { %10 = vsyncpa [#allocation3], 0  ;;  %5164 = vmatprep.subr.bf16.mxu1 %v6001_v18  ;;  %v6005_v26 = vld [vmem:[%s7931_s1 + $0x420] ss:$20 sps:$4 sm:$0xff]   ;;  %3939 = vmatprep.mubr.bf16.mxu1 %v6424_v17  ;;  %v704_v28 = vrot.slane %v690_v21, %v6327_v49  ;;  %v6009_v30 = vld [vmem:[%s7931_s1 + $0x448] ss:$20 sps:$4 sm:$0xff]  }
 0x186   :  { %v6006_v29 = vld [vmem:[%s7931_s1 + $0x2e0] ss:$20 sps:$4 sm:$0xff]   ;;  %v5989_v17 = vld [vmem:[%s7931_s1 + $0xf08] ss:$20 sps:$4 sm:$0xff]   ;;  %vm3289_vm0 = vcmask 261120   ;;  %vm6160_vm1 = vmmov 0  }
 0x187   :  { %3542 = vmatpush1.bf16.msra.mxu0 %v5986_v19  ;;  %v7480_v31 = vrot.slane %v704_v28, %v6327_v49  ;;  %v5994_v32 = vld [vmem:[%s7931_s1 + $0xf34] ss:$20 sps:$4 sm:$0xff]   ;;  %v6013_v49 = vld [vmem:[%s7931_s1 + $0x470] ss:$20 sps:$4 sm:$0xff]   ;;  %v6017_v39 = vld [vmem:[%s7931_s1 + $0x498] ss:$20 sps:$4 sm:$0xff]  }
 0x188   :  { %3826 = vmatprep.subr.bf16.mxu0 %v5991_v22  ;;  %5165 = vmatpush3.bf16.msra.mxu1 %v6002_v25  ;;  %v6010_v35 = vld [vmem:[%s7931_s1 + $0x308] ss:$20 sps:$4 sm:$0xff]   ;;  %v5992_v36 = vld [vmem:[%s7931_s1 + $0xf30] ss:$20 sps:$4 sm:$0xff]   ;;  %v5999_v41 = vld [vmem:[%s7931_s1 + $0x178] ss:$20 sps:$4 sm:$0xff]  }
 0x189   :  { %5166 = vmatprep.subr.bf16.mxu1 %v6005_v26  ;;  %v5995_v37 = vld [vmem:[%s7931_s1 + $0x150] ss:$20 sps:$4 sm:$0xff]   ;;  %v6018_v43 = vld [vmem:[%s7931_s1 + $0x358] ss:$20 sps:$4 sm:$0xff]   ;;  %v6021_v44 = vld [vmem:[%s7931_s1 + $0x4c0] ss:$20 sps:$4 sm:$0xff]  }
 0x18a   :  { %v6014_v38 = vld [vmem:[%s7931_s1 + $0x330] ss:$20 sps:$4 sm:$0xff]   ;;  %v6000_v45 = vld [vmem:[%s7931_s1 + $0x38] ss:$20 sps:$4 sm:$0xff]   ;;  %v6003_v46 = vld [vmem:[%s7931_s1 + $0x1a0] ss:$20 sps:$4 sm:$0xff]  }
 0x18b   :  { %v5996_v40 = vld [vmem:[%s7931_s1 + $0x10] ss:$20 sps:$4 sm:$0xff]   ;;  %v6022_v48 = vld [vmem:[%s7931_s1 + $0x380] ss:$20 sps:$4 sm:$0xff]   ;;  %v6025_v50 = vld [vmem:[%s7931_s1 + $0x4e8] ss:$20 sps:$4 sm:$0xff]  }
 0x18c   :  { %5167 = vmatpush3.bf16.msra.mxu1 %v6006_v29  ;;  %v6007_v53 = vld [vmem:[%s7931_s1 + $0x1c8] ss:$20 sps:$4 sm:$0xff]   ;;  %v6029_v55 = vld [vmem:[%s7931_s1 + $0x8d0] ss:$20 sps:$4 sm:$0xff]   ;;  %v6033_v59 = vld [vmem:[%s7931_s1 + $0x8f8] ss:$20 sps:$4 sm:$0xff]  }
 0x18d   :  { %5168 = vmatprep.subr.bf16.mxu1 %v6009_v30  ;;  %v6026_v54 = vld [vmem:[%s7931_s1 + $0x3a8] ss:$20 sps:$4 sm:$0xff]   ;;  %v6011_v57 = vld [vmem:[%s7931_s1 + $0x1f0] ss:$20 sps:$4 sm:$0xff]   ;;  %v6015_v62 = vld [vmem:[%s7931_s1 + $0x218] ss:$20 sps:$4 sm:$0xff]  }
 0x18e   :  { %5097 = vmatmul.mubr.msk.bf16.vlgmr.msra.gmra.mrb[0].mxu0 %vm3289_vm0, %v7480_v31  ;;  %v6008_v56 = vld [vmem:[%s7931_s1 + $0x88] ss:$20 sps:$4 sm:$0xff]   ;;  %v6030_v58 = vld [vmem:[%s7931_s1 + $0x790] ss:$20 sps:$4 sm:$0xff]   ;;  %v6034_v0 = vld [vmem:[%s7931_s1 + $0x7b8] ss:$20 sps:$4 sm:$0xff]  }
 0x18f   :  { %3827 = vmatpush1.bf16.msra.mxu0 %v5989_v17  ;;  %3858 = vmatprep.mubr.bf16.mxu0 %v6158_v24  ;;  %v6012_v61 = vld [vmem:[%s7931_s1 + $0xb0] ss:$20 sps:$4 sm:$0xff]   ;;  %v6037_v1 = vld [vmem:[%s7931_s1 + $0x920] ss:$20 sps:$4 sm:$0xff]   ;;  %v6023_v5 = vld [vmem:[%s7931_s1 + $0x268] ss:$20 sps:$4 sm:$0xff]  }
 0x190   :  { %3828 = vmatprep.subr.bf16.mxu0 %v5994_v32  ;;  %5169 = vmatpush3.bf16.msra.mxu1 %v6010_v35  ;;  %v6019_v2 = vld [vmem:[%s7931_s1 + $0x240] ss:$20 sps:$4 sm:$0xff]   ;;  %v6042_v6 = vld [vmem:[%s7931_s1 + $0x808] ss:$20 sps:$4 sm:$0xff]   ;;  %v6045_v7 = vld [vmem:[%s7931_s1 + $0x970] ss:$20 sps:$4 sm:$0xff]  }
 0x191   :  { %5170 = vmatprep.subr.bf16.mxu1 %v6013_v49  ;;  %v6038_v34 = vld [vmem:[%s7931_s1 + $0x7e0] ss:$20 sps:$4 sm:$0xff]   ;;  %v6024_v8 = vld [vmem:[%s7931_s1 + $0x128] ss:$20 sps:$4 sm:$0xff]   ;;  %v6027_v9 = vld [vmem:[%s7931_s1 + $0x650] ss:$20 sps:$4 sm:$0xff]  }
 0x192   :  { %v6020_v4 = vld [vmem:[%s7931_s1 + $0x100] ss:$20 sps:$4 sm:$0xff]   ;;  %v6046_v10 = vld [vmem:[%s7931_s1 + $0x830] ss:$20 sps:$4 sm:$0xff]   ;;  %v6049_v11 = vld [vmem:[%s7931_s1 + $0x998] ss:$20 sps:$4 sm:$0xff]  }
 0x193   :  { %3829 = vmatpush1.bf16.msra.mxu0 %v5992_v36  ;;  %v6028_v14 = vld [vmem:[%s7931_s1 + $0x510] ss:$20 sps:$4 sm:$0xff]   ;;  %v6031_v52 = vld [vmem:[%s7931_s1 + $0x678] ss:$20 sps:$4 sm:$0xff]   ;;  %v6053_v18 = vld [vmem:[%s7931_s1 + $0x9c0] ss:$20 sps:$4 sm:$0xff]  }
 0x194   :  { %5140 = vmatprep.subr.bf16.mxu0 %v5995_v37  ;;  %5171 = vmatpush3.bf16.msra.mxu1 %v6014_v38  ;;  %v6050_v16 = vld [vmem:[%s7931_s1 + $0x858] ss:$20 sps:$4 sm:$0xff]   ;;  %v6035_v20 = vld [vmem:[%s7931_s1 + $0x6a0] ss:$20 sps:$4 sm:$0xff]   ;;  %v6039_v22 = vld [vmem:[%s7931_s1 + $0x6c8] ss:$20 sps:$4 sm:$0xff]  }
 0x195   :  { %5172 = vmatprep.subr.bf16.mxu1 %v6017_v39  ;;  %v6032_v19 = vld [vmem:[%s7931_s1 + $0x538] ss:$20 sps:$4 sm:$0xff]   ;;  %v6054_v21 = vld [vmem:[%s7931_s1 + $0x880] ss:$20 sps:$4 sm:$0xff]   ;;  %v6058_v24 = vld [vmem:[%s7931_s1 + $0x8a8] ss:$20 sps:$4 sm:$0xff]  }
 0x196   :  { %5098 = vmatmul.mubr.msk.bf16.vlgmr.msra.gmra.mrb[4].mxu0 %vm3289_vm0, %v7480_v31  ;;  %v6061_v25 = vld [vmem:[%s7931_s1 + $0xdd0] ss:$20 sps:$4 sm:$0xff]   ;;  %v6040_v26 = vld [vmem:[%s7931_s1 + $0x588] ss:$20 sps:$4 sm:$0xff]   ;;  %v6065_v30 = vld [vmem:[%s7931_s1 + $0xdf8] ss:$20 sps:$4 sm:$0xff]  }
 0x197   :  { %5141 = vmatpush3.bf16.msra.mxu0 %v5996_v40  ;;  %3899 = vmatprep.mubr.bf16.mxu0 %v6358_v60  ;;  %v6004_v60 = vld [vmem:[%s7931_s1 + $0x60] ss:$20 sps:$4 sm:$0xff]   ;;  %v6043_v28 = vld [vmem:[%s7931_s1 + $0x6f0] ss:$20 sps:$4 sm:$0xff]   ;;  %v6047_v32 = vld [vmem:[%s7931_s1 + $0x718] ss:$20 sps:$4 sm:$0xff]  }
 0x198   :  { %5142 = vmatprep.subr.bf16.mxu0 %v5999_v41  ;;  %5173 = vmatpush3.bf16.msra.mxu1 %v6018_v43  ;;  %v6062_v29 = vld [vmem:[%s7931_s1 + $0xc90] ss:$20 sps:$4 sm:$0xff]   ;;  %v6066_v35 = vld [vmem:[%s7931_s1 + $0xcb8] ss:$20 sps:$4 sm:$0xff]   ;;  %v6069_v49 = vld [vmem:[%s7931_s1 + $0xe20] ss:$20 sps:$4 sm:$0xff]  }
 0x199   :  { %5174 = vmatprep.subr.bf16.mxu1 %v6021_v44  ;;  %v6044_v17 = vld [vmem:[%s7931_s1 + $0x5b0] ss:$20 sps:$4 sm:$0xff]   ;;  %v6051_v36 = vld [vmem:[%s7931_s1 + $0x740] ss:$20 sps:$4 sm:$0xff]   ;;  %v6055_v39 = vld [vmem:[%s7931_s1 + $0x768] ss:$20 sps:$4 sm:$0xff]  }
 0x19a   :  { %v6070_v37 = vld [vmem:[%s7931_s1 + $0xce0] ss:$20 sps:$4 sm:$0xff]   ;;  %v6074_v40 = vld [vmem:[%s7931_s1 + $0xd08] ss:$20 sps:$4 sm:$0xff]   ;;  %v6077_v41 = vld [vmem:[%s7931_s1 + $0xe70] ss:$20 sps:$4 sm:$0xff]  }
 0x19b   :  { %5143 = vmatpush3.bf16.msra.mxu0 %v6000_v45  ;;  %v6052_v38 = vld [vmem:[%s7931_s1 + $0x600] ss:$20 sps:$4 sm:$0xff]   ;;  %v6056_v43 = vld [vmem:[%s7931_s1 + $0x628] ss:$20 sps:$4 sm:$0xff]   ;;  %v6059_v44 = vld [vmem:[%s7931_s1 + $0xb50] ss:$20 sps:$4 sm:$0xff]  }
 0x19c   :  { %5144 = vmatprep.subr.bf16.mxu0 %v6003_v46  ;;  %5175 = vmatpush3.bf16.msra.mxu1 %v6022_v48  ;;  %v6078_v45 = vld [vmem:[%s7931_s1 + $0xd30] ss:$20 sps:$4 sm:$0xff]   ;;  %v6081_v46 = vld [vmem:[%s7931_s1 + $0xe98] ss:$20 sps:$4 sm:$0xff]   ;;  %vm4468_vm2 = vcmask 1043456   ;;  %vm4464_vm3 = vcmask 719872  }
 0x19d   :  { %5176 = vmatprep.subr.bf16.mxu1 %v6025_v50  ;;  %v6060_v48 = vld [vmem:[%s7931_s1 + $0xa10] ss:$20 sps:$4 sm:$0xff]   ;;  %v6063_v50 = vld [vmem:[%s7931_s1 + $0xb78] ss:$20 sps:$4 sm:$0xff]   ;;  %s6161_s19 = smov [#allocation2]  }
 0x19e   :  { %s4599_s20 = sshll.u32 %s6161_s19, 4  ;;  %s4600_s20 = int_to_ptr.vmem [resolvable:$true] %s4599_s20 }
 0x19f   :  { %5145 = vmatpush3.bf16.msra.mxu0 %v6004_v60  ;;  %v6082_v60 = vld [vmem:[%s7931_s1 + $0xd58] ss:$20 sps:$4 sm:$0xff]   ;;  %s6133_s21 = scalar_lea.vmem %s4600_s20, 32  ;;  %p6138_p1 = scmp.lt.s32.totalorder %s4600_s20, %s4600_s20 }
 0x1a0   :  { %5146 = vmatprep.subr.bf16.mxu0 %v6007_v53  ;;  %5177 = vmatpush3.bf16.msra.mxu1 %v6026_v54  ;;  %v6085_v53 = vld [vmem:[%s7931_s1 + $0xec0] ss:$20 sps:$4 sm:$0xff]   ;;  %v6064_v54 = vld [vmem:[%s7931_s1 + $0xa38] ss:$20 sps:$4 sm:$0xff]   ;;  %p6134_p0 = scmp.ne.s32.totalorder %s4600_s20, %s6133_s21  ;;  %p6139_p2 = scmp.lt.s32.totalorder %s6133_s21, %s6133_s21 }
 0x1a1   :  { %5206 = vmatprep.subr.bf16.mxu1 %v6029_v55  ;;  %v6067_v55 = vld [vmem:[%s7931_s1 + $0xba0] ss:$20 sps:$4 sm:$0xff]  }
 0x1a2   :  { %p6140_p3 = por %p6139_p2, %p6138_p1 }
 0x1a3   :  { %5147 = vmatpush3.bf16.msra.mxu0 %v6008_v56  ;;  %3940 = vmatmul.mubr.bf16.vlgmr.msra.gmra.mrb[4].mxu1 %v6622_v23  ;;  %v6016_v23 = vld [vmem:[%s7931_s1 + $0xd8] ss:$20 sps:$4 sm:$0xff]   ;;  %v6086_v56 = vld [vmem:[%s7931_s1 + $0xd80] ss:$20 sps:$4 sm:$0xff]  }
 0x1a4   :  { %5148 = vmatprep.subr.bf16.mxu0 %v6011_v57  ;;  %5207 = vmatpush3.bf16.msra.mxu1 %v6030_v58  ;;  %v6071_v57 = vld [vmem:[%s7931_s1 + $0xbc8] ss:$20 sps:$4 sm:$0xff]   ;;  %p6141_p4 = pnand %p6140_p3, %p6134_p0 }
 0x1a5   :  { %5208 = vmatprep.subr.bf16.mxu1 %v6033_v59  ;;  %4019 = vmatprep.mubr.bf16.mxu1 %v6838_v15  ;;  %v6041_v15 = vld [vmem:[%s7931_s1 + $0x948] ss:$20 sps:$4 sm:$0xff]   ;;  %v6093_v59 = vld [vmem:[%s7933_s3 + $0x40] sm:$0xff]  }
 0x1a6   :  { %v6090_v58 = vld [vmem:[%s7931_s1 + $0xda8] ss:$20 sps:$4 sm:$0xff]  }
 0x1a7   :  { %5149 = vmatpush3.bf16.msra.mxu0 %v6012_v61  ;;  %v6072_v61 = vld [vmem:[%s7931_s1 + $0xa88] ss:$20 sps:$4 sm:$0xff]  }
 0x1a8   :  { %5150 = vmatprep.subr.bf16.mxu0 %v6015_v62  ;;  %5209 = vmatpush3.bf16.msra.mxu1 %v6034_v0  ;;  %v6075_v62 = vld [vmem:[%s7931_s1 + $0xbf0] ss:$20 sps:$4 sm:$0xff]  }
 0x1a9   :  { %5210 = vmatprep.subr.bf16.mxu1 %v6037_v1  ;;  %v6094_v0 = vld [vmem:[%s7933_s3] sm:$0xff]   ;;  %v6095_v1 = vld [vmem:[%s7933_s3 + $0x48] sm:$0xff]  }
 0x1ab   :  { %5151 = vmatpush3.bf16.msra.mxu0 %v6016_v23  ;;  %v6076_v23 = vld [vmem:[%s7931_s1 + $0xab0] ss:$20 sps:$4 sm:$0xff]  }
 0x1ac   :  { %5152 = vmatprep.subr.bf16.mxu0 %v6019_v2  ;;  %5211 = vmatpush3.bf16.msra.mxu1 %v6038_v34  ;;  %v6079_v2 = vld [vmem:[%s7931_s1 + $0xc18] ss:$20 sps:$4 sm:$0xff]  }
 0x1ad   :  { %5212 = vmatprep.subr.bf16.mxu1 %v6041_v15  ;;  %v6096_v34 = vld [vmem:[%s7933_s3 + $0x8] sm:$0xff]   ;;  %v6097_v15 = vld [vmem:[%s7933_s3 + $0x50] sm:$0xff]  }
 0x1af   :  { %5153 = vmatpush3.bf16.msra.mxu0 %v6020_v4  ;;  %v6083_v4 = vld [vmem:[%s7931_s1 + $0xc40] ss:$20 sps:$4 sm:$0xff]  }
 0x1b0   :  { %5154 = vmatprep.subr.bf16.mxu0 %v6023_v5  ;;  %5213 = vmatpush3.bf16.msra.mxu1 %v6042_v6  ;;  %v6099_v5 = vld [vmem:[%s7933_s3 + $0x10] sm:$0xff]   ;;  %v6101_v6 = vld [vmem:[%s7933_s3 + $0x58] sm:$0xff]  }
 0x1b1   :  { %5214 = vmatprep.subr.bf16.mxu1 %v6045_v7  ;;  %v6084_v7 = vld [vmem:[%s7931_s1 + $0xb00] ss:$20 sps:$4 sm:$0xff]  }
 0x1b3   :  { %5155 = vmatpush3.bf16.msra.mxu0 %v6024_v8  ;;  %v6087_v8 = vld [vmem:[%s7931_s1 + $0xc68] ss:$20 sps:$4 sm:$0xff]  }
 0x1b4   :  { %5184 = vmatprep.subr.bf16.mxu0 %v6027_v9  ;;  %5215 = vmatpush3.bf16.msra.mxu1 %v6046_v10  ;;  %v6103_v9 = vld [vmem:[%s7933_s3 + $0x18] sm:$0xff]   ;;  %v6105_v10 = vld [vmem:[%s7933_s3 + $0x60] sm:$0xff]  }
 0x1b5   :  { %5216 = vmatprep.subr.bf16.mxu1 %v6049_v11  ;;  %v6088_v11 = vld [vmem:[%s7931_s1 + $0xb28] ss:$20 sps:$4 sm:$0xff]  }
 0x1b6   :  { %3900 = vmatmul.mubr.bf16.vlgmr.msra.gmra.mrb[8].mxu0 %v6411_v13  ;;  %v6057_v13 = vld [vmem:[%s7931_s1 + $0x9e8] ss:$20 sps:$4 sm:$0xff]  }
 0x1b7   :  { %5185 = vmatpush3.bf16.msra.mxu0 %v6028_v14  ;;  %3979 = vmatprep.mubr.bf16.mxu0 %v6634_v27  ;;  %v6036_v27 = vld [vmem:[%s7931_s1 + $0x560] ss:$20 sps:$4 sm:$0xff]  }
 0x1b8   :  { %5186 = vmatprep.subr.bf16.mxu0 %v6031_v52  ;;  %5217 = vmatpush3.bf16.msra.mxu1 %v6050_v16  ;;  %v6107_v14 = vld [vmem:[%s7933_s3 + $0x20] sm:$0xff]   ;;  %v6109_v52 = vld [vmem:[%s7933_s3 + $0x68] sm:$0xff]  }
 0x1b9   :  { %5218 = vmatprep.subr.bf16.mxu1 %v6053_v18  ;;  %v6091_v16 = vld [vmem:[%s7931_s1 + $0xf10] ss:$20 sps:$4 sm:$0xff]   ;;  %v6159_v18 = vmov 0.0  }
 0x1bb   :  { %5187 = vmatpush3.bf16.msra.mxu0 %v6032_v19  ;;  %v6111_v19 = vld [vmem:[%s7933_s3 + $0x28] sm:$0xff]  }
 0x1bc   :  { %5188 = vmatprep.subr.bf16.mxu0 %v6035_v20  ;;  %5219 = vmatpush3.bf16.msra.mxu1 %v6054_v21  ;;  %v6113_v20 = vld [vmem:[%s7933_s3 + $0x70] sm:$0xff]   ;;  %v6092_v21 = vld [vmem:[%s7931_s1 + $0xf38] ss:$20 sps:$4 sm:$0xff]  }
 0x1bd   :  { %5220 = vmatprep.subr.bf16.mxu1 %v6057_v13  ;;  %v6098_v13 = vld [vmem:[%s7933_s3 + $0xc0] sm:$0xff]  }
 0x1bf   :  { %5189 = vmatpush3.bf16.msra.mxu0 %v6036_v27  ;;  %v6117_v27 = vld [vmem:[%s7933_s3 + $0x78] sm:$0xff]  }
 0x1c0   :  { %5190 = vmatprep.subr.bf16.mxu0 %v6039_v22  ;;  %5221 = vmatpush3.bf16.msra.mxu1 %v6058_v24  ;;  %v6100_v22 = vld [vmem:[%s7933_s3 + $0x80] sm:$0xff]   ;;  %v6102_v24 = vld [vmem:[%s7933_s3 + $0xc8] sm:$0xff]  }
 0x1c1   :  { %5250 = vmatprep.subr.bf16.mxu1 %v6061_v25  ;;  %v6119_v25 = vld [vmem:[%s7933_s3 + $0x38] sm:$0xff]  }
 0x1c3   :  { %5191 = vmatpush3.bf16.msra.mxu0 %v6040_v26  ;;  %4020 = vmatmul.mubr.bf16.vlgmr.msra.gmra.mrb[8].mxu1 %v7039_v47  ;;  %v6048_v47 = vld [vmem:[%s7931_s1 + $0x5d8] ss:$20 sps:$4 sm:$0xff]  }
 0x1c4   :  { %5192 = vmatprep.subr.bf16.mxu0 %v6043_v28  ;;  %5251 = vmatpush3.bf16.msra.mxu1 %v6062_v29  ;;  %v6104_v26 = vld [vmem:[%s7933_s3 + $0x88] sm:$0xff]   ;;  %v6106_v28 = vld [vmem:[%s7933_s3 + $0xd0] sm:$0xff]  }
 0x1c5   :  { %5252 = vmatprep.subr.bf16.mxu1 %v6065_v30  ;;  %4099 = vmatprep.mubr.bf16.mxu1 %v7255_v3  ;;  %v6073_v3 = vld [vmem:[%s7931_s1 + $0xe48] ss:$20 sps:$4 sm:$0xff]   ;;  %v6108_v29 = vld [vmem:[%s7933_s3 + $0x90] sm:$0xff]  }
 0x1c6   :  { %v6112_v30 = vld [vmem:[%s7933_s3 + $0x98] sm:$0xff]  }
 0x1c7   :  { %5193 = vmatpush3.bf16.msra.mxu0 %v6044_v17  ;;  %v6114_v17 = vld [vmem:[%s7933_s3 + $0xe0] sm:$0xff]  }
 0x1c8   :  { %5194 = vmatprep.subr.bf16.mxu0 %v6047_v32  ;;  %5253 = vmatpush3.bf16.msra.mxu1 %v6066_v35  ;;  %v6116_v32 = vld [vmem:[%s7933_s3 + $0xa0] sm:$0xff]   ;;  %v6118_v35 = vld [vmem:[%s7933_s3 + $0xe8] sm:$0xff]  }
 0x1c9   :  { %5254 = vmatprep.subr.bf16.mxu1 %v6069_v49  ;;  %v6120_v49 = vld [vmem:[%s7933_s3 + $0xa8] sm:$0xff]  }
 0x1cb   :  { %5195 = vmatpush3.bf16.msra.mxu0 %v6048_v47  ;;  %v6121_v47 = vld [vmem:[%s7933_s3 + $0xf0] sm:$0xff]  }
 0x1cc   :  { %5196 = vmatprep.subr.bf16.mxu0 %v6051_v36  ;;  %5255 = vmatpush3.bf16.msra.mxu1 %v6070_v37  ;;  %v6122_v36 = vld [vmem:[%s7933_s3 + $0xb0] sm:$0xff]   ;;  %v6123_v37 = vld [vmem:[%s7933_s3 + $0xf8] sm:$0xff]  }
 0x1cd   :  { %5256 = vmatprep.subr.bf16.mxu1 %v6073_v3  ;;  %v6124_v3 = vld [vmem:[%s7933_s3 + $0xb8] sm:$0xff]  }
 0x1cf   :  { %5197 = vmatpush3.bf16.msra.mxu0 %v6052_v38 }
 0x1d0   :  { %5198 = vmatprep.subr.bf16.mxu0 %v6055_v39  ;;  %5257 = vmatpush3.bf16.msra.mxu1 %v6074_v40 }
 0x1d1   :  { %5258 = vmatprep.subr.bf16.mxu1 %v6077_v41 }
 0x1d3   :  { %5199 = vmatpush3.bf16.msra.mxu0 %v6056_v43  ;;  %v616_v43 = vsub.s32 0, %v6309_v42 }
 0x1d4   :  { %5228 = vmatprep.subr.bf16.mxu0 %v6059_v44  ;;  %5259 = vmatpush3.bf16.msra.mxu1 %v6078_v45  ;;  %v620_v44 = vsub.s32 1, %v6309_v42  ;;  %v612_v45 = vld [vmem:[%s7932_s2] sm:$0x1f] }
 0x1d5   :  { %5260 = vmatprep.subr.bf16.mxu1 %v6081_v46  ;;  %v617_v46 = vrot.slane %v612_v45, %v616_v43 }
 0x1d6   :  { %3980 = vmatmul.mubr.bf16.vlgmr.msra.gmra.mrb[12].mxu0 %v6825_v33  ;;  %v6089_v33 = vld [vmem:[%s7931_s1 + $0xee8] ss:$20 sps:$4 sm:$0xff]  }
 0x1d7   :  { %5229 = vmatpush3.bf16.msra.mxu0 %v6060_v48  ;;  %4059 = vmatprep.mubr.bf16.mxu0 %v7048_v51  ;;  %v6068_v51 = vld [vmem:[%s7931_s1 + $0xa60] ss:$20 sps:$4 sm:$0xff]   ;;  %v621_v48 = vrot.slane %v612_v45, %v620_v44 }
 0x1d8   :  { %5230 = vmatprep.subr.bf16.mxu0 %v6063_v50  ;;  %5261 = vmatpush3.bf16.msra.mxu1 %v6082_v60  ;;  %v624_v50 = vsub.s32 2, %v6309_v42  ;;  %v628_v60 = vsub.s32 3, %v6309_v42 }
 0x1d9   :  { %5262 = vmatprep.subr.bf16.mxu1 %v6085_v53 }
 0x1db   :  { %5231 = vmatpush3.bf16.msra.mxu0 %v6064_v54 }
 0x1dc   :  { %5232 = vmatprep.subr.bf16.mxu0 %v6067_v55  ;;  %5263 = vmatpush3.bf16.msra.mxu1 %v6086_v56 }
 0x1dd   :  { %5264 = vmatprep.subr.bf16.mxu1 %v6089_v33 }
 0x1df   :  { %5233 = vmatpush3.bf16.msra.mxu0 %v6068_v51  ;;  %v625_v51 = vrot.slane %v612_v45, %v624_v50 }
 0x1e0   :  { %5234 = vmatprep.subr.bf16.mxu0 %v6071_v57  ;;  %5265 = vmatpush3.bf16.msra.mxu1 %v6090_v58 }
 0x1e1   :  { %5275 = vmatprep.subr.bf16.mxu1 %v6093_v59  ;;  %v629_v59 = vrot.slane %v612_v45, %v628_v60 }
 0x1e3   :  { %5235 = vmatpush3.bf16.msra.mxu0 %v6072_v61  ;;  %4100 = vmatmul.mubr.bf16.vlgmr.msra.gmra.mrb[12].mxu1 %v7440_v12  ;;  %v6080_v12 = vld [vmem:[%s7931_s1 + $0xad8] ss:$20 sps:$4 sm:$0xff]  }
 0x1e4   :  { %5236 = vmatprep.subr.bf16.mxu0 %v6075_v62  ;;  %5276 = vmatpush3.bf16.msra.mxu1 %v6094_v0  ;;  %v6125_v0 = vld [vmem:[%s7933_s3 + $0x100] sm:$0xff]  }
 0x1e5   :  { %5277 = vmatprep.subr.bf16.mxu1 %v6095_v1 }
 0x1e7   :  { %5237 = vmatpush3.bf16.msra.mxu0 %v6076_v23 }
 0x1e8   :  { %5238 = vmatprep.subr.bf16.mxu0 %v6079_v2  ;;  %5278 = vmatpush3.bf16.msra.mxu1 %v6096_v34 }
 0x1e9   :  { %5279 = vmatprep.subr.bf16.mxu1 %v6097_v15 }
 0x1eb   :  { %5239 = vmatpush3.bf16.msra.mxu0 %v6080_v12 }
 0x1ec   :  { %5240 = vmatprep.subr.bf16.mxu0 %v6083_v4  ;;  %5280 = vmatpush3.bf16.msra.mxu1 %v6099_v5 }
 0x1ed   :  { %5281 = vmatprep.subr.bf16.mxu1 %v6101_v6  ;;  %v6126_v6 = vld [vmem:[%s7933_s3 + $0x108] sm:$0xff]  }
 0x1ef   :  { %5241 = vmatpush3.bf16.msra.mxu0 %v6084_v7 }
 0x1f0   :  { %5242 = vmatprep.subr.bf16.mxu0 %v6087_v8  ;;  %5282 = vmatpush3.bf16.msra.mxu1 %v6103_v9 }
 0x1f1   :  { %5283 = vmatprep.subr.bf16.mxu1 %v6105_v10 }
 0x1f3   :  { %5243 = vmatpush3.bf16.msra.mxu0 %v6088_v11  ;;  %v6127_v11 = vld [vmem:[%s7933_s3 + $0x110] sm:$0xff]  }
 0x1f4   :  { %5326 = vmatprep.subr.bf16.mxu0 %v6159_v18  ;;  %5284 = vmatpush3.bf16.msra.mxu1 %v6107_v14 }
 0x1f5   :  { %5285 = vmatprep.subr.bf16.mxu1 %v6109_v52  ;;  %v6128_v52 = vld [vmem:[%s7933_s3 + $0x118] sm:$0xff]  }
 0x1f6   :  { %4060 = vmatmul.mubr.bf16.vlgmr.msra.gmra.mrb[16].mxu0 %v7239_v63  ;;  %v6115_v63 = vld [vmem:[%s7933_s3 + $0x30] sm:$0xff]  }
 0x1f7   :  { %5327 = vmatpush3.bf16.msra.mxu0 %v6091_v16  ;;  %5330 = vmatprep.mubr.msk.bf16.mxu0 %vm6160_vm1, %v6159_v18 }
 0x1f8   :  { %5328 = vmatprep.subr.bf16.mxu0 %v6159_v18  ;;  %5286 = vmatpush3.bf16.msra.mxu1 %v6111_v19 }
 0x1f9   :  { %5287 = vmatprep.subr.bf16.mxu1 %v6113_v20  ;;  %v6129_v20 = vld [vmem:[%s7933_s3 + $0x120] sm:$0xff]  }
 0x1fb   :  { %5329 = vmatpush3.bf16.msra.mxu0 %v6092_v21 }
 0x1fc   :  { %5297 = vmatprep.subr.bf16.mxu0 %v6098_v13  ;;  %5288 = vmatpush3.bf16.msra.mxu1 %v6115_v63  ;;  %v6130_v63 = vld [vmem:[%s7933_s3 + $0x128] ss:$0 sps:$4 sm:$0xff]  }
 0x1fd   :  { %5289 = vmatprep.subr.bf16.mxu1 %v6117_v27 }
 0x1fe   :  { %5331 = vmatmul.mubr.msk.bf16.vlgmr.msra.gmra.mrb[20].mxu0 %vm3289_vm0, %v7480_v31  ;;  %v6110_v31 = vld [vmem:[%s7933_s3 + $0xd8] sm:$0xff]  }
 0x1ff   :  { %5298 = vmatpush3.bf16.msra.mxu0 %v6100_v22  ;;  %v4470_v22 = vsel %vm4468_vm2, %v6130_v63, 0 }
 0x200   :  { %5299 = vmatprep.subr.bf16.mxu0 %v6102_v24  ;;  %5290 = vmatpush3.bf16.msra.mxu1 %v6119_v25  ;;  %v632_v24 = vsub.s32 4, %v6309_v42 }
 0x201   :  { %5334 = vmatprep.subr.bf16.mxu1 %v6159_v18 }
 0x203   :  { %5300 = vmatpush3.bf16.msra.mxu0 %v6104_v26  ;;  %v633_v26 = vrot.slane %v612_v45, %v632_v24 }
 0x204   :  { %5301 = vmatprep.subr.bf16.mxu0 %v6106_v28 }
 0x207   :  { %5302 = vmatpush3.bf16.msra.mxu0 %v6108_v29 }
 0x208   :  { %5303 = vmatprep.subr.bf16.mxu0 %v6110_v31 }
 0x20b   :  { %5304 = vmatpush3.bf16.msra.mxu0 %v6112_v30 }
 0x20c   :  { %5305 = vmatprep.subr.bf16.mxu0 %v6114_v17 }
 0x20f   :  { %5306 = vmatpush3.bf16.msra.mxu0 %v6116_v32 }
 0x210   :  { %5307 = vmatprep.subr.bf16.mxu0 %v6118_v35 }
 0x213   :  { %5308 = vmatpush3.bf16.msra.mxu0 %v6120_v49 }
 0x214   :  { %5309 = vmatprep.subr.bf16.mxu0 %v6121_v47 }
 0x217   :  { %5310 = vmatpush3.bf16.msra.mxu0 %v6122_v36 }
 0x218   :  { %5311 = vmatprep.subr.bf16.mxu0 %v6123_v37 }
 0x21b   :  { %5312 = vmatpush3.bf16.msra.mxu0 %v6124_v3 }
 0x255   :  { %v3819_v38 = vpop.f32.mrb[0].mxu1 }
 0x256   :  { %v3821_v39 = vpop.f32.mrb[1].mxu1  ;;  %v5352_v1 = vadd.f32 %v3819_v38, %v625_v51 }
 0x257   :  { %v3823_v40 = vpop.f32.mrb[2].mxu1  ;;  %v5354_v2 = vadd.f32 %v3821_v39, %v629_v59 }
 0x258   :  { %v3824_v41 = vpop.f32.mrb[3].mxu1 }
 0x261   :  { %v3573_v53 = vpop.f32.mrb[0].mxu0 }
 0x262   :  { %v5350_v54 = vadd.f32 %v3573_v53, %v617_v46  ;;  %v3575_v55 = vpop.f32.mrb[1].mxu0 }
 0x263   :  { %v5351_v56 = vadd.f32 %v3575_v55, %v621_v48  ;;  %v3577_v33 = vpop.f32.mrb[2].mxu0 }
 0x264   :  { %v4147_v57 = vmax.f32 %v5350_v54, 0.0  ;;  %v3578_v58 = vpop.f32.mrb[3].mxu0 }
 0x265   :  { %v4148_v61 = vmax.f32 %v5351_v56, 0.0 }
 0x266   :  { %v4152_v23 = vpack.c.bf16 %v4147_v57, %v4147_v57 }
 0x267   :  { %v4153_v62 = vpack.c.bf16 %v4148_v61, %v4148_v61 }
 0x269   :  { %v3860_v34 = vpop.f32.mrb[4].mxu0  ;;  %4504 = vmatprep.mubr.bf16.mxu1 %v4153_v62 }
 0x26a   :  { %v5353_v15 = vadd.f32 %v5352_v1, %v3860_v34  ;;  %v3862_v12 = vpop.f32.mrb[5].mxu0  ;;  %4505 = vmatmul.mubr.bf16.vlgmr.msra.gmra.mrb[16].mxu1 %v4152_v23 }
 0x26b   :  { %v5355_v4 = vadd.f32 %v5354_v2, %v3862_v12  ;;  %v3864_v5 = vpop.f32.mrb[6].mxu0  ;;  %5335 = vmatpush3.bf16.msra.mxu1 %v6125_v0  ;;  %5346 = vmatprep.mubr.msk.bf16.mxu1 %vm6160_vm1, %v6159_v18  ;;  %v5100_v12 = vld [vmem:[%s7934_s4] ss:$0 sm:$0xff] }
 0x26c   :  { %v4149_v7 = vmax.f32 %v5353_v15, 0.0  ;;  %v3865_v8 = vpop.f32.mrb[7].mxu0  ;;  %5336 = vmatprep.subr.bf16.mxu1 %v6159_v18 }
 0x26d   :  { %v4150_v9 = vmax.f32 %v5355_v4, 0.0 }
 0x26e   :  { %v4154_v14 = vpack.c.bf16 %v4149_v7, %v4149_v7 }
 0x26f   :  { %v4155_v10 = vpack.c.bf16 %v4150_v9, %v4150_v9  ;;  %5337 = vmatpush3.bf16.msra.mxu1 %v6126_v6 }
 0x270   :  { %5338 = vmatprep.subr.bf16.mxu1 %v6159_v18 }
 0x271   :  { %4544 = vmatprep.mubr.bf16.mxu0 %v4155_v10 }
 0x272   :  { %4545 = vmatmul.mubr.bf16.vlgmr.msra.gmra.mrb[24].mxu0 %v4154_v14 }
 0x273   :  { %5339 = vmatpush3.bf16.msra.mxu1 %v6127_v11 }
 0x274   :  { %5340 = vmatprep.subr.bf16.mxu1 %v6159_v18 }
 0x276   :  { %v5178_v16 = vpop.f32.mrb[4].mxu1 }
 0x277   :  { %v5179_v19 = vpop.f32.mrb[5].mxu1  ;;  %5341 = vmatpush3.bf16.msra.mxu1 %v6128_v52 }
 0x278   :  { %v5180_v21 = vadd.f32 %v5179_v19, %v5178_v16  ;;  %v5181_v13 = vpop.f32.mrb[6].mxu1  ;;  %5342 = vmatprep.subr.bf16.mxu1 %v6159_v18 }
 0x279   :  { %v5182_v27 = vpop.f32.mrb[7].mxu1 }
 0x27b   :  { %5343 = vmatpush3.bf16.msra.mxu1 %v6129_v20 }
 0x27c   :  { %5344 = vmatprep.subr.bf16.mxu1 %v6159_v18 }
 0x27f   :  { %5345 = vmatpush3.bf16.msra.mxu1 %v4470_v22 }
 0x289   :  { %v5156_v25 = vpop.f32.mrb[8].mxu0 }
 0x28a   :  { %v5157_v28 = vpop.f32.mrb[9].mxu0 }
 0x28b   :  { %v5158_v29 = vadd.f32 %v5157_v28, %v5156_v25  ;;  %v5159_v31 = vpop.f32.mrb[10].mxu0 }
 0x28c   :  { %v5160_v30 = vpop.f32.mrb[11].mxu0 }
 0x28d   :  { %v3902_v17 = vadd.f32 %v5158_v29, %v633_v26 }
 0x28f   :  { %v3942_v32 = vadd.f32 %v5180_v21, %v3902_v17 }
 0x296   :  { %v5222_v35 = vpop.f32.mrb[8].mxu1 }
 0x297   :  { %v5223_v49 = vpop.f32.mrb[9].mxu1 }
 0x298   :  { %v5224_v47 = vadd.f32 %v5223_v49, %v5222_v35  ;;  %v5225_v36 = vpop.f32.mrb[10].mxu1 }
 0x299   :  { %v5226_v37 = vpop.f32.mrb[11].mxu1 }
 0x2a9   :  { %v5200_v3 = vpop.f32.mrb[12].mxu0 }
 0x2aa   :  { %v5201_v38 = vpop.f32.mrb[13].mxu0 }
 0x2ab   :  { %v5202_v18 = vadd.f32 %v5201_v38, %v5200_v3  ;;  %v5203_v39 = vpop.f32.mrb[14].mxu0 }
 0x2ac   :  { %v5204_v40 = vpop.f32.mrb[15].mxu0 }
 0x2ad   :  { %v3982_v41 = vadd.f32 %v5202_v18, %v3942_v32 }
 0x2af   :  { %v4022_v42 = vadd.f32 %v5224_v47, %v3982_v41 }
 0x2b6   :  { %v5266_v43 = vpop.f32.mrb[12].mxu1 }
 0x2b7   :  { %v5267_v44 = vpop.f32.mrb[13].mxu1 }
 0x2b8   :  { %v5268_v45 = vadd.f32 %v5267_v44, %v5266_v43  ;;  %v5269_v46 = vpop.f32.mrb[14].mxu1 }
 0x2b9   :  { %v5270_v48 = vpop.f32.mrb[15].mxu1 }
 0x2c9   :  { %v5244_v50 = vpop.f32.mrb[16].mxu0 }
 0x2ca   :  { %v5245_v60 = vpop.f32.mrb[17].mxu0 }
 0x2cb   :  { %v5246_v53 = vadd.f32 %v5245_v60, %v5244_v50  ;;  %v5247_v54 = vpop.f32.mrb[18].mxu0 }
 0x2cc   :  { %v5248_v55 = vpop.f32.mrb[19].mxu0 }
 0x2cd   :  { %v4062_v56 = vadd.f32 %v5246_v53, %v4022_v42 }
 0x2cf   :  { %v4102_v33 = vadd.f32 %v5268_v45, %v4062_v56 }
 0x2d1   :  { %v4141_v51 = vpop.f32.mrb[20].mxu0 }
 0x2d2   :  { %v4142_v57 = vadd.f32 %v4141_v51, %v4102_v33  ;;  %v5332_v58 = vpop.f32.mrb[21].mxu0 }
 0x2d3   :  { %v4144_v59 = vpop.f32.mrb[22].mxu0 }
 0x2d4   :  { %v4151_v61 = vmax.f32 %v4142_v57, 0.0  ;;  %v5333_v62 = vpop.f32.mrb[23].mxu0 }
 0x2d6   :  { %v4156_v0 = vpack.c.bf16 %v4151_v61, %v4151_v61 }
 0x2d8   :  { %5347 = vmatmul.mubr.msk.bf16.vlgmr.msra.gmra.mrb[20].mxu1 %vm4464_vm3, %v4156_v0 }
 0x33d   :  { %v5291_v1 = vpop.f32.mrb[16].mxu1 }
 0x33e   :  { %v5292_v23 = vpop.f32.mrb[17].mxu1 }
 0x33f   :  { %v5293_v2 = vadd.f32 %v5292_v23, %v5291_v1  ;;  %v5294_v34 = vpop.f32.mrb[18].mxu1 }
 0x340   :  { %v5295_v15 = vpop.f32.mrb[19].mxu1 }
 0x341   :  { %v4507_v6 = vadd.f32 %v5293_v2, %v5100_v12 }
 0x345   :  { %v5313_v4 = vpop.f32.mrb[24].mxu0 }
 0x346   :  { %v5314_v5 = vpop.f32.mrb[25].mxu0 }
 0x347   :  { %v5315_v7 = vadd.f32 %v5314_v5, %v5313_v4  ;;  %v5316_v8 = vpop.f32.mrb[26].mxu0 }
 0x348   :  { %v5317_v9 = vpop.f32.mrb[27].mxu0 }
 0x349   :  { %v4547_v10 = vadd.f32 %v5315_v7, %v4507_v6 }
 0x3ab   :  { %v4586_v11 = vpop.f32.mrb[20].mxu1 }
 0x3ac   :  { %v4587_v14 = vadd.f32 %v4586_v11, %v4547_v10  ;;  %v5348_v52 = vpop.f32.mrb[21].mxu1 }
 0x3ad   :  { %v4589_v16 = vpop.f32.mrb[22].mxu1 }
 0x3ae   :  { %4592 = vst [vmem:[#allocation2] sm:$0x3] %v4587_v14  ;;  %v5349_v19 = vpop.f32.mrb[23].mxu1 }
 0x3af   :  { %6144 = shalt.err (!%p6141_p4)
}
 0x3b0   :  { %s6145_s23 = scalar_lea.hbm %s7935_s5, 32 }
 0x3b1   :  { %p6146_p5 = scmp.ne.s32.totalorder %s7935_s5, %s6145_s23  ;;  %p6149_p6 = scmp.lt.u32.totalorder %s6145_s23, %s7935_s5 }
 0x3b3   :  { %p6151_p7 = pnand %p6149_p6, %p6146_p5 }
 0x3b5   :  { %6154 = shalt.err (!%p6151_p7)
}
 0x3b6   :  { %4602 = dma.vmem_to_hbm [thread:$0]  %s4600_s20, 32, %s7935_s5, [#allocation3]  }
 0x3b7   :  { %6155 = dma.done.wait [#allocation3], 32  }
 0x3b8   :  { %6156 = vsyncadd [#allocation3], 4294967264 }
 0x3b9   :  { %4606 = vsyncpa [#allocation3], 1 }

</bundles_post_ra>
